<compile_context>
chip_gen: v7x
topology: tpu7x:2x2x1
jax: 0.10.0
libtpu: 0.0.40
codegen_flags: <defaults>
</compile_context>

<pallas_src>
import jax
import jax.numpy as jnp
from jax.experimental import pallas as pl
from jax.experimental.pallas import tpu as pltpu


# ---------------------------------------------------------------------------
# helpers
# ---------------------------------------------------------------------------
def _round_up(x, m):
    return (x + m - 1) // m * m


# 48 MiB scoped VMEM: within v7x's 64 MiB/TC, well under v5e/v6e's 128 MiB.
_VMEM_LIMIT = 48 * 1024 * 1024


# ---------------------------------------------------------------------------
# Pallas kernels
# ---------------------------------------------------------------------------
def _conv_pool_relu_kernel(x_ref, w_ref, b_ref, o_ref):
    """Stacked-phase conv + 2x2 max-pool + bias + ReLU.

    x_ref : (4, TM, Kp) bf16 -- one im2col LHS tile per 2x2 pooling-window
            position (phase).  Running max over phases keeps only two live
            f32 (TM, Cout) temporaries.
    w_ref : (Kp, Cout) bf16, resident across the grid.
    b_ref : (1, Cout)  f32 per-channel bias (commutes with the max).
    """
    w = w_ref[...]
    m = jnp.dot(x_ref[0], w, preferred_element_type=jnp.float32)
    for p in range(1, 4):
        m = jnp.maximum(m, jnp.dot(x_ref[p], w,
                                   preferred_element_type=jnp.float32))
    m = m + b_ref[...]
    o_ref[...] = jnp.maximum(m, 0.0).astype(o_ref.dtype)


def _head_kernel(x_ref, w_ref, b_ref, o_ref):
    """Global average pool over the (small) spatial axis fused with the FC."""
    xv = x_ref[...]                       # (N, S, C) bf16
    S = xv.shape[1]
    s = xv[:, 0, :].astype(jnp.float32)
    for i in range(1, S):
        s = s + xv[:, i, :].astype(jnp.float32)
    avg = s * (1.0 / float(S))
    y = jnp.dot(avg.astype(w_ref.dtype), w_ref[...],
                preferred_element_type=jnp.float32)
    o_ref[...] = (y + b_ref[...]).astype(o_ref.dtype)


# ---------------------------------------------------------------------------
# Wrappers (XLA glue feeding lane-dense bf16 Pallas kernels)
# ---------------------------------------------------------------------------
def conv_pool_relu_pallas(x_nhwc, w_oihw, b, *, tm_max=512):
    """relu(max_pool2d(conv2d(x, w, b), 2)) for NHWC x, stride-1 valid conv.

    Returns the pooled feature map in bf16, shape (N, Hp, Wp, Cout).
    """
    N, H, W, Cin = x_nhwc.shape
    Cout, Cin_w, kh, kw = w_oihw.shape
    assert Cin_w == Cin, (Cin_w, Cin)

    Ho, Wo = H - kh + 1, W - kw + 1
    Hp, Wp = Ho // 2, Wo // 2            # floor-pool, like PyTorch
    K = kh * kw * Cin
    Kp = _round_up(K, 128)               # lane-dense K
    Mp = N * Hp * Wp

    x_bf = x_nhwc.astype(jnp.bfloat16)

    # Phase-split im2col in bf16, stacked into one (4, Mp, Kp) operand.
    # Phase (p, q) holds the patches of conv-output pixels (2i+p, 2j+q),
    # i.e. one of the four positions of every 2x2 pooling window.
    # TODO(synk): replace with in-kernel patch extraction from an NHWC halo
    #             block to remove the kh*kw HBM read amplification.
    phase_mats = []
    for p in range(2):
        for q in range(2):
            pats = [x_bf[:, p + di:p + di + 2 * Hp:2,
                         q + dj:q + dj + 2 * Wp:2, :]
                    for di in range(kh) for dj in range(kw)]
            phase_mats.append(jnp.concatenate(pats, axis=-1).reshape(Mp, K))
    lhs = jnp.stack(phase_mats, axis=0)                 # (4, Mp, K)
    if Kp != K:
        lhs = jnp.pad(lhs, ((0, 0), (0, 0), (0, Kp - K)))

    # M tiling: TM multiple of 16 (bf16 sublane packing); force >=2 grid steps
    # when there are enough rows so the parallel axis can use both v7x cores.
    ngrid = pl.cdiv(Mp, tm_max)
    if Mp >= 32:
        ngrid = max(ngrid, 2)
    TM = _round_up(pl.cdiv(Mp, ngrid), 16)
    Mpad = TM * ngrid
    if Mpad != Mp:
        lhs = jnp.pad(lhs, ((0, 0), (0, Mpad - Mp), (0, 0)))

    # (Cout, Cin, kh, kw) -> (kh, kw, Cin, Cout) -> (K, Cout) -> (Kp, Cout)
    w2 = jnp.transpose(w_oihw, (2, 3, 1, 0)).reshape(K, Cout)
    w2 = jnp.pad(w2, ((0, Kp - K), (0, 0))).astype(jnp.bfloat16)
    b2 = b.astype(jnp.float32).reshape(1, Cout)

    flops = 2 * 4 * Mpad * Kp * Cout
    bytes_accessed = (4 * Mpad * Kp * 2 + Kp * Cout * 2
                      + Mpad * Cout * 2 + Cout * 4)

    out = pl.pallas_call(
        _conv_pool_relu_kernel,
        out_shape=jax.ShapeDtypeStruct((Mpad, Cout), jnp.bfloat16),
        grid=(ngrid,),
        in_specs=[pl.BlockSpec((4, TM, Kp), lambda i: (0, i, 0)),
                  pl.BlockSpec((Kp, Cout), lambda i: (0, 0)),   # resident
                  pl.BlockSpec((1, Cout), lambda i: (0, 0))],   # resident
        out_specs=pl.BlockSpec((TM, Cout), lambda i: (i, 0)),
        compiler_params=pltpu.CompilerParams(
            dimension_semantics=("parallel",),
            vmem_limit_bytes=_VMEM_LIMIT),
        cost_estimate=pl.CostEstimate(flops=flops, transcendentals=0,
                                      bytes_accessed=bytes_accessed),
    )(lhs, w2, b2)

    if Mpad != Mp:
        out = out[:Mp]
    return out.reshape(N, Hp, Wp, Cout)


def avgpool_fc_pallas(feat_nhwc, w_fc, b_fc):
    """adaptive_avg_pool2d(x, 1) -> view(-1, C) -> Linear, fused in one kernel."""
    N, Hs, Ws, C = feat_nhwc.shape
    out_dim, C_w = w_fc.shape
    assert C_w == C, (C_w, C)

    x = feat_nhwc.reshape(N, Hs * Ws, C)                    # bf16
    wt = jnp.transpose(w_fc).astype(jnp.bfloat16)           # (C, out_dim)
    bt = b_fc.astype(jnp.float32).reshape(1, out_dim)

    return pl.pallas_call(
        _head_kernel,
        out_shape=jax.ShapeDtypeStruct((N, out_dim), jnp.float32),
        in_specs=[pl.BlockSpec((N, Hs * Ws, C), lambda: (0, 0, 0)),
                  pl.BlockSpec((C, out_dim), lambda: (0, 0)),
                  pl.BlockSpec((1, out_dim), lambda: (0, 0))],
        out_specs=pl.BlockSpec((N, out_dim), lambda: (0, 0)),
        compiler_params=pltpu.CompilerParams(vmem_limit_bytes=_VMEM_LIMIT),
    )(x, wt, bt)


# ---------------------------------------------------------------------------
# Parameters (deterministic; kaiming-style weights, small random biases)
# ---------------------------------------------------------------------------
def init_params(key):
    def conv_p(k, cin, cout, ks):
        kw_, kb_ = jax.random.split(k)
        std = (2.0 / (cin * ks * ks)) ** 0.5
        w = jax.random.normal(kw_, (cout, cin, ks, ks), jnp.float32) * std
        b = jax.random.normal(kb_, (cout,), jnp.float32) * 0.01
        return w, b

    key, k1, k2, k3, k4 = jax.random.split(key, 5)
    params = {
        "conv1": conv_p(k1, 3, 64, 5),
        "conv2": conv_p(k2, 64, 128, 3),
        "conv3": conv_p(k3, 128, 128, 3),
    }
    kw_, kb_ = jax.random.split(k4)
    wfc = jax.random.normal(kw_, (10, 128), jnp.float32) * (1.0 / 128) ** 0.5
    bfc = jax.random.normal(kb_, (10,), jnp.float32) * 0.01
    params["fc1"] = (wfc, bfc)
    return params


# ---------------------------------------------------------------------------
# Forward pass (mirrors CNN3.forward)
# ---------------------------------------------------------------------------
def cnn3_forward(params, x_nchw):
    x = jnp.transpose(x_nchw, (0, 2, 3, 1))                        # NCHW->NHWC
    x = conv_pool_relu_pallas(x, *params["conv1"], tm_max=1024)    # (N,14,14,64)
    x = conv_pool_relu_pallas(x, *params["conv2"], tm_max=512)     # (N, 6, 6,128)
    x = conv_pool_relu_pallas(x, *params["conv3"], tm_max=512)     # (N, 2, 2,128)
    return avgpool_fc_pallas(x, *params["fc1"])                    # (N, 10)


# ---------------------------------------------------------------------------
# Pure-JAX f32 reference for a sanity check
# ---------------------------------------------------------------------------
def _ref_conv(x, w, b):
    y = jax.lax.conv_general_dilated(
        x, jnp.transpose(w, (2, 3, 1, 0)), (1, 1), "VALID",
        dimension_numbers=("NHWC", "HWIO", "NHWC"))
    return y + b.reshape(1, 1, 1, -1)


def _ref_pool_relu(x):
    N, H, W, C = x.shape
    Hp, Wp = H // 2, W // 2
    xr = x[:, :2 * Hp, :2 * Wp, :].reshape(N, Hp, 2, Wp, 2, C)
    return jnp.maximum(jnp.max(xr, axis=(2, 4)), 0.0)


def cnn3_ref(params, x_nchw):
    x = jnp.transpose(x_nchw, (0, 2, 3, 1))
    x = _ref_pool_relu(_ref_conv(x, *params["conv1"]))
    x = _ref_pool_relu(_ref_conv(x, *params["conv2"]))
    x = _ref_pool_relu(_ref_conv(x, *params["conv3"]))
    x = jnp.mean(x, axis=(1, 2))
    w, b = params["fc1"]
    return x @ w.T + b


# ---------------------------------------------------------------------------
if __name__ == "__main__":
    key = jax.random.PRNGKey(0)
    key, pkey, xkey = jax.random.split(key, 3)
    params = init_params(pkey)

    # CNN3 default input_shape=(3, 32, 32); small batch of 2.
    x = jax.random.normal(xkey, (2, 3, 32, 32), dtype=jnp.float32)

    fwd = jax.jit(cnn3_forward)
    out = jax.block_until_ready(fwd(params, x))
    assert out.shape == (2, 10), out.shape

    ref = jax.block_until_ready(cnn3_ref(params, x))
    # bf16 matmuls / bf16 activations vs. a pure-f32 reference -> loose tol.
    err = float(jnp.max(jnp.abs(out - ref)))
    assert jnp.allclose(out, ref, atol=1e-1, rtol=1e-1), err

    print("KERNEL_OK")
</pallas_src>

<mosaic_0001>
module attributes {stable_mosaic.version = 11 : i64} {
  func.func @_conv_pool_relu_kernel(%arg0: i32, %arg1: memref<4x208x128xbf16, #tpu.memory_space<vmem>>, %arg2: memref<128x64xbf16, #tpu.memory_space<vmem>>, %arg3: memref<1x64xf32, #tpu.memory_space<vmem>>, %arg4: memref<208x64xbf16, #tpu.memory_space<vmem>>) attributes {dimension_semantics = [#tpu.dimension_semantics<parallel>], iteration_bounds = array<i64: 2>, scalar_prefetch = 0 : i64, scratch_operands = 0 : i64, tpu.core_type = #tpu.core_type<tc>, window_params = [{transform_indices = @transform_0, window_bounds = array<i64: 4, 208, 128>}, {pipeline_mode = #tpu.pipeline_mode<synchronous>, transform_indices = @transform_1, window_bounds = array<i64: 128, 64>}, {pipeline_mode = #tpu.pipeline_mode<synchronous>, transform_indices = @transform_2, window_bounds = array<i64: 1, 64>}, {transform_indices = @transform_3, window_bounds = array<i64: 208, 64>}]} {
    %c0 = arith.constant 0 : index
    %c0_0 = arith.constant 0 : index
    %0 = vector.load %arg2[%c0, %c0_0] : memref<128x64xbf16, #tpu.memory_space<vmem>>, vector<128x64xbf16>
    %c0_1 = arith.constant 0 : index
    %c0_2 = arith.constant 0 : index
    %c0_3 = arith.constant 0 : index
    %1 = vector.load %arg1[%c0_1, %c0_2, %c0_3] : memref<4x208x128xbf16, #tpu.memory_space<vmem>>, vector<1x208x128xbf16>
    %2 = vector.shape_cast %1 : vector<1x208x128xbf16> to vector<208x128xbf16>
    %cst = arith.constant dense<0.000000e+00> : vector<208x64xf32>
    %3 = tpu.matmul %2, %0, %cst {dimension_numbers = #tpu.dot_dimension_numbers<[1], [0], [0], [1], [0, 0, 1, 1], [], []>} : vector<208x128xbf16>, vector<128x64xbf16>, vector<208x64xf32> -> vector<208x64xf32>
    %c1 = arith.constant 1 : index
    %c0_4 = arith.constant 0 : index
    %c0_5 = arith.constant 0 : index
    %4 = vector.load %arg1[%c1, %c0_4, %c0_5] : memref<4x208x128xbf16, #tpu.memory_space<vmem>>, vector<1x208x128xbf16>
    %5 = vector.shape_cast %4 : vector<1x208x128xbf16> to vector<208x128xbf16>
    %cst_6 = arith.constant dense<0.000000e+00> : vector<208x64xf32>
    %6 = tpu.matmul %5, %0, %cst_6 {dimension_numbers = #tpu.dot_dimension_numbers<[1], [0], [0], [1], [0, 0, 1, 1], [], []>} : vector<208x128xbf16>, vector<128x64xbf16>, vector<208x64xf32> -> vector<208x64xf32>
    %7 = arith.maximumf %3, %6 : vector<208x64xf32>
    %c2 = arith.constant 2 : index
    %c0_7 = arith.constant 0 : index
    %c0_8 = arith.constant 0 : index
    %8 = vector.load %arg1[%c2, %c0_7, %c0_8] : memref<4x208x128xbf16, #tpu.memory_space<vmem>>, vector<1x208x128xbf16>
    %9 = vector.shape_cast %8 : vector<1x208x128xbf16> to vector<208x128xbf16>
    %cst_9 = arith.constant dense<0.000000e+00> : vector<208x64xf32>
    %10 = tpu.matmul %9, %0, %cst_9 {dimension_numbers = #tpu.dot_dimension_numbers<[1], [0], [0], [1], [0, 0, 1, 1], [], []>} : vector<208x128xbf16>, vector<128x64xbf16>, vector<208x64xf32> -> vector<208x64xf32>
    %11 = arith.maximumf %7, %10 : vector<208x64xf32>
    %c3 = arith.constant 3 : index
    %c0_10 = arith.constant 0 : index
    %c0_11 = arith.constant 0 : index
    %12 = vector.load %arg1[%c3, %c0_10, %c0_11] : memref<4x208x128xbf16, #tpu.memory_space<vmem>>, vector<1x208x128xbf16>
    %13 = vector.shape_cast %12 : vector<1x208x128xbf16> to vector<208x128xbf16>
    %cst_12 = arith.constant dense<0.000000e+00> : vector<208x64xf32>
    %14 = tpu.matmul %13, %0, %cst_12 {dimension_numbers = #tpu.dot_dimension_numbers<[1], [0], [0], [1], [0, 0, 1, 1], [], []>} : vector<208x128xbf16>, vector<128x64xbf16>, vector<208x64xf32> -> vector<208x64xf32>
    %15 = arith.maximumf %11, %14 : vector<208x64xf32>
    %c0_13 = arith.constant 0 : index
    %c0_14 = arith.constant 0 : index
    %16 = vector.load %arg3[%c0_13, %c0_14] : memref<1x64xf32, #tpu.memory_space<vmem>>, vector<1x64xf32>
    %17 = vector.broadcast %16 : vector<1x64xf32> to vector<208x64xf32>
    %18 = arith.addf %15, %17 : vector<208x64xf32>
    %cst_15 = arith.constant 0.000000e+00 : f32
    %19 = vector.broadcast %cst_15 : f32 to vector<208x64xf32>
    %20 = arith.maximumf %18, %19 : vector<208x64xf32>
    %21 = arith.truncf %20 : vector<208x64xf32> to vector<208x64xbf16>
    %c0_16 = arith.constant 0 : index
    %c0_17 = arith.constant 0 : index
    %22 = vector.load %arg4[%c0_16, %c0_17] : memref<208x64xbf16, #tpu.memory_space<vmem>>, vector<208x64xbf16>
    tpu.vector_store %arg4[%c0_16, %c0_17], %21 {strides = array<i32>} : memref<208x64xbf16, #tpu.memory_space<vmem>>, vector<208x64xbf16>,
    return
  }
  func.func @transform_0(%arg0: i32) -> (i32, i32, i32) {
    %c0_i32 = arith.constant 0 : i32
    %c0_i32_0 = arith.constant 0 : i32
    %c0_i32_1 = arith.constant 0 : i32
    return %c0_i32, %arg0, %c0_i32_0 : i32, i32, i32
  }
  func.func @transform_1(%arg0: i32) -> (i32, i32) {
    %c0_i32 = arith.constant 0 : i32
    %c0_i32_0 = arith.constant 0 : i32
    %c0_i32_1 = arith.constant 0 : i32
    return %c0_i32, %c0_i32_0 : i32, i32
  }
  func.func @transform_2(%arg0: i32) -> (i32, i32) {
    %c0_i32 = arith.constant 0 : i32
    %c0_i32_0 = arith.constant 0 : i32
    %c0_i32_1 = arith.constant 0 : i32
    return %c0_i32, %c0_i32_0 : i32, i32
  }
  func.func @transform_3(%arg0: i32) -> (i32, i32) {
    %c0_i32 = arith.constant 0 : i32
    %c0_i32_0 = arith.constant 0 : i32
    return %arg0, %c0_i32 : i32, i32
  }
}

module attributes {stable_mosaic.version = 11 : i64} {
  func.func @_conv_pool_relu_kernel(%arg0: i32, %arg1: memref<4x48x640xbf16, #tpu.memory_space<vmem>>, %arg2: memref<640x128xbf16, #tpu.memory_space<vmem>>, %arg3: memref<1x128xf32, #tpu.memory_space<vmem>>, %arg4: memref<48x128xbf16, #tpu.memory_space<vmem>>) attributes {dimension_semantics = [#tpu.dimension_semantics<parallel>], iteration_bounds = array<i64: 2>, scalar_prefetch = 0 : i64, scratch_operands = 0 : i64, tpu.core_type = #tpu.core_type<tc>, window_params = [{transform_indices = @transform_0, window_bounds = array<i64: 4, 48, 640>}, {pipeline_mode = #tpu.pipeline_mode<synchronous>, transform_indices = @transform_1, window_bounds = array<i64: 640, 128>}, {pipeline_mode = #tpu.pipeline_mode<synchronous>, transform_indices = @transform_2, window_bounds = array<i64: 1, 128>}, {transform_indices = @transform_3, window_bounds = array<i64: 48, 128>}]} {
    %c0 = arith.constant 0 : index
    %c0_0 = arith.constant 0 : index
    %0 = vector.load %arg2[%c0, %c0_0] : memref<640x128xbf16, #tpu.memory_space<vmem>>, vector<640x128xbf16>
    %c0_1 = arith.constant 0 : index
    %c0_2 = arith.constant 0 : index
    %c0_3 = arith.constant 0 : index
    %1 = vector.load %arg1[%c0_1, %c0_2, %c0_3] : memref<4x48x640xbf16, #tpu.memory_space<vmem>>, vector<1x48x640xbf16>
    %2 = vector.shape_cast %1 : vector<1x48x640xbf16> to vector<48x640xbf16>
    %cst = arith.constant dense<0.000000e+00> : vector<48x128xf32>
    %3 = tpu.matmul %2, %0, %cst {dimension_numbers = #tpu.dot_dimension_numbers<[1], [0], [0], [1], [0, 0, 1, 1], [], []>} : vector<48x640xbf16>, vector<640x128xbf16>, vector<48x128xf32> -> vector<48x128xf32>
    %c1 = arith.constant 1 : index
    %c0_4 = arith.constant 0 : index
    %c0_5 = arith.constant 0 : index
    %4 = vector.load %arg1[%c1, %c0_4, %c0_5] : memref<4x48x640xbf16, #tpu.memory_space<vmem>>, vector<1x48x640xbf16>
    %5 = vector.shape_cast %4 : vector<1x48x640xbf16> to vector<48x640xbf16>
    %cst_6 = arith.constant dense<0.000000e+00> : vector<48x128xf32>
    %6 = tpu.matmul %5, %0, %cst_6 {dimension_numbers = #tpu.dot_dimension_numbers<[1], [0], [0], [1], [0, 0, 1, 1], [], []>} : vector<48x640xbf16>, vector<640x128xbf16>, vector<48x128xf32> -> vector<48x128xf32>
    %7 = arith.maximumf %3, %6 : vector<48x128xf32>
    %c2 = arith.constant 2 : index
    %c0_7 = arith.constant 0 : index
    %c0_8 = arith.constant 0 : index
    %8 = vector.load %arg1[%c2, %c0_7, %c0_8] : memref<4x48x640xbf16, #tpu.memory_space<vmem>>, vector<1x48x640xbf16>
    %9 = vector.shape_cast %8 : vector<1x48x640xbf16> to vector<48x640xbf16>
    %cst_9 = arith.constant dense<0.000000e+00> : vector<48x128xf32>
    %10 = tpu.matmul %9, %0, %cst_9 {dimension_numbers = #tpu.dot_dimension_numbers<[1], [0], [0], [1], [0, 0, 1, 1], [], []>} : vector<48x640xbf16>, vector<640x128xbf16>, vector<48x128xf32> -> vector<48x128xf32>
    %11 = arith.maximumf %7, %10 : vector<48x128xf32>
    %c3 = arith.constant 3 : index
    %c0_10 = arith.constant 0 : index
    %c0_11 = arith.constant 0 : index
    %12 = vector.load %arg1[%c3, %c0_10, %c0_11] : memref<4x48x640xbf16, #tpu.memory_space<vmem>>, vector<1x48x640xbf16>
    %13 = vector.shape_cast %12 : vector<1x48x640xbf16> to vector<48x640xbf16>
    %cst_12 = arith.constant dense<0.000000e+00> : vector<48x128xf32>
    %14 = tpu.matmul %13, %0, %cst_12 {dimension_numbers = #tpu.dot_dimension_numbers<[1], [0], [0], [1], [0, 0, 1, 1], [], []>} : vector<48x640xbf16>, vector<640x128xbf16>, vector<48x128xf32> -> vector<48x128xf32>
    %15 = arith.maximumf %11, %14 : vector<48x128xf32>
    %c0_13 = arith.constant 0 : index
    %c0_14 = arith.constant 0 : index
    %16 = vector.load %arg3[%c0_13, %c0_14] : memref<1x128xf32, #tpu.memory_space<vmem>>, vector<1x128xf32>
    %17 = vector.broadcast %16 : vector<1x128xf32> to vector<48x128xf32>
    %18 = arith.addf %15, %17 : vector<48x128xf32>
    %cst_15 = arith.constant 0.000000e+00 : f32
    %19 = vector.broadcast %cst_15 : f32 to vector<48x128xf32>
    %20 = arith.maximumf %18, %19 : vector<48x128xf32>
    %21 = arith.truncf %20 : vector<48x128xf32> to vector<48x128xbf16>
    %c0_16 = arith.constant 0 : index
    %c0_17 = arith.constant 0 : index
    %22 = vector.load %arg4[%c0_16, %c0_17] : memref<48x128xbf16, #tpu.memory_space<vmem>>, vector<48x128xbf16>
    tpu.vector_store %arg4[%c0_16, %c0_17], %21 {strides = array<i32>} : memref<48x128xbf16, #tpu.memory_space<vmem>>, vector<48x128xbf16>,
    return
  }
  func.func @transform_0(%arg0: i32) -> (i32, i32, i32) {
    %c0_i32 = arith.constant 0 : i32
    %c0_i32_0 = arith.constant 0 : i32
    %c0_i32_1 = arith.constant 0 : i32
    return %c0_i32, %arg0, %c0_i32_0 : i32, i32, i32
  }
  func.func @transform_1(%arg0: i32) -> (i32, i32) {
    %c0_i32 = arith.constant 0 : i32
    %c0_i32_0 = arith.constant 0 : i32
    %c0_i32_1 = arith.constant 0 : i32
    return %c0_i32, %c0_i32_0 : i32, i32
  }
  func.func @transform_2(%arg0: i32) -> (i32, i32) {
    %c0_i32 = arith.constant 0 : i32
    %c0_i32_0 = arith.constant 0 : i32
    %c0_i32_1 = arith.constant 0 : i32
    return %c0_i32, %c0_i32_0 : i32, i32
  }
  func.func @transform_3(%arg0: i32) -> (i32, i32) {
    %c0_i32 = arith.constant 0 : i32
    %c0_i32_0 = arith.constant 0 : i32
    return %arg0, %c0_i32 : i32, i32
  }
}

module attributes {stable_mosaic.version = 11 : i64} {
  func.func @_conv_pool_relu_kernel(%arg0: i32, %arg1: memref<4x16x1152xbf16, #tpu.memory_space<vmem>>, %arg2: memref<1152x128xbf16, #tpu.memory_space<vmem>>, %arg3: memref<1x128xf32, #tpu.memory_space<vmem>>, %arg4: memref<16x128xbf16, #tpu.memory_space<vmem>>) attributes {dimension_semantics = [#tpu.dimension_semantics<parallel>], iteration_bounds = array<i64: 1>, scalar_prefetch = 0 : i64, scratch_operands = 0 : i64, tpu.core_type = #tpu.core_type<tc>, window_params = [{transform_indices = @transform_0, window_bounds = array<i64: 4, 16, 1152>}, {pipeline_mode = #tpu.pipeline_mode<synchronous>, transform_indices = @transform_1, window_bounds = array<i64: 1152, 128>}, {pipeline_mode = #tpu.pipeline_mode<synchronous>, transform_indices = @transform_2, window_bounds = array<i64: 1, 128>}, {transform_indices = @transform_3, window_bounds = array<i64: 16, 128>}]} {
    %c0 = arith.constant 0 : index
    %c0_0 = arith.constant 0 : index
    %0 = vector.load %arg2[%c0, %c0_0] : memref<1152x128xbf16, #tpu.memory_space<vmem>>, vector<1152x128xbf16>
    %c0_1 = arith.constant 0 : index
    %c0_2 = arith.constant 0 : index
    %c0_3 = arith.constant 0 : index
    %1 = vector.load %arg1[%c0_1, %c0_2, %c0_3] : memref<4x16x1152xbf16, #tpu.memory_space<vmem>>, vector<1x16x1152xbf16>
    %2 = vector.shape_cast %1 : vector<1x16x1152xbf16> to vector<16x1152xbf16>
    %cst = arith.constant dense<0.000000e+00> : vector<16x128xf32>
    %3 = tpu.matmul %2, %0, %cst {dimension_numbers = #tpu.dot_dimension_numbers<[1], [0], [0], [1], [0, 0, 1, 1], [], []>} : vector<16x1152xbf16>, vector<1152x128xbf16>, vector<16x128xf32> -> vector<16x128xf32>
    %c1 = arith.constant 1 : index
    %c0_4 = arith.constant 0 : index
    %c0_5 = arith.constant 0 : index
    %4 = vector.load %arg1[%c1, %c0_4, %c0_5] : memref<4x16x1152xbf16, #tpu.memory_space<vmem>>, vector<1x16x1152xbf16>
    %5 = vector.shape_cast %4 : vector<1x16x1152xbf16> to vector<16x1152xbf16>
    %cst_6 = arith.constant dense<0.000000e+00> : vector<16x128xf32>
    %6 = tpu.matmul %5, %0, %cst_6 {dimension_numbers = #tpu.dot_dimension_numbers<[1], [0], [0], [1], [0, 0, 1, 1], [], []>} : vector<16x1152xbf16>, vector<1152x128xbf16>, vector<16x128xf32> -> vector<16x128xf32>
    %7 = arith.maximumf %3, %6 : vector<16x128xf32>
    %c2 = arith.constant 2 : index
    %c0_7 = arith.constant 0 : index
    %c0_8 = arith.constant 0 : index
    %8 = vector.load %arg1[%c2, %c0_7, %c0_8] : memref<4x16x1152xbf16, #tpu.memory_space<vmem>>, vector<1x16x1152xbf16>
    %9 = vector.shape_cast %8 : vector<1x16x1152xbf16> to vector<16x1152xbf16>
    %cst_9 = arith.constant dense<0.000000e+00> : vector<16x128xf32>
    %10 = tpu.matmul %9, %0, %cst_9 {dimension_numbers = #tpu.dot_dimension_numbers<[1], [0], [0], [1], [0, 0, 1, 1], [], []>} : vector<16x1152xbf16>, vector<1152x128xbf16>, vector<16x128xf32> -> vector<16x128xf32>
    %11 = arith.maximumf %7, %10 : vector<16x128xf32>
    %c3 = arith.constant 3 : index
    %c0_10 = arith.constant 0 : index
    %c0_11 = arith.constant 0 : index
    %12 = vector.load %arg1[%c3, %c0_10, %c0_11] : memref<4x16x1152xbf16, #tpu.memory_space<vmem>>, vector<1x16x1152xbf16>
    %13 = vector.shape_cast %12 : vector<1x16x1152xbf16> to vector<16x1152xbf16>
    %cst_12 = arith.constant dense<0.000000e+00> : vector<16x128xf32>
    %14 = tpu.matmul %13, %0, %cst_12 {dimension_numbers = #tpu.dot_dimension_numbers<[1], [0], [0], [1], [0, 0, 1, 1], [], []>} : vector<16x1152xbf16>, vector<1152x128xbf16>, vector<16x128xf32> -> vector<16x128xf32>
    %15 = arith.maximumf %11, %14 : vector<16x128xf32>
    %c0_13 = arith.constant 0 : index
    %c0_14 = arith.constant 0 : index
    %16 = vector.load %arg3[%c0_13, %c0_14] : memref<1x128xf32, #tpu.memory_space<vmem>>, vector<1x128xf32>
    %17 = vector.broadcast %16 : vector<1x128xf32> to vector<16x128xf32>
    %18 = arith.addf %15, %17 : vector<16x128xf32>
    %cst_15 = arith.constant 0.000000e+00 : f32
    %19 = vector.broadcast %cst_15 : f32 to vector<16x128xf32>
    %20 = arith.maximumf %18, %19 : vector<16x128xf32>
    %21 = arith.truncf %20 : vector<16x128xf32> to vector<16x128xbf16>
    %c0_16 = arith.constant 0 : index
    %c0_17 = arith.constant 0 : index
    %22 = vector.load %arg4[%c0_16, %c0_17] : memref<16x128xbf16, #tpu.memory_space<vmem>>, vector<16x128xbf16>
    tpu.vector_store %arg4[%c0_16, %c0_17], %21 {strides = array<i32>} : memref<16x128xbf16, #tpu.memory_space<vmem>>, vector<16x128xbf16>,
    return
  }
  func.func @transform_0(%arg0: i32) -> (i32, i32, i32) {
    %c0_i32 = arith.constant 0 : i32
    %c0_i32_0 = arith.constant 0 : i32
    %c0_i32_1 = arith.constant 0 : i32
    return %c0_i32, %arg0, %c0_i32_0 : i32, i32, i32
  }
  func.func @transform_1(%arg0: i32) -> (i32, i32) {
    %c0_i32 = arith.constant 0 : i32
    %c0_i32_0 = arith.constant 0 : i32
    %c0_i32_1 = arith.constant 0 : i32
    return %c0_i32, %c0_i32_0 : i32, i32
  }
  func.func @transform_2(%arg0: i32) -> (i32, i32) {
    %c0_i32 = arith.constant 0 : i32
    %c0_i32_0 = arith.constant 0 : i32
    %c0_i32_1 = arith.constant 0 : i32
    return %c0_i32, %c0_i32_0 : i32, i32
  }
  func.func @transform_3(%arg0: i32) -> (i32, i32) {
    %c0_i32 = arith.constant 0 : i32
    %c0_i32_0 = arith.constant 0 : i32
    return %arg0, %c0_i32 : i32, i32
  }
}

module attributes {stable_mosaic.version = 11 : i64} {
  func.func @_head_kernel(%arg0: memref<2x4x128xbf16, #tpu.memory_space<vmem>>, %arg1: memref<128x10xbf16, #tpu.memory_space<vmem>>, %arg2: memref<1x10xf32, #tpu.memory_space<vmem>>, %arg3: memref<2x10xf32, #tpu.memory_space<vmem>>) attributes {dimension_semantics = [], scalar_prefetch = 0 : i64, scratch_operands = 0 : i64, tpu.core_type = #tpu.core_type<tc>} {
    %c0 = arith.constant 0 : index
    %c0_0 = arith.constant 0 : index
    %c0_1 = arith.constant 0 : index
    %0 = vector.load %arg0[%c0, %c0_0, %c0_1] : memref<2x4x128xbf16, #tpu.memory_space<vmem>>, vector<2x4x128xbf16>
    %1 = vector.extract_strided_slice %0 {offsets = [0, 0, 0], sizes = [2, 1, 128], strides = [1, 1, 1]} : vector<2x4x128xbf16> to vector<2x1x128xbf16>
    %2 = vector.shape_cast %1 : vector<2x1x128xbf16> to vector<2x128xbf16>
    %3 = arith.extf %2 : vector<2x128xbf16> to vector<2x128xf32>
    %4 = vector.extract_strided_slice %0 {offsets = [0, 1, 0], sizes = [2, 1, 128], strides = [1, 1, 1]} : vector<2x4x128xbf16> to vector<2x1x128xbf16>
    %5 = vector.shape_cast %4 : vector<2x1x128xbf16> to vector<2x128xbf16>
    %6 = arith.extf %5 : vector<2x128xbf16> to vector<2x128xf32>
    %7 = arith.addf %3, %6 : vector<2x128xf32>
    %8 = vector.extract_strided_slice %0 {offsets = [0, 2, 0], sizes = [2, 1, 128], strides = [1, 1, 1]} : vector<2x4x128xbf16> to vector<2x1x128xbf16>
    %9 = vector.shape_cast %8 : vector<2x1x128xbf16> to vector<2x128xbf16>
    %10 = arith.extf %9 : vector<2x128xbf16> to vector<2x128xf32>
    %11 = arith.addf %7, %10 : vector<2x128xf32>
    %12 = vector.extract_strided_slice %0 {offsets = [0, 3, 0], sizes = [2, 1, 128], strides = [1, 1, 1]} : vector<2x4x128xbf16> to vector<2x1x128xbf16>
    %13 = vector.shape_cast %12 : vector<2x1x128xbf16> to vector<2x128xbf16>
    %14 = arith.extf %13 : vector<2x128xbf16> to vector<2x128xf32>
    %15 = arith.addf %11, %14 : vector<2x128xf32>
    %cst = arith.constant 2.500000e-01 : f32
    %16 = vector.broadcast %cst : f32 to vector<2x128xf32>
    %17 = arith.mulf %15, %16 : vector<2x128xf32>
    %18 = arith.truncf %17 : vector<2x128xf32> to vector<2x128xbf16>
    %c0_2 = arith.constant 0 : index
    %c0_3 = arith.constant 0 : index
    %19 = vector.load %arg1[%c0_2, %c0_3] : memref<128x10xbf16, #tpu.memory_space<vmem>>, vector<128x10xbf16>
    %cst_4 = arith.constant dense<0.000000e+00> : vector<2x10xf32>
    %20 = tpu.matmul %18, %19, %cst_4 {dimension_numbers = #tpu.dot_dimension_numbers<[1], [0], [0], [1], [0, 0, 1, 1], [], []>} : vector<2x128xbf16>, vector<128x10xbf16>, vector<2x10xf32> -> vector<2x10xf32>
    %c0_5 = arith.constant 0 : index
    %c0_6 = arith.constant 0 : index
    %21 = vector.load %arg2[%c0_5, %c0_6] : memref<1x10xf32, #tpu.memory_space<vmem>>, vector<1x10xf32>
    %22 = vector.broadcast %21 : vector<1x10xf32> to vector<2x10xf32>
    %23 = arith.addf %20, %22 : vector<2x10xf32>
    %c0_7 = arith.constant 0 : index
    %c0_8 = arith.constant 0 : index
    %24 = vector.load %arg3[%c0_7, %c0_8] : memref<2x10xf32, #tpu.memory_space<vmem>>, vector<2x10xf32>
    tpu.vector_store %arg3[%c0_7, %c0_8], %23 {strides = array<i32>} : memref<2x10xf32, #tpu.memory_space<vmem>>, vector<2x10xf32>,
    return
  }
}

</mosaic_0001>

<bundles_post_ra>
// kernel: cnn3_forward.4
= control target key start
LH: loop header
LB: loop body
LE: loop exit
PB: predicated region body
PF: predicated region fallthrough
CT: control target
= control target key end

     0   :  { %s2680_s12 = smov 0   ;;  %s2682_s13 = smov 0   ;;  %s3373_s0 = inlined_call_operand.vmem [shape: bf16[4,416,128], index: 0, kind: input, shape index: {}]   ;;  %s3374_s1 = inlined_call_operand.vmem [shape: bf16[128,64], index: 1, kind: input, shape index: {}]   ;;  %s3375_s2 = inlined_call_operand.vmem [shape: f32[1,64], index: 2, kind: input, shape index: {}]   ;;  %s3376_s3 = inlined_call_operand.vmem [shape: bf16[416,64], index: 3, kind: output, shape index: {}]  }
   0x1   :  { %s2684_s14 = smov 0  }
   0x2 LB: > { %s1989_s15 = sadd.s32 4294967295, %s2656_s14   ;;  %s2697_s16 = sadd.s32 1, %s2656_s14   ;;  %s2656_s14 = sphi %s2684_s14, %s3410_s14   ;;  %s2652_s13 = sphi %s2682_s13, %s3409_s13   ;;  %s2648_s12 = sphi %s2680_s12, %s3408_s12  }
   0x3   : > { %s17_s17 = ssub.s32 %s2656_s14, %s2697_s16  ;;  %s20_s18 = sadd.s32 1, %s2652_s13 }
   0x4   : > { %p18_p0 = scmp.eq.s32.totalorder %s17_s17, 0  ;;  %p27_p1 = scmp.ne.s32.totalorder %s2652_s13, %s2648_s12 }
   0x5   : > { %p28_p2 = scmp.eq.s32.totalorder %s2656_s14, 0  ;;  %p1992_p4 = scmp.ge.s32.totalorder %s2656_s14, 2 }
   0x6   : > { %s2706_s19 = scalar_select %p18_p0, %s2652_s13, %s20_s18  }
   0x7   : > { %p29_p3 = por %p28_p2, %p27_p1  ;;  %127 = sbr.rel (%p1992_p4) target bundleno = 45 (0x2d), region = 24 }
   0xe   : > { %130 = sbr.rel (!%p29_p3) target bundleno = 45 (0x2d), region = 28  ;;  %s132_s20 = sand.u32 (%p29_p3), 1, %s2652_s13  }
   0xf   : > { %s2163_s21 = smul.u32 (%p29_p3), 104, %s2656_s14 }
  0x10   : > { %s2546_s22 = smul.u32 (%p29_p3), 416, %s132_s20 }
  0x11   : > { %s2714_s25 = scalar_lea.vmem (%p29_p3), %s3373_s0, %s2163_s21 }
  0x12   : > { %v153_v0 = vld [vmem:[%s2714_s25] sm:$0xff] (%p29_p3)   ;;  %v157_v1 = vld [vmem:[%s2714_s25 + $0x8] sm:$0xff] (%p29_p3)   ;;  %v161_v2 = vld [vmem:[%s2714_s25 + $0x10] sm:$0xff] (%p29_p3)   ;;  %s2719_s26 = scalar_lea.vmem (%p29_p3), [#allocation2], %s2546_s22 }
  0x13   : > { %154 = vst [vmem:[%s2719_s26] sm:$0xff] (%p29_p3), %v153_v0   ;;  %158 = vst [vmem:[%s2719_s26 + $0x8] sm:$0xff] (%p29_p3), %v157_v1   ;;  %v165_v3 = vld [vmem:[%s2714_s25 + $0x18] sm:$0xff] (%p29_p3)   ;;  %v169_v4 = vld [vmem:[%s2714_s25 + $0x20] sm:$0xff] (%p29_p3)  }
  0x14   : > { %162 = vst [vmem:[%s2719_s26 + $0x10] sm:$0xff] (%p29_p3), %v161_v2   ;;  %v173_v5 = vld [vmem:[%s2714_s25 + $0x28] sm:$0xff] (%p29_p3)   ;;  %166 = vst [vmem:[%s2719_s26 + $0x18] sm:$0xff] (%p29_p3), %v165_v3   ;;  %v177_v6 = vld [vmem:[%s2714_s25 + $0x30] sm:$0xff] (%p29_p3)  }
  0x15   : > { %170 = vst [vmem:[%s2719_s26 + $0x20] sm:$0xff] %v169_v4   ;;  %174 = vst [vmem:[%s2719_s26 + $0x28] sm:$0xff] %v173_v5   ;;  %v181_v7 = vld [vmem:[%s2714_s25 + $0x38] sm:$0xff]   ;;  %v185_v8 = vld [vmem:[%s2714_s25 + $0x40] sm:$0xff]  }
  0x16   : > { %178 = vst [vmem:[%s2719_s26 + $0x30] sm:$0xff] %v177_v6   ;;  %182 = vst [vmem:[%s2719_s26 + $0x38] sm:$0xff] %v181_v7   ;;  %v189_v9 = vld [vmem:[%s2714_s25 + $0x48] sm:$0xff]   ;;  %v193_v10 = vld [vmem:[%s2714_s25 + $0x50] sm:$0xff]  }
  0x17   : > { %186 = vst [vmem:[%s2719_s26 + $0x40] sm:$0xff] %v185_v8   ;;  %v197_v11 = vld [vmem:[%s2714_s25 + $0x58] sm:$0xff]   ;;  %190 = vst [vmem:[%s2719_s26 + $0x48] sm:$0xff] %v189_v9   ;;  %v201_v12 = vld [vmem:[%s2714_s25 + $0x60] sm:$0xff]  }
  0x18   : > { %194 = vst [vmem:[%s2719_s26 + $0x50] sm:$0xff] %v193_v10   ;;  %198 = vst [vmem:[%s2719_s26 + $0x58] sm:$0xff] %v197_v11   ;;  %v205_v13 = vld [vmem:[%s2714_s25 + $0xd0] sm:$0xff]   ;;  %v209_v14 = vld [vmem:[%s2714_s25 + $0xd8] sm:$0xff]  }
  0x19   : > { %202 = vst [vmem:[%s2719_s26 + $0x60] sm:$0xff] %v201_v12   ;;  %206 = vst [vmem:[%s2719_s26 + $0x68] sm:$0xff] %v205_v13   ;;  %v213_v15 = vld [vmem:[%s2714_s25 + $0xe0] sm:$0xff]   ;;  %v217_v16 = vld [vmem:[%s2714_s25 + $0xe8] sm:$0xff]  }
  0x1a   : > { %210 = vst [vmem:[%s2719_s26 + $0x70] sm:$0xff] %v209_v14   ;;  %v221_v17 = vld [vmem:[%s2714_s25 + $0xf0] sm:$0xff]   ;;  %214 = vst [vmem:[%s2719_s26 + $0x78] sm:$0xff] %v213_v15   ;;  %v225_v18 = vld [vmem:[%s2714_s25 + $0xf8] sm:$0xff]  }
  0x1b   : > { %218 = vst [vmem:[%s2719_s26 + $0x80] sm:$0xff] %v217_v16   ;;  %222 = vst [vmem:[%s2719_s26 + $0x88] sm:$0xff] %v221_v17   ;;  %v229_v19 = vld [vmem:[%s2714_s25 + $0x100] sm:$0xff]   ;;  %v233_v20 = vld [vmem:[%s2714_s25 + $0x108] sm:$0xff]  }
  0x1c   : > { %226 = vst [vmem:[%s2719_s26 + $0x90] sm:$0xff] %v225_v18   ;;  %230 = vst [vmem:[%s2719_s26 + $0x98] sm:$0xff] %v229_v19   ;;  %v237_v21 = vld [vmem:[%s2714_s25 + $0x110] sm:$0xff]   ;;  %v241_v22 = vld [vmem:[%s2714_s25 + $0x118] sm:$0xff]  }
  0x1d   : > { %234 = vst [vmem:[%s2719_s26 + $0xa0] sm:$0xff] %v233_v20   ;;  %v245_v23 = vld [vmem:[%s2714_s25 + $0x120] sm:$0xff]   ;;  %238 = vst [vmem:[%s2719_s26 + $0xa8] sm:$0xff] %v237_v21   ;;  %v249_v24 = vld [vmem:[%s2714_s25 + $0x128] sm:$0xff]  }
  0x1e   : > { %242 = vst [vmem:[%s2719_s26 + $0xb0] sm:$0xff] %v241_v22   ;;  %246 = vst [vmem:[%s2719_s26 + $0xb8] sm:$0xff] %v245_v23   ;;  %v253_v25 = vld [vmem:[%s2714_s25 + $0x130] sm:$0xff]   ;;  %v257_v26 = vld [vmem:[%s2714_s25 + $0x1a0] sm:$0xff]  }
  0x1f   : > { %250 = vst [vmem:[%s2719_s26 + $0xc0] sm:$0xff] %v249_v24   ;;  %254 = vst [vmem:[%s2719_s26 + $0xc8] sm:$0xff] %v253_v25   ;;  %v261_v27 = vld [vmem:[%s2714_s25 + $0x1a8] sm:$0xff]   ;;  %v265_v28 = vld [vmem:[%s2714_s25 + $0x1b0] sm:$0xff]  }
  0x20   : > { %258 = vst [vmem:[%s2719_s26 + $0xd0] sm:$0xff] %v257_v26   ;;  %v269_v29 = vld [vmem:[%s2714_s25 + $0x1b8] sm:$0xff]   ;;  %262 = vst [vmem:[%s2719_s26 + $0xd8] sm:$0xff] %v261_v27   ;;  %v273_v30 = vld [vmem:[%s2714_s25 + $0x1c0] sm:$0xff]  }
  0x21   : > { %266 = vst [vmem:[%s2719_s26 + $0xe0] sm:$0xff] %v265_v28   ;;  %270 = vst [vmem:[%s2719_s26 + $0xe8] sm:$0xff] %v269_v29   ;;  %v277_v31 = vld [vmem:[%s2714_s25 + $0x1c8] sm:$0xff]   ;;  %v281_v32 = vld [vmem:[%s2714_s25 + $0x1d0] sm:$0xff]  }
  0x22   : > { %274 = vst [vmem:[%s2719_s26 + $0xf0] sm:$0xff] %v273_v30   ;;  %278 = vst [vmem:[%s2719_s26 + $0xf8] sm:$0xff] %v277_v31   ;;  %v285_v33 = vld [vmem:[%s2714_s25 + $0x1d8] sm:$0xff]   ;;  %v289_v34 = vld [vmem:[%s2714_s25 + $0x1e0] sm:$0xff]  }
  0x23   : > { %282 = vst [vmem:[%s2719_s26 + $0x100] sm:$0xff] %v281_v32   ;;  %v293_v35 = vld [vmem:[%s2714_s25 + $0x1e8] sm:$0xff]   ;;  %286 = vst [vmem:[%s2719_s26 + $0x108] sm:$0xff] %v285_v33   ;;  %v297_v36 = vld [vmem:[%s2714_s25 + $0x1f0] sm:$0xff]  }
  0x24   : > { %290 = vst [vmem:[%s2719_s26 + $0x110] sm:$0xff] %v289_v34   ;;  %294 = vst [vmem:[%s2719_s26 + $0x118] sm:$0xff] %v293_v35   ;;  %v301_v37 = vld [vmem:[%s2714_s25 + $0x1f8] sm:$0xff]   ;;  %v305_v38 = vld [vmem:[%s2714_s25 + $0x200] sm:$0xff]  }
  0x25   : > { %298 = vst [vmem:[%s2719_s26 + $0x120] sm:$0xff] %v297_v36   ;;  %302 = vst [vmem:[%s2719_s26 + $0x128] sm:$0xff] %v301_v37   ;;  %v309_v39 = vld [vmem:[%s2714_s25 + $0x270] sm:$0xff]   ;;  %v313_v40 = vld [vmem:[%s2714_s25 + $0x278] sm:$0xff]  }
  0x26   : > { %306 = vst [vmem:[%s2719_s26 + $0x130] sm:$0xff] %v305_v38   ;;  %v317_v41 = vld [vmem:[%s2714_s25 + $0x280] sm:$0xff]   ;;  %310 = vst [vmem:[%s2719_s26 + $0x138] sm:$0xff] %v309_v39   ;;  %v321_v42 = vld [vmem:[%s2714_s25 + $0x288] sm:$0xff]  }
  0x27   : > { %314 = vst [vmem:[%s2719_s26 + $0x140] sm:$0xff] %v313_v40   ;;  %318 = vst [vmem:[%s2719_s26 + $0x148] sm:$0xff] %v317_v41   ;;  %v325_v43 = vld [vmem:[%s2714_s25 + $0x290] sm:$0xff]   ;;  %v329_v44 = vld [vmem:[%s2714_s25 + $0x298] sm:$0xff]  }
  0x28   : > { %322 = vst [vmem:[%s2719_s26 + $0x150] sm:$0xff] %v321_v42   ;;  %326 = vst [vmem:[%s2719_s26 + $0x158] sm:$0xff] %v325_v43   ;;  %v333_v45 = vld [vmem:[%s2714_s25 + $0x2a0] sm:$0xff]   ;;  %v337_v46 = vld [vmem:[%s2714_s25 + $0x2a8] sm:$0xff]  }
  0x29   : > { %330 = vst [vmem:[%s2719_s26 + $0x160] sm:$0xff] %v329_v44   ;;  %v341_v47 = vld [vmem:[%s2714_s25 + $0x2b0] sm:$0xff]   ;;  %334 = vst [vmem:[%s2719_s26 + $0x168] sm:$0xff] %v333_v45   ;;  %v345_v48 = vld [vmem:[%s2714_s25 + $0x2b8] sm:$0xff]  }
  0x2a   : > { %338 = vst [vmem:[%s2719_s26 + $0x170] sm:$0xff] %v337_v46   ;;  %342 = vst [vmem:[%s2719_s26 + $0x178] sm:$0xff] %v341_v47   ;;  %v349_v49 = vld [vmem:[%s2714_s25 + $0x2c0] sm:$0xff]   ;;  %v353_v50 = vld [vmem:[%s2714_s25 + $0x2c8] sm:$0xff]  }
  0x2b   : > { %346 = vst [vmem:[%s2719_s26 + $0x180] sm:$0xff] %v345_v48   ;;  %350 = vst [vmem:[%s2719_s26 + $0x188] sm:$0xff] %v349_v49   ;;  %v357_v51 = vld [vmem:[%s2714_s25 + $0x2d0] sm:$0xff]  }
  0x2c   : > { %354 = vst [vmem:[%s2719_s26 + $0x190] sm:$0xff] %v353_v50   ;;  %358 = vst [vmem:[%s2719_s26 + $0x198] sm:$0xff] %v357_v51  }
  0x2d PF: > { %p1994_p5 = scmp.ge.s32.totalorder %s2656_s14, 1  ;;  %p590_p6 = scmp.lt.s32.totalorder %s2656_s14, 3 }
  0x2f   : > { %p591_p7 = pnand %p1994_p5, %p590_p6 }
  0x31   : > { %594 = sbr.rel (%p591_p7) target bundleno = 514 (0x202), region = 69 }
  0x38   : > { %v2574_v52 = vld [vmem:[%s3374_s1] sm:$0xff]   ;;  %v2658_v53 = vmov 0.0   ;;  %v2575_v54 = vld [vmem:[%s3374_s1 + $0x8] sm:$0xff]   ;;  %s597_s4 = sand.u32 1, %s2648_s12   ;;  %vm2659_vm0 = vmmov 0   ;;  %v2576_v55 = vld [vmem:[%s3374_s1 + $0x10] sm:$0xff]  }
  0x39   : > { %2274 = vmatprep.subr.bf16.mxu0 %v2658_v53  ;;  %2342 = vmatprep.subr.bf16.mxu1 %v2658_v53  ;;  %s2547_s5 = smul.u32 416, %s597_s4  ;;  %v2577_v56 = vld [vmem:[%s3374_s1 + $0x18] sm:$0xff]   ;;  %v2578_v57 = vld [vmem:[%s3374_s1 + $0x20] sm:$0xff]   ;;  %v2579_v58 = vld [vmem:[%s3374_s1 + $0x28] sm:$0xff]   ;;  %vm1900_vm1 = vcmask 519168  }
  0x3a   : > { %2275 = vmatpush3.bf16.msra.mxu0 %v2574_v52  ;;  %2343 = vmatpush3.bf16.msra.mxu1 %v2574_v52  ;;  %v2580_v59 = vld [vmem:[%s3374_s1 + $0x30] sm:$0xff]   ;;  %v2581_v60 = vld [vmem:[%s3374_s1 + $0x38] sm:$0xff]   ;;  %s621_s24 = smul.u32 26, %s1989_s15 }
  0x3b   : > { %2276 = vmatprep.subr.bf16.mxu0 %v2658_v53  ;;  %2344 = vmatprep.subr.bf16.mxu1 %v2658_v53  ;;  %s2844_s8 = scalar_lea.vmem [#allocation2], %s2547_s5 }
  0x3c   : > { %2290 = vmatprep.mubr.msk.bf16.mxu0 %vm2659_vm0, %v2658_v53  ;;  %2358 = vmatprep.mubr.msk.bf16.mxu1 %vm2659_vm0, %v2658_v53  ;;  %v2582_v61 = vld [vmem:[%s2844_s8] sm:$0xff]   ;;  %v2583_v62 = vld [vmem:[%s2844_s8 + $0x68] sm:$0xff]   ;;  %v2585_v0 = vld [vmem:[%s2844_s8 + $0x70] sm:$0xff]   ;;  %p622_p8 = scmp.lt.s32.totalorder %s621_s24, 51 }
  0x3d   : > { %v2584_v63 = vld [vmem:[%s2844_s8 + $0x8] sm:$0xff]   ;;  %v2586_v1 = vld [vmem:[%s2844_s8 + $0x10] sm:$0xff]   ;;  %v2587_v2 = vld [vmem:[%s2844_s8 + $0x78] sm:$0xff]  }
  0x3e   : > { %2277 = vmatpush3.bf16.msra.mxu0 %v2575_v54  ;;  %2345 = vmatpush3.bf16.msra.mxu1 %v2575_v54  ;;  %v2588_v3 = vld [vmem:[%s2844_s8 + $0x18] sm:$0xff]   ;;  %v2589_v4 = vld [vmem:[%s2844_s8 + $0x80] sm:$0xff]   ;;  %v2591_v6 = vld [vmem:[%s2844_s8 + $0x88] sm:$0xff]   ;;  %s3412_s24 = smov (!%p622_p8, %s621_s24), 51 }
  0x3f   : > { %2278 = vmatprep.subr.bf16.mxu0 %v2658_v53  ;;  %2346 = vmatprep.subr.bf16.mxu1 %v2658_v53  ;;  %v2590_v5 = vld [vmem:[%s2844_s8 + $0x20] sm:$0xff]   ;;  %v2592_v7 = vld [vmem:[%s2844_s8 + $0x28] sm:$0xff]   ;;  %v2593_v8 = vld [vmem:[%s2844_s8 + $0x90] sm:$0xff]   ;;  %s1995_s25 = sshll.u32 %s3412_s24, 2 }
  0x40   : > { %v2594_v9 = vld [vmem:[%s2844_s8 + $0x30] sm:$0xff]   ;;  %v2595_v10 = vld [vmem:[%s2844_s8 + $0x98] sm:$0xff]   ;;  %v2597_v12 = vld [vmem:[%s2844_s8 + $0xa0] sm:$0xff]   ;;  %s3213_s28 = scalar_lea.vmem %s3376_s3, %s1995_s25 }
  0x41   : > { %v2596_v11 = vld [vmem:[%s2844_s8 + $0x38] sm:$0xff]   ;;  %v2598_v13 = vld [vmem:[%s2844_s8 + $0x40] sm:$0xff]   ;;  %v2599_v14 = vld [vmem:[%s2844_s8 + $0xa8] sm:$0xff]  }
  0x42   : > { %2279 = vmatpush3.bf16.msra.mxu0 %v2576_v55  ;;  %2347 = vmatpush3.bf16.msra.mxu1 %v2576_v55  ;;  %v2600_v15 = vld [vmem:[%s2844_s8 + $0x48] sm:$0xff]   ;;  %v2601_v16 = vld [vmem:[%s2844_s8 + $0xb0] sm:$0xff]   ;;  %v2603_v18 = vld [vmem:[%s2844_s8 + $0xb8] sm:$0xff]  }
  0x43   : > { %2280 = vmatprep.subr.bf16.mxu0 %v2658_v53  ;;  %2348 = vmatprep.subr.bf16.mxu1 %v2658_v53  ;;  %v2602_v17 = vld [vmem:[%s2844_s8 + $0x50] sm:$0xff]   ;;  %v2604_v19 = vld [vmem:[%s2844_s8 + $0x58] sm:$0xff]   ;;  %v2605_v20 = vld [vmem:[%s2844_s8 + $0xc0] sm:$0xff]  }
  0x44   : > { %v2606_v21 = vld [vmem:[%s2844_s8 + $0x60] sm:$0xff]   ;;  %v2607_v22 = vld [vmem:[%s2844_s8 + $0xc8] sm:$0xff]   ;;  %v2608_v23 = vld [vmem:[%s2844_s8 + $0xd0] sm:$0xff]  }
  0x45   : > { %v2609_v24 = vld [vmem:[%s2844_s8 + $0x138] sm:$0xff]   ;;  %v2611_v26 = vld [vmem:[%s2844_s8 + $0x140] sm:$0xff]   ;;  %v2613_v28 = vld [vmem:[%s2844_s8 + $0x148] sm:$0xff]  }
  0x46   : > { %2281 = vmatpush3.bf16.msra.mxu0 %v2577_v56  ;;  %2349 = vmatpush3.bf16.msra.mxu1 %v2577_v56  ;;  %v2610_v25 = vld [vmem:[%s2844_s8 + $0xd8] sm:$0xff]   ;;  %v2612_v27 = vld [vmem:[%s2844_s8 + $0xe0] sm:$0xff]   ;;  %v2614_v29 = vld [vmem:[%s2844_s8 + $0xe8] sm:$0xff]  }
  0x47   : > { %2282 = vmatprep.subr.bf16.mxu0 %v2658_v53  ;;  %2350 = vmatprep.subr.bf16.mxu1 %v2658_v53  ;;  %v2615_v30 = vld [vmem:[%s2844_s8 + $0x150] sm:$0xff]   ;;  %v2617_v32 = vld [vmem:[%s2844_s8 + $0x158] sm:$0xff]   ;;  %v2619_v34 = vld [vmem:[%s2844_s8 + $0x160] sm:$0xff]  }
  0x48   : > { %v2616_v31 = vld [vmem:[%s2844_s8 + $0xf0] sm:$0xff]   ;;  %v2618_v33 = vld [vmem:[%s2844_s8 + $0xf8] sm:$0xff]   ;;  %v2620_v35 = vld [vmem:[%s2844_s8 + $0x100] sm:$0xff]  }
  0x49   : > { %v2621_v36 = vld [vmem:[%s2844_s8 + $0x168] sm:$0xff]   ;;  %v2623_v38 = vld [vmem:[%s2844_s8 + $0x170] sm:$0xff]   ;;  %v2625_v40 = vld [vmem:[%s2844_s8 + $0x178] sm:$0xff]  }
  0x4a   : > { %2283 = vmatpush3.bf16.msra.mxu0 %v2578_v57  ;;  %2351 = vmatpush3.bf16.msra.mxu1 %v2578_v57  ;;  %v2622_v37 = vld [vmem:[%s2844_s8 + $0x108] sm:$0xff]   ;;  %v2624_v39 = vld [vmem:[%s2844_s8 + $0x110] sm:$0xff]   ;;  %v2626_v41 = vld [vmem:[%s2844_s8 + $0x118] sm:$0xff]  }
  0x4b   : > { %2284 = vmatprep.subr.bf16.mxu0 %v2658_v53  ;;  %2352 = vmatprep.subr.bf16.mxu1 %v2658_v53  ;;  %v2627_v42 = vld [vmem:[%s2844_s8 + $0x180] sm:$0xff]   ;;  %v2629_v44 = vld [vmem:[%s2844_s8 + $0x188] sm:$0xff]   ;;  %v2631_v46 = vld [vmem:[%s2844_s8 + $0x190] sm:$0xff]  }
  0x4c   : > { %v2628_v43 = vld [vmem:[%s2844_s8 + $0x120] sm:$0xff]   ;;  %v2630_v45 = vld [vmem:[%s2844_s8 + $0x128] sm:$0xff]   ;;  %v2632_v47 = vld [vmem:[%s2844_s8 + $0x130] sm:$0xff]  }
  0x4d   : > { %v2633_v48 = vld [vmem:[%s2844_s8 + $0x198] sm:$0xff]  }
  0x4e   : > { %2285 = vmatpush3.bf16.msra.mxu0 %v2579_v58  ;;  %2353 = vmatpush3.bf16.msra.mxu1 %v2579_v58 }
  0x4f   : > { %2286 = vmatprep.subr.bf16.mxu0 %v2658_v53  ;;  %2354 = vmatprep.subr.bf16.mxu1 %v2658_v53 }
  0x52   : > { %2287 = vmatpush3.bf16.msra.mxu0 %v2580_v59  ;;  %2355 = vmatpush3.bf16.msra.mxu1 %v2580_v59 }
  0x53   : > { %2288 = vmatprep.subr.bf16.mxu0 %v2658_v53  ;;  %2356 = vmatprep.subr.bf16.mxu1 %v2658_v53 }
  0x56   : > { %2289 = vmatpush3.bf16.msra.mxu0 %v2581_v60  ;;  %2357 = vmatpush3.bf16.msra.mxu1 %v2581_v60 }
  0x57   : > { %2410 = vmatprep.subr.bf16.mxu0 %v2658_v53  ;;  %2478 = vmatprep.subr.bf16.mxu1 %v2658_v53 }
  0x59   : > { %2291 = vmatmul.mubr.bf16.vlgmr.msra.gmra.mrb[0].mxu0 %v2582_v61  ;;  %2359 = vmatmul.mubr.bf16.vlgmr.msra.gmra.mrb[0].mxu1 %v2583_v62 }
  0x5a   : > { %2411 = vmatpush3.bf16.msra.mxu0 %v2574_v52  ;;  %2479 = vmatpush3.bf16.msra.mxu1 %v2574_v52 }
  0x5b   : > { %2294 = vmatprep.mubr.msk.bf16.mxu0 %vm2659_vm0, %v2658_v53  ;;  %2362 = vmatprep.mubr.msk.bf16.mxu1 %vm2659_vm0, %v2658_v53 }
  0x5c   : > { %2412 = vmatprep.subr.bf16.mxu0 %v2658_v53  ;;  %2480 = vmatprep.subr.bf16.mxu1 %v2658_v53 }
  0x5e   : > { %2413 = vmatpush3.bf16.msra.mxu0 %v2575_v54  ;;  %2481 = vmatpush3.bf16.msra.mxu1 %v2575_v54 }
  0x5f   : > { %2414 = vmatprep.subr.bf16.mxu0 %v2658_v53  ;;  %2482 = vmatprep.subr.bf16.mxu1 %v2658_v53 }
  0x61   : > { %2295 = vmatmul.mubr.bf16.gmra.mrb[4].mxu0 %v2584_v63  ;;  %2363 = vmatmul.mubr.bf16.gmra.mrb[4].mxu1 %v2585_v0 }
  0x62   : > { %2298 = vmatprep.mubr.msk.bf16.mxu0 %vm2659_vm0, %v2658_v53  ;;  %2366 = vmatprep.mubr.msk.bf16.mxu1 %vm2659_vm0, %v2658_v53 }
  0x63   : > { %2415 = vmatpush3.bf16.msra.mxu0 %v2576_v55  ;;  %2483 = vmatpush3.bf16.msra.mxu1 %v2576_v55 }
  0x64   : > { %2416 = vmatprep.subr.bf16.mxu0 %v2658_v53  ;;  %2484 = vmatprep.subr.bf16.mxu1 %v2658_v53 }
  0x67   : > { %2417 = vmatpush3.bf16.msra.mxu0 %v2577_v56  ;;  %2485 = vmatpush3.bf16.msra.mxu1 %v2577_v56 }
  0x68   : > { %2418 = vmatprep.subr.bf16.mxu0 %v2658_v53  ;;  %2486 = vmatprep.subr.bf16.mxu1 %v2658_v53 }
  0x69   : > { %2299 = vmatmul.mubr.bf16.gmra.mrb[8].mxu0 %v2586_v1  ;;  %2367 = vmatmul.mubr.bf16.gmra.mrb[8].mxu1 %v2587_v2  ;;  %v3203_v2 = vld [vmem:[%s3375_s2] ss:$0 sm:$0xff] }
  0x6a   : > { %2302 = vmatprep.mubr.msk.bf16.mxu0 %vm2659_vm0, %v2658_v53  ;;  %2370 = vmatprep.mubr.msk.bf16.mxu1 %vm2659_vm0, %v2658_v53 }
  0x6b   : > { %2419 = vmatpush3.bf16.msra.mxu0 %v2578_v57  ;;  %2487 = vmatpush3.bf16.msra.mxu1 %v2578_v57 }
  0x6c   : > { %2420 = vmatprep.subr.bf16.mxu0 %v2658_v53  ;;  %2488 = vmatprep.subr.bf16.mxu1 %v2658_v53 }
  0x6f   : > { %2421 = vmatpush3.bf16.msra.mxu0 %v2579_v58  ;;  %2489 = vmatpush3.bf16.msra.mxu1 %v2579_v58 }
  0x70   : > { %2422 = vmatprep.subr.bf16.mxu0 %v2658_v53  ;;  %2490 = vmatprep.subr.bf16.mxu1 %v2658_v53 }
  0x71   : > { %2303 = vmatmul.mubr.bf16.gmra.mrb[12].mxu0 %v2588_v3  ;;  %2371 = vmatmul.mubr.bf16.gmra.mrb[12].mxu1 %v2589_v4 }
  0x72   : > { %2306 = vmatprep.mubr.msk.bf16.mxu0 %vm2659_vm0, %v2658_v53  ;;  %2374 = vmatprep.mubr.msk.bf16.mxu1 %vm2659_vm0, %v2658_v53 }
  0x73   : > { %2423 = vmatpush3.bf16.msra.mxu0 %v2580_v59  ;;  %2491 = vmatpush3.bf16.msra.mxu1 %v2580_v59 }
  0x74   : > { %2424 = vmatprep.subr.bf16.mxu0 %v2658_v53  ;;  %2492 = vmatprep.subr.bf16.mxu1 %v2658_v53 }
  0x77   : > { %2425 = vmatpush3.bf16.msra.mxu0 %v2581_v60  ;;  %2493 = vmatpush3.bf16.msra.mxu1 %v2581_v60 }
  0x79   : > { %2307 = vmatmul.mubr.bf16.gmra.mrb[16].mxu0 %v2590_v5  ;;  %2375 = vmatmul.mubr.bf16.gmra.mrb[16].mxu1 %v2591_v6 }
  0x7a   : > { %2310 = vmatprep.mubr.msk.bf16.mxu0 %vm2659_vm0, %v2658_v53  ;;  %2378 = vmatprep.mubr.msk.bf16.mxu1 %vm2659_vm0, %v2658_v53 }
  0x81   : > { %2311 = vmatmul.mubr.bf16.gmra.mrb[20].mxu0 %v2592_v7  ;;  %2379 = vmatmul.mubr.bf16.gmra.mrb[20].mxu1 %v2593_v8 }
  0x82   : > { %2314 = vmatprep.mubr.msk.bf16.mxu0 %vm2659_vm0, %v2658_v53  ;;  %2382 = vmatprep.mubr.msk.bf16.mxu1 %vm2659_vm0, %v2658_v53 }
  0x89   : > { %2315 = vmatmul.mubr.bf16.gmra.mrb[24].mxu0 %v2594_v9  ;;  %2383 = vmatmul.mubr.bf16.gmra.mrb[24].mxu1 %v2595_v10 }
  0x8a   : > { %2318 = vmatprep.mubr.msk.bf16.mxu0 %vm2659_vm0, %v2658_v53  ;;  %2386 = vmatprep.mubr.msk.bf16.mxu1 %vm2659_vm0, %v2658_v53 }
  0x91   : > { %2319 = vmatmul.mubr.bf16.gmra.mrb[28].mxu0 %v2596_v11  ;;  %2387 = vmatmul.mubr.bf16.gmra.mrb[28].mxu1 %v2597_v12 }
  0x92   : > { %2322 = vmatprep.mubr.msk.bf16.mxu0 %vm2659_vm0, %v2658_v53  ;;  %2390 = vmatprep.mubr.msk.bf16.mxu1 %vm2659_vm0, %v2658_v53 }
  0x99   : > { %2323 = vmatmul.mubr.bf16.gmra.mrb[32].mxu0 %v2598_v13  ;;  %2391 = vmatmul.mubr.bf16.gmra.mrb[32].mxu1 %v2599_v14 }
  0x9a   : > { %2326 = vmatprep.mubr.msk.bf16.mxu0 %vm2659_vm0, %v2658_v53  ;;  %2394 = vmatprep.mubr.msk.bf16.mxu1 %vm2659_vm0, %v2658_v53 }
  0xa1   : > { %2327 = vmatmul.mubr.bf16.gmra.mrb[36].mxu0 %v2600_v15  ;;  %2395 = vmatmul.mubr.bf16.gmra.mrb[36].mxu1 %v2601_v16 }
  0xa2   : > { %2330 = vmatprep.mubr.msk.bf16.mxu0 %vm2659_vm0, %v2658_v53  ;;  %2398 = vmatprep.mubr.msk.bf16.mxu1 %vm2659_vm0, %v2658_v53 }
  0xa9   : > { %2331 = vmatmul.mubr.bf16.gmra.mrb[40].mxu0 %v2602_v17  ;;  %2399 = vmatmul.mubr.bf16.gmra.mrb[40].mxu1 %v2603_v18 }
  0xaa   : > { %2334 = vmatprep.mubr.msk.bf16.mxu0 %vm2659_vm0, %v2658_v53  ;;  %2402 = vmatprep.mubr.msk.bf16.mxu1 %vm2659_vm0, %v2658_v53 }
  0xb1   : > { %2335 = vmatmul.mubr.bf16.gmra.mrb[44].mxu0 %v2604_v19  ;;  %2403 = vmatmul.mubr.bf16.gmra.mrb[44].mxu1 %v2605_v20 }
  0xb2   : > { %2338 = vmatprep.mubr.msk.bf16.mxu0 %vm2659_vm0, %v2658_v53  ;;  %2406 = vmatprep.mubr.msk.bf16.mxu1 %vm2659_vm0, %v2658_v53 }
  0xb9   : > { %2339 = vmatmul.mubr.bf16.gmra.mrb[48].mxu0 %v2606_v21  ;;  %2407 = vmatmul.mubr.bf16.gmra.mrb[48].mxu1 %v2607_v22 }
  0xba   : > { %2426 = vmatprep.mubr.msk.bf16.mxu0 %vm2659_vm0, %v2658_v53  ;;  %2494 = vmatprep.mubr.msk.bf16.mxu1 %vm2659_vm0, %v2658_v53 }
  0xc1   : > { %2427 = vmatmul.mubr.bf16.vlgmr.msra.gmra.mrb[52].mxu0 %v2608_v23  ;;  %2495 = vmatmul.mubr.bf16.vlgmr.msra.gmra.mrb[52].mxu1 %v2609_v24 }
  0xc2   : > { %2430 = vmatprep.mubr.msk.bf16.mxu0 %vm2659_vm0, %v2658_v53  ;;  %2498 = vmatprep.mubr.msk.bf16.mxu1 %vm2659_vm0, %v2658_v53 }
  0xc9   : > { %2431 = vmatmul.mubr.bf16.gmra.mrb[56].mxu0 %v2610_v25  ;;  %2499 = vmatmul.mubr.bf16.gmra.mrb[56].mxu1 %v2611_v26 }
  0xca   : > { %2434 = vmatprep.mubr.msk.bf16.mxu0 %vm2659_vm0, %v2658_v53  ;;  %2502 = vmatprep.mubr.msk.bf16.mxu1 %vm2659_vm0, %v2658_v53 }
  0xd1   : > { %2435 = vmatmul.mubr.bf16.gmra.mrb[60].mxu0 %v2612_v27  ;;  %2503 = vmatmul.mubr.bf16.gmra.mrb[60].mxu1 %v2613_v28 }
  0xd2   : > { %2438 = vmatprep.mubr.msk.bf16.mxu0 %vm2659_vm0, %v2658_v53  ;;  %2506 = vmatprep.mubr.msk.bf16.mxu1 %vm2659_vm0, %v2658_v53 }
  0xd9   : > { %2439 = vmatmul.mubr.bf16.gmra.mrb[64].mxu0 %v2614_v29  ;;  %2507 = vmatmul.mubr.bf16.gmra.mrb[64].mxu1 %v2615_v30 }
  0xda   : > { %2442 = vmatprep.mubr.msk.bf16.mxu0 %vm2659_vm0, %v2658_v53  ;;  %2510 = vmatprep.mubr.msk.bf16.mxu1 %vm2659_vm0, %v2658_v53 }
  0xe1   : > { %2443 = vmatmul.mubr.bf16.gmra.mrb[68].mxu0 %v2616_v31  ;;  %2511 = vmatmul.mubr.bf16.gmra.mrb[68].mxu1 %v2617_v32 }
  0xe2   : > { %2446 = vmatprep.mubr.msk.bf16.mxu0 %vm2659_vm0, %v2658_v53  ;;  %2514 = vmatprep.mubr.msk.bf16.mxu1 %vm2659_vm0, %v2658_v53 }
  0xe9   : > { %2447 = vmatmul.mubr.bf16.gmra.mrb[72].mxu0 %v2618_v33  ;;  %2515 = vmatmul.mubr.bf16.gmra.mrb[72].mxu1 %v2619_v34 }
  0xea   : > { %2450 = vmatprep.mubr.msk.bf16.mxu0 %vm2659_vm0, %v2658_v53  ;;  %2518 = vmatprep.mubr.msk.bf16.mxu1 %vm2659_vm0, %v2658_v53 }
  0xf1   : > { %2451 = vmatmul.mubr.bf16.gmra.mrb[76].mxu0 %v2620_v35  ;;  %2519 = vmatmul.mubr.bf16.gmra.mrb[76].mxu1 %v2621_v36 }
  0xf2   : > { %2454 = vmatprep.mubr.msk.bf16.mxu0 %vm2659_vm0, %v2658_v53  ;;  %2522 = vmatprep.mubr.msk.bf16.mxu1 %vm2659_vm0, %v2658_v53 }
  0xf9   : > { %2455 = vmatmul.mubr.bf16.gmra.mrb[80].mxu0 %v2622_v37  ;;  %2523 = vmatmul.mubr.bf16.gmra.mrb[80].mxu1 %v2623_v38 }
  0xfa   : > { %2458 = vmatprep.mubr.msk.bf16.mxu0 %vm2659_vm0, %v2658_v53  ;;  %2526 = vmatprep.mubr.msk.bf16.mxu1 %vm2659_vm0, %v2658_v53 }
 0x101   : > { %2459 = vmatmul.mubr.bf16.gmra.mrb[84].mxu0 %v2624_v39  ;;  %2527 = vmatmul.mubr.bf16.gmra.mrb[84].mxu1 %v2625_v40 }
 0x102   : > { %2462 = vmatprep.mubr.msk.bf16.mxu0 %vm2659_vm0, %v2658_v53  ;;  %2530 = vmatprep.mubr.msk.bf16.mxu1 %vm2659_vm0, %v2658_v53 }
 0x109   : > { %2463 = vmatmul.mubr.bf16.gmra.mrb[88].mxu0 %v2626_v41  ;;  %2531 = vmatmul.mubr.bf16.gmra.mrb[88].mxu1 %v2627_v42 }
 0x10a   : > { %2466 = vmatprep.mubr.msk.bf16.mxu0 %vm2659_vm0, %v2658_v53  ;;  %2534 = vmatprep.mubr.msk.bf16.mxu1 %vm2659_vm0, %v2658_v53 }
 0x111   : > { %2467 = vmatmul.mubr.bf16.gmra.mrb[92].mxu0 %v2628_v43  ;;  %2535 = vmatmul.mubr.bf16.gmra.mrb[92].mxu1 %v2629_v44 }
 0x112   : > { %2470 = vmatprep.mubr.msk.bf16.mxu0 %vm2659_vm0, %v2658_v53  ;;  %2538 = vmatprep.mubr.msk.bf16.mxu1 %vm2659_vm0, %v2658_v53 }
 0x119   : > { %2471 = vmatmul.mubr.bf16.gmra.mrb[96].mxu0 %v2630_v45  ;;  %2539 = vmatmul.mubr.bf16.gmra.mrb[96].mxu1 %v2631_v46 }
 0x11a   : > { %2474 = vmatprep.mubr.msk.bf16.mxu0 %vm2659_vm0, %v2658_v53  ;;  %2542 = vmatprep.mubr.msk.bf16.mxu1 %vm2659_vm0, %v2658_v53 }
 0x121   : > { %2475 = vmatmul.mubr.bf16.gmra.mrb[100].mxu0 %v2632_v47  ;;  %2543 = vmatmul.mubr.bf16.gmra.mrb[100].mxu1 %v2633_v48 }
 0x12c   : > { %v3039_v49 = vpop.f32.mrb[0].mxu0  ;;  %v3041_v50 = vpop.f32.mrb[0].mxu1 }
 0x12d   : > { %v1175_v51 = vmax.f32 %v3039_v49, %v3041_v50  ;;  %v2292_v52 = vpop.f32.mrb[1].mxu0  ;;  %v2360_v54 = vpop.f32.mrb[1].mxu1 }
 0x12e   : > { %v3045_v55 = vpop.f32.mrb[2].mxu0  ;;  %v3047_v56 = vpop.f32.mrb[2].mxu1 }
 0x12f   : > { %v2293_v57 = vpop.f32.mrb[3].mxu0  ;;  %v2361_v58 = vpop.f32.mrb[3].mxu1 }
 0x134   : > { %v3051_v59 = vpop.f32.mrb[4].mxu0  ;;  %v3053_v60 = vpop.f32.mrb[4].mxu1 }
 0x135   : > { %v2296_v62 = vpop.f32.mrb[5].mxu0  ;;  %v2364_v63 = vpop.f32.mrb[5].mxu1 }
 0x136   : > { %v3057_v0 = vpop.f32.mrb[6].mxu0  ;;  %v3059_v1 = vpop.f32.mrb[6].mxu1 }
 0x137   : > { %v2297_v3 = vpop.f32.mrb[7].mxu0  ;;  %v2365_v4 = vpop.f32.mrb[7].mxu1 }
 0x13c   : > { %v3063_v5 = vpop.f32.mrb[8].mxu0  ;;  %v3065_v6 = vpop.f32.mrb[8].mxu1 }
 0x13d   : > { %v2300_v8 = vpop.f32.mrb[9].mxu0  ;;  %v2368_v9 = vpop.f32.mrb[9].mxu1 }
 0x13e   : > { %v3069_v10 = vpop.f32.mrb[10].mxu0  ;;  %v3071_v11 = vpop.f32.mrb[10].mxu1 }
 0x13f   : > { %v2301_v13 = vpop.f32.mrb[11].mxu0  ;;  %v2369_v14 = vpop.f32.mrb[11].mxu1 }
 0x144   : > { %v3075_v15 = vpop.f32.mrb[12].mxu0  ;;  %v3077_v16 = vpop.f32.mrb[12].mxu1 }
 0x145   : > { %v2304_v18 = vpop.f32.mrb[13].mxu0  ;;  %v2372_v19 = vpop.f32.mrb[13].mxu1 }
 0x146   : > { %v3081_v20 = vpop.f32.mrb[14].mxu0  ;;  %v3083_v21 = vpop.f32.mrb[14].mxu1 }
 0x147   : > { %v2305_v23 = vpop.f32.mrb[15].mxu0  ;;  %v2373_v24 = vpop.f32.mrb[15].mxu1 }
 0x14c   : > { %v3087_v25 = vpop.f32.mrb[16].mxu0  ;;  %v3089_v26 = vpop.f32.mrb[16].mxu1 }
 0x14d   : > { %v2308_v28 = vpop.f32.mrb[17].mxu0  ;;  %v2376_v29 = vpop.f32.mrb[17].mxu1 }
 0x14e   : > { %v3093_v30 = vpop.f32.mrb[18].mxu0  ;;  %v3095_v31 = vpop.f32.mrb[18].mxu1 }
 0x14f   : > { %v2309_v33 = vpop.f32.mrb[19].mxu0  ;;  %v2377_v34 = vpop.f32.mrb[19].mxu1 }
 0x154   : > { %v3099_v35 = vpop.f32.mrb[20].mxu0  ;;  %v3101_v36 = vpop.f32.mrb[20].mxu1 }
 0x155   : > { %v2312_v38 = vpop.f32.mrb[21].mxu0  ;;  %v2380_v39 = vpop.f32.mrb[21].mxu1 }
 0x156   : > { %v3105_v40 = vpop.f32.mrb[22].mxu0  ;;  %v3107_v41 = vpop.f32.mrb[22].mxu1 }
 0x157   : > { %v2313_v43 = vpop.f32.mrb[23].mxu0  ;;  %v2381_v44 = vpop.f32.mrb[23].mxu1 }
 0x15c   : > { %v3111_v45 = vpop.f32.mrb[24].mxu0  ;;  %v3113_v46 = vpop.f32.mrb[24].mxu1 }
 0x15d   : > { %v2316_v48 = vpop.f32.mrb[25].mxu0  ;;  %v2384_v52 = vpop.f32.mrb[25].mxu1 }
 0x15e   : > { %v3117_v54 = vpop.f32.mrb[26].mxu0  ;;  %v3119_v57 = vpop.f32.mrb[26].mxu1 }
 0x15f   : > { %v2317_v62 = vpop.f32.mrb[27].mxu0  ;;  %v2385_v63 = vpop.f32.mrb[27].mxu1 }
 0x164   : > { %v3123_v3 = vpop.f32.mrb[28].mxu0  ;;  %v3125_v4 = vpop.f32.mrb[28].mxu1 }
 0x165   : > { %v2320_v9 = vpop.f32.mrb[29].mxu0  ;;  %v2388_v13 = vpop.f32.mrb[29].mxu1 }
 0x166   : > { %v3129_v14 = vpop.f32.mrb[30].mxu0  ;;  %v3131_v18 = vpop.f32.mrb[30].mxu1 }
 0x167   : > { %v2321_v23 = vpop.f32.mrb[31].mxu0  ;;  %v2389_v24 = vpop.f32.mrb[31].mxu1 }
 0x16c   : > { %v3135_v28 = vpop.f32.mrb[32].mxu0  ;;  %v3137_v29 = vpop.f32.mrb[32].mxu1 }
 0x16d   : > { %v2324_v34 = vpop.f32.mrb[33].mxu0  ;;  %v2392_v38 = vpop.f32.mrb[33].mxu1 }
 0x16e   : > { %v3141_v39 = vpop.f32.mrb[34].mxu0  ;;  %v3143_v43 = vpop.f32.mrb[34].mxu1 }
 0x16f   : > { %v2325_v48 = vpop.f32.mrb[35].mxu0  ;;  %v2393_v52 = vpop.f32.mrb[35].mxu1 }
 0x174   : > { %v3147_v62 = vpop.f32.mrb[36].mxu0  ;;  %v3149_v63 = vpop.f32.mrb[36].mxu1 }
 0x175   : > { %v2328_v13 = vpop.f32.mrb[37].mxu0  ;;  %v2396_v23 = vpop.f32.mrb[37].mxu1 }
 0x176   : > { %v3153_v24 = vpop.f32.mrb[38].mxu0  ;;  %v3155_v34 = vpop.f32.mrb[38].mxu1 }
 0x177   : > { %v2329_v33 = vpop.f32.mrb[39].mxu0  ;;  %v2397_v44 = vpop.f32.mrb[39].mxu1 }
 0x17c   : > { %v3159_v48 = vpop.f32.mrb[40].mxu0  ;;  %v3161_v52 = vpop.f32.mrb[40].mxu1 }
 0x17d   : > { %v2332_v8 = vpop.f32.mrb[41].mxu0  ;;  %v2400_v9 = vpop.f32.mrb[41].mxu1 }
 0x17e   : > { %v3165_v13 = vpop.f32.mrb[42].mxu0  ;;  %v3167_v23 = vpop.f32.mrb[42].mxu1 }
 0x17f   : > { %v2333_v47 = vpop.f32.mrb[43].mxu0  ;;  %v2401_v38 = vpop.f32.mrb[43].mxu1 }
 0x184   : > { %v3171_v33 = vpop.f32.mrb[44].mxu0  ;;  %v3173_v44 = vpop.f32.mrb[44].mxu1 }
 0x185   : > { %v2336_v19 = vpop.f32.mrb[45].mxu0  ;;  %v2404_v8 = vpop.f32.mrb[45].mxu1 }
 0x186   : > { %v3177_v9 = vpop.f32.mrb[46].mxu0  ;;  %v3179_v37 = vpop.f32.mrb[46].mxu1 }
 0x187   : > { %v2337_v58 = vpop.f32.mrb[47].mxu0  ;;  %v2405_v47 = vpop.f32.mrb[47].mxu1 }
 0x18c   : > { %v3183_v38 = vpop.f32.mrb[48].mxu0  ;;  %v3185_v27 = vpop.f32.mrb[48].mxu1 }
 0x18d   : > { %v2340_v17 = vpop.f32.mrb[49].mxu0  ;;  %v2408_v42 = vpop.f32.mrb[49].mxu1 }
 0x18e   : > { %v3191_v19 = vpop.f32.mrb[50].mxu0  ;;  %v3193_v8 = vpop.f32.mrb[50].mxu1 }
 0x18f   : > { %3379 = vst [vmem:[#allocation3_spill] sm:$0xff] %v3191_v19  ;;  %3380 = vst [vmem:[#allocation4_spill] sm:$0xff] %v3193_v8  ;;  %v2341_v58 = vpop.f32.mrb[51].mxu0  ;;  %v2409_v47 = vpop.f32.mrb[51].mxu1 }
 0x190   : > { %v3381_v58 = vmax.f32 %v3045_v55, %v3047_v56 }
 0x194   : > { %v1340_v12 = vpop.f32.mrb[52].mxu0  ;;  %v1608_v7 = vpop.f32.mrb[52].mxu1 }
 0x195   : > { %v1443_v22 = vmax.f32 %v1175_v51, %v1340_v12  ;;  %v2428_v17 = vpop.f32.mrb[53].mxu0  ;;  %v2496_v42 = vpop.f32.mrb[53].mxu1 }
 0x196   : > { %v1343_v61 = vpop.f32.mrb[54].mxu0  ;;  %v1611_v53 = vpop.f32.mrb[54].mxu1 }
 0x197   : > { %v1711_v32 = vmax.f32 %v1443_v22, %v1608_v7  ;;  %v1444_v47 = vmax.f32 %v3381_v58, %v1343_v61  ;;  %v2429_v8 = vpop.f32.mrb[55].mxu0  ;;  %v2497_v19 = vpop.f32.mrb[55].mxu1  ;;  %v3382_v22 = vmax.f32 %v3051_v59, %v3053_v60 }
 0x199   : > { %v1744_v49 = vadd.f32 %v3203_v2, %v1711_v32  ;;  %v1712_v50 = vmax.f32 %v1444_v47, %v1611_v53  ;;  %v3383_v47 = vmax.f32 %v3057_v0, %v3059_v1  ;;  %v3384_v0 = vmax.f32 %v3063_v5, %v3065_v6 }
 0x19b   : > { %v1770_v51 = vmax.f32 %v1744_v49, 0.0  ;;  %v1745_v12 = vadd.f32 %v3203_v2, %v1712_v50 }
 0x19c   : > { %v1348_v7 = vpop.f32.mrb[56].mxu0  ;;  %v1616_v55 = vpop.f32.mrb[56].mxu1 }
 0x19d   : > { %v2164_v56 = vpack.c.bf16 %v1770_v51, %v1770_v51  ;;  %v1771_v61 = vmax.f32 %v1745_v12, 0.0  ;;  %v1445_v32 = vmax.f32 %v3382_v22, %v1348_v7  ;;  %v2432_v53 = vpop.f32.mrb[57].mxu0  ;;  %v2500_v19 = vpop.f32.mrb[57].mxu1 }
 0x19e   : > { %v1351_v8 = vpop.f32.mrb[58].mxu0  ;;  %v1619_v17 = vpop.f32.mrb[58].mxu1 }
 0x19f   : > { %1901 = vst.msk [vmem:[%s3213_s28] sm:$0xf] %vm1900_vm1, %v2164_v56  ;;  %v2165_v42 = vpack.c.bf16 %v1771_v61, %v1771_v61  ;;  %v1713_v58 = vmax.f32 %v1445_v32, %v1616_v55  ;;  %v1446_v49 = vmax.f32 %v3383_v47, %v1351_v8  ;;  %v2433_v50 = vpop.f32.mrb[59].mxu0  ;;  %v2501_v51 = vpop.f32.mrb[59].mxu1 }
 0x1a1   : > { %1902 = vst.msk [vmem:[%s3213_s28 + $0x4] sm:$0xf] %vm1900_vm1, %v2165_v42  ;;  %v1746_v59 = vadd.f32 %v3203_v2, %v1713_v58  ;;  %v1714_v60 = vmax.f32 %v1446_v49, %v1619_v17  ;;  %v3385_v58 = vmax.f32 %v3069_v10, %v3071_v11  ;;  %v3386_v10 = vmax.f32 %v3075_v15, %v3077_v16 }
 0x1a3   : > { %v1772_v12 = vmax.f32 %v1746_v59, 0.0  ;;  %v1747_v7 = vadd.f32 %v3203_v2, %v1714_v60 }
 0x1a4   : > { %v1356_v22 = vpop.f32.mrb[60].mxu0  ;;  %v1624_v56 = vpop.f32.mrb[60].mxu1 }
 0x1a5   : > { %v2166_v61 = vpack.c.bf16 %v1772_v12, %v1772_v12  ;;  %v1773_v55 = vmax.f32 %v1747_v7, 0.0  ;;  %v1447_v1 = vmax.f32 %v3384_v0, %v1356_v22  ;;  %v2436_v32 = vpop.f32.mrb[61].mxu0  ;;  %v2504_v53 = vpop.f32.mrb[61].mxu1 }
 0x1a6   : > { %v1359_v19 = vpop.f32.mrb[62].mxu0  ;;  %v1627_v8 = vpop.f32.mrb[62].mxu1  ;;  %v3387_v53 = vmax.f32 %v3081_v20, %v3083_v21  ;;  %v3388_v20 = vmax.f32 %v3087_v25, %v3089_v26 }
 0x1a7   : > { %1903 = vst.msk [vmem:[%s3213_s28 + $0x8] sm:$0xf] %vm1900_vm1, %v2166_v61  ;;  %v2167_v42 = vpack.c.bf16 %v1773_v55, %v1773_v55  ;;  %v1715_v17 = vmax.f32 %v1447_v1, %v1624_v56  ;;  %v1448_v47 = vmax.f32 %v3385_v58, %v1359_v19  ;;  %v2437_v49 = vpop.f32.mrb[63].mxu0  ;;  %v2505_v50 = vpop.f32.mrb[63].mxu1 }
 0x1a9   : > { %1904 = vst.msk [vmem:[%s3213_s28 + $0xc] sm:$0xf] %vm1900_vm1, %v2167_v42  ;;  %v1748_v5 = vadd.f32 %v3203_v2, %v1715_v17  ;;  %v1716_v6 = vmax.f32 %v1448_v47, %v1627_v8 }
 0x1ab   : > { %v1774_v51 = vmax.f32 %v1748_v5, 0.0  ;;  %v1749_v59 = vadd.f32 %v3203_v2, %v1716_v6 }
 0x1ac   : > { %v1364_v60 = vpop.f32.mrb[64].mxu0  ;;  %v1632_v12 = vpop.f32.mrb[64].mxu1 }
 0x1ad   : > { %v2168_v7 = vpack.c.bf16 %v1774_v51, %v1774_v51  ;;  %v1775_v22 = vmax.f32 %v1749_v59, 0.0  ;;  %v1449_v11 = vmax.f32 %v3386_v10, %v1364_v60  ;;  %v2440_v56 = vpop.f32.mrb[65].mxu0  ;;  %v2508_v61 = vpop.f32.mrb[65].mxu1 }
 0x1ae   : > { %v1367_v55 = vpop.f32.mrb[66].mxu0  ;;  %v1635_v0 = vpop.f32.mrb[66].mxu1 }
 0x1af   : > { %1905 = vst.msk [vmem:[%s3213_s28 + $0x10] sm:$0xf] %vm1900_vm1, %v2168_v7  ;;  %v2169_v1 = vpack.c.bf16 %v1775_v22, %v1775_v22  ;;  %v1717_v32 = vmax.f32 %v1449_v11, %v1632_v12  ;;  %v1450_v19 = vmax.f32 %v3387_v53, %v1367_v55  ;;  %v2441_v8 = vpop.f32.mrb[67].mxu0  ;;  %v2509_v42 = vpop.f32.mrb[67].mxu1  ;;  %v3389_v22 = vmax.f32 %v3093_v30, %v3095_v31 }
 0x1b0   : > { %v3390_v30 = vmax.f32 %v3099_v35, %v3101_v36 }
 0x1b1   : > { %1906 = vst.msk [vmem:[%s3213_s28 + $0x14] sm:$0xf] %vm1900_vm1, %v2169_v1  ;;  %v1750_v15 = vadd.f32 %v3203_v2, %v1717_v32  ;;  %v1718_v16 = vmax.f32 %v1450_v19, %v1635_v0 }
 0x1b3   : > { %v1776_v17 = vmax.f32 %v1750_v15, 0.0  ;;  %v1751_v58 = vadd.f32 %v3203_v2, %v1718_v16 }
 0x1b4   : > { %v1372_v47 = vpop.f32.mrb[68].mxu0  ;;  %v1640_v49 = vpop.f32.mrb[68].mxu1 }
 0x1b5   : > { %v2170_v50 = vpack.c.bf16 %v1776_v17, %v1776_v17  ;;  %v1777_v5 = vmax.f32 %v1751_v58, 0.0  ;;  %v1451_v21 = vmax.f32 %v3388_v20, %v1372_v47  ;;  %v2444_v6 = vpop.f32.mrb[69].mxu0  ;;  %v2512_v51 = vpop.f32.mrb[69].mxu1  ;;  %v3391_v58 = vmax.f32 %v3105_v40, %v3107_v41 }
 0x1b6   : > { %v1375_v59 = vpop.f32.mrb[70].mxu0  ;;  %v1643_v60 = vpop.f32.mrb[70].mxu1  ;;  %v3392_v40 = vmax.f32 %v3111_v45, %v3113_v46 }
 0x1b7   : > { %1907 = vst.msk [vmem:[%s3213_s28 + $0x18] sm:$0xf] %vm1900_vm1, %v2170_v50  ;;  %v2171_v12 = vpack.c.bf16 %v1777_v5, %v1777_v5  ;;  %v1719_v7 = vmax.f32 %v1451_v21, %v1640_v49  ;;  %v1452_v10 = vmax.f32 %v3389_v22, %v1375_v59  ;;  %v2445_v11 = vpop.f32.mrb[71].mxu0  ;;  %v2513_v56 = vpop.f32.mrb[71].mxu1 }
 0x1b8   : > { %v3393_v56 = vmax.f32 %v3117_v54, %v3119_v57  ;;  %v3394_v54 = vmax.f32 %v3123_v3, %v3125_v4 }
 0x1b9   : > { %1908 = vst.msk [vmem:[%s3213_s28 + $0x1c] sm:$0xf] %vm1900_vm1, %v2171_v12  ;;  %v1752_v25 = vadd.f32 %v3203_v2, %v1719_v7  ;;  %v1720_v26 = vmax.f32 %v1452_v10, %v1643_v60 }
 0x1bb   : > { %v1778_v61 = vmax.f32 %v1752_v25, 0.0  ;;  %v1753_v55 = vadd.f32 %v3203_v2, %v1720_v26 }
 0x1bc   : > { %v1380_v0 = vpop.f32.mrb[72].mxu0  ;;  %v1648_v1 = vpop.f32.mrb[72].mxu1 }
 0x1bd   : > { %v2172_v32 = vpack.c.bf16 %v1778_v61, %v1778_v61  ;;  %v1779_v53 = vmax.f32 %v1753_v55, 0.0  ;;  %v1453_v31 = vmax.f32 %v3390_v30, %v1380_v0  ;;  %v2448_v19 = vpop.f32.mrb[73].mxu0  ;;  %v2516_v8 = vpop.f32.mrb[73].mxu1 }
 0x1be   : > { %v1383_v42 = vpop.f32.mrb[74].mxu0  ;;  %v1651_v15 = vpop.f32.mrb[74].mxu1 }
 0x1bf   : > { %1909 = vst.msk [vmem:[%s3213_s28 + $0x20] sm:$0xf] %vm1900_vm1, %v2172_v32  ;;  %v2173_v16 = vpack.c.bf16 %v1779_v53, %v1779_v53  ;;  %v1721_v17 = vmax.f32 %v1453_v31, %v1648_v1  ;;  %v1454_v47 = vmax.f32 %v3391_v58, %v1383_v42  ;;  %v2449_v49 = vpop.f32.mrb[75].mxu0  ;;  %v2517_v50 = vpop.f32.mrb[75].mxu1 }
 0x1c1   : > { %1910 = vst.msk [vmem:[%s3213_s28 + $0x24] sm:$0xf] %vm1900_vm1, %v2173_v16  ;;  %v1754_v35 = vadd.f32 %v3203_v2, %v1721_v17  ;;  %v1722_v36 = vmax.f32 %v1454_v47, %v1651_v15  ;;  %v3395_v17 = vmax.f32 %v3129_v14, %v3131_v18  ;;  %v3396_v14 = vmax.f32 %v3135_v28, %v3137_v29 }
 0x1c3   : > { %v1780_v5 = vmax.f32 %v1754_v35, 0.0  ;;  %v1755_v20 = vadd.f32 %v3203_v2, %v1722_v36 }
 0x1c4   : > { %v1388_v21 = vpop.f32.mrb[76].mxu0  ;;  %v1656_v6 = vpop.f32.mrb[76].mxu1 }
 0x1c5   : > { %v2174_v51 = vpack.c.bf16 %v1780_v5, %v1780_v5  ;;  %v1781_v59 = vmax.f32 %v1755_v20, 0.0  ;;  %v1455_v41 = vmax.f32 %v3392_v40, %v1388_v21  ;;  %v2452_v60 = vpop.f32.mrb[77].mxu0  ;;  %v2520_v12 = vpop.f32.mrb[77].mxu1 }
 0x1c6   : > { %v1391_v7 = vpop.f32.mrb[78].mxu0  ;;  %v1659_v22 = vpop.f32.mrb[78].mxu1  ;;  %v3397_v12 = vmax.f32 %v3141_v39, %v3143_v43  ;;  %v3398_v39 = vmax.f32 %v3147_v62, %v3149_v63 }
 0x1c7   : > { %1911 = vst.msk [vmem:[%s3213_s28 + $0x28] sm:$0xf] %vm1900_vm1, %v2174_v51  ;;  %v2175_v10 = vpack.c.bf16 %v1781_v59, %v1781_v59  ;;  %v1723_v11 = vmax.f32 %v1455_v41, %v1656_v6  ;;  %v1456_v25 = vmax.f32 %v3393_v56, %v1391_v7  ;;  %v2453_v26 = vpop.f32.mrb[79].mxu0  ;;  %v2521_v61 = vpop.f32.mrb[79].mxu1 }
 0x1c9   : > { %1912 = vst.msk [vmem:[%s3213_s28 + $0x2c] sm:$0xf] %vm1900_vm1, %v2175_v10  ;;  %v1756_v45 = vadd.f32 %v3203_v2, %v1723_v11  ;;  %v1724_v46 = vmax.f32 %v1456_v25, %v1659_v22 }
 0x1cb   : > { %v1782_v55 = vmax.f32 %v1756_v45, 0.0  ;;  %v1757_v0 = vadd.f32 %v3203_v2, %v1724_v46 }
 0x1cc   : > { %v1396_v1 = vpop.f32.mrb[80].mxu0  ;;  %v1664_v32 = vpop.f32.mrb[80].mxu1 }
 0x1cd   : > { %v2176_v53 = vpack.c.bf16 %v1782_v55, %v1782_v55  ;;  %v1783_v30 = vmax.f32 %v1757_v0, 0.0  ;;  %v1457_v57 = vmax.f32 %v3394_v54, %v1396_v1  ;;  %v2456_v31 = vpop.f32.mrb[81].mxu0  ;;  %v2524_v19 = vpop.f32.mrb[81].mxu1 }
 0x1ce   : > { %v1399_v8 = vpop.f32.mrb[82].mxu0  ;;  %v1667_v42 = vpop.f32.mrb[82].mxu1 }
 0x1cf   : > { %1913 = vst.msk [vmem:[%s3213_s28 + $0x30] sm:$0xf] %vm1900_vm1, %v2176_v53  ;;  %v2177_v15 = vpack.c.bf16 %v1783_v30, %v1783_v30  ;;  %v1725_v16 = vmax.f32 %v1457_v57, %v1664_v32  ;;  %v1458_v58 = vmax.f32 %v3395_v17, %v1399_v8  ;;  %v2457_v47 = vpop.f32.mrb[83].mxu0  ;;  %v2525_v49 = vpop.f32.mrb[83].mxu1  ;;  %v3399_v30 = vmax.f32 %v3153_v24, %v3155_v34 }
 0x1d0   : > { %v3400_v24 = vmax.f32 %v3159_v48, %v3161_v52 }
 0x1d1   : > { %1914 = vst.msk [vmem:[%s3213_s28 + $0x34] sm:$0xf] %vm1900_vm1, %v2177_v15  ;;  %v1758_v3 = vadd.f32 %v3203_v2, %v1725_v16  ;;  %v1726_v4 = vmax.f32 %v1458_v58, %v1667_v42 }
 0x1d3   : > { %v1784_v50 = vmax.f32 %v1758_v3, 0.0  ;;  %v1759_v35 = vadd.f32 %v3203_v2, %v1726_v4 }
 0x1d4   : > { %v1404_v36 = vpop.f32.mrb[84].mxu0  ;;  %v1672_v5 = vpop.f32.mrb[84].mxu1 }
 0x1d5   : > { %v2178_v20 = vpack.c.bf16 %v1784_v50, %v1784_v50  ;;  %v1785_v21 = vmax.f32 %v1759_v35, 0.0  ;;  %v1459_v18 = vmax.f32 %v3396_v14, %v1404_v36  ;;  %v2460_v6 = vpop.f32.mrb[85].mxu0  ;;  %v2528_v51 = vpop.f32.mrb[85].mxu1  ;;  %v3401_v35 = vmax.f32 %v3165_v13, %v3167_v23 }
 0x1d6   : > { %v1407_v59 = vpop.f32.mrb[86].mxu0  ;;  %v1675_v40 = vpop.f32.mrb[86].mxu1  ;;  %v3402_v13 = vmax.f32 %v3171_v33, %v3173_v44 }
 0x1d7   : > { %1915 = vst.msk [vmem:[%s3213_s28 + $0x38] sm:$0xf] %vm1900_vm1, %v2178_v20  ;;  %v2179_v41 = vpack.c.bf16 %v1785_v21, %v1785_v21  ;;  %v1727_v60 = vmax.f32 %v1459_v18, %v1672_v5  ;;  %v1460_v7 = vmax.f32 %v3397_v12, %v1407_v59  ;;  %v2461_v22 = vpop.f32.mrb[87].mxu0  ;;  %v2529_v10 = vpop.f32.mrb[87].mxu1 }
 0x1d8   : > { %v3403_v10 = vmax.f32 %v3177_v9, %v3179_v37  ;;  %v3404_v37 = vmax.f32 %v3183_v38, %v3185_v27 }
 0x1d9   : > { %1916 = vst.msk [vmem:[%s3213_s28 + $0x3c] sm:$0xf] %vm1900_vm1, %v2179_v41  ;;  %v1760_v28 = vadd.f32 %v3203_v2, %v1727_v60  ;;  %v1728_v29 = vmax.f32 %v1460_v7, %v1675_v40 }
 0x1db   : > { %v1786_v11 = vmax.f32 %v1760_v28, 0.0  ;;  %v1761_v56 = vadd.f32 %v3203_v2, %v1728_v29 }
 0x1dc   : > { %v1412_v25 = vpop.f32.mrb[88].mxu0  ;;  %v1680_v26 = vpop.f32.mrb[88].mxu1 }
 0x1dd   : > { %v2180_v61 = vpack.c.bf16 %v1786_v11, %v1786_v11  ;;  %v1787_v45 = vmax.f32 %v1761_v56, 0.0  ;;  %v1461_v43 = vmax.f32 %v3398_v39, %v1412_v25  ;;  %v2464_v46 = vpop.f32.mrb[89].mxu0  ;;  %v2532_v55 = vpop.f32.mrb[89].mxu1 }
 0x1de   : > { %v1415_v0 = vpop.f32.mrb[90].mxu0  ;;  %v1683_v1 = vpop.f32.mrb[90].mxu1 }
 0x1df   : > { %1917 = vst.msk [vmem:[%s3213_s28 + $0x40] sm:$0xf] %vm1900_vm1, %v2180_v61  ;;  %v2181_v32 = vpack.c.bf16 %v1787_v45, %v1787_v45  ;;  %v1729_v53 = vmax.f32 %v1461_v43, %v1680_v26  ;;  %v1462_v54 = vmax.f32 %v3399_v30, %v1415_v0  ;;  %v2465_v57 = vpop.f32.mrb[91].mxu0  ;;  %v2533_v31 = vpop.f32.mrb[91].mxu1  ;;  %v3406_v30 = vld [vmem:[#allocation4_spill] sm:$0xff] }
 0x1e1   : > { %1918 = vst.msk [vmem:[%s3213_s28 + $0x44] sm:$0xf] %vm1900_vm1, %v2181_v32  ;;  %v1762_v62 = vadd.f32 %v3203_v2, %v1729_v53  ;;  %v1730_v63 = vmax.f32 %v1462_v54, %v1683_v1  ;;  %v3405_v53 = vld [vmem:[#allocation3_spill] sm:$0xff] }
 0x1e2   : > { %v3407_v54 = vmax.f32 %v3405_v53, %v3406_v30 }
 0x1e3   : > { %v1788_v19 = vmax.f32 %v1762_v62, 0.0  ;;  %v1763_v8 = vadd.f32 %v3203_v2, %v1730_v63 }
 0x1e4   : > { %v1420_v42 = vpop.f32.mrb[92].mxu0  ;;  %v1688_v15 = vpop.f32.mrb[92].mxu1 }
 0x1e5   : > { %v2182_v16 = vpack.c.bf16 %v1788_v19, %v1788_v19  ;;  %v1789_v17 = vmax.f32 %v1763_v8, 0.0  ;;  %v1463_v34 = vmax.f32 %v3400_v24, %v1420_v42  ;;  %v2468_v58 = vpop.f32.mrb[93].mxu0  ;;  %v2536_v47 = vpop.f32.mrb[93].mxu1 }
 0x1e6   : > { %v1423_v49 = vpop.f32.mrb[94].mxu0  ;;  %v1691_v3 = vpop.f32.mrb[94].mxu1 }
 0x1e7   : > { %1919 = vst.msk [vmem:[%s3213_s28 + $0x48] sm:$0xf] %vm1900_vm1, %v2182_v16  ;;  %v2183_v4 = vpack.c.bf16 %v1789_v17, %v1789_v17  ;;  %v1731_v50 = vmax.f32 %v1463_v34, %v1688_v15  ;;  %v1464_v36 = vmax.f32 %v3401_v35, %v1423_v49  ;;  %v2469_v5 = vpop.f32.mrb[95].mxu0  ;;  %v2537_v20 = vpop.f32.mrb[95].mxu1 }
 0x1e9   : > { %1920 = vst.msk [vmem:[%s3213_s28 + $0x4c] sm:$0xf] %vm1900_vm1, %v2183_v4  ;;  %v1764_v48 = vadd.f32 %v3203_v2, %v1731_v50  ;;  %v1732_v52 = vmax.f32 %v1464_v36, %v1691_v3 }
 0x1eb   : > { %v1790_v21 = vmax.f32 %v1764_v48, 0.0  ;;  %v1765_v14 = vadd.f32 %v3203_v2, %v1732_v52 }
 0x1ec   : > { %v1428_v18 = vpop.f32.mrb[96].mxu0  ;;  %v1696_v6 = vpop.f32.mrb[96].mxu1 }
 0x1ed   : > { %v2184_v51 = vpack.c.bf16 %v1790_v21, %v1790_v21  ;;  %v1791_v59 = vmax.f32 %v1765_v14, 0.0  ;;  %v1465_v23 = vmax.f32 %v3402_v13, %v1428_v18  ;;  %v2472_v40 = vpop.f32.mrb[97].mxu0  ;;  %v2540_v41 = vpop.f32.mrb[97].mxu1 }
 0x1ee   : > { %v1431_v60 = vpop.f32.mrb[98].mxu0  ;;  %v1699_v12 = vpop.f32.mrb[98].mxu1 }
 0x1ef   : > { %1921 = vst.msk [vmem:[%s3213_s28 + $0x50] sm:$0xf] %vm1900_vm1, %v2184_v51  ;;  %v2185_v7 = vpack.c.bf16 %v1791_v59, %v1791_v59  ;;  %v1733_v22 = vmax.f32 %v1465_v23, %v1696_v6  ;;  %v1466_v28 = vmax.f32 %v3403_v10, %v1431_v60  ;;  %v2473_v29 = vpop.f32.mrb[99].mxu0  ;;  %v2541_v11 = vpop.f32.mrb[99].mxu1 }
 0x1f1   : > { %1922 = vst.msk [vmem:[%s3213_s28 + $0x54] sm:$0xf] %vm1900_vm1, %v2185_v7  ;;  %v1766_v33 = vadd.f32 %v3203_v2, %v1733_v22  ;;  %v1734_v44 = vmax.f32 %v1466_v28, %v1699_v12 }
 0x1f3   : > { %v1792_v56 = vmax.f32 %v1766_v33, 0.0  ;;  %v1767_v25 = vadd.f32 %v3203_v2, %v1734_v44 }
 0x1f4   : > { %v1436_v26 = vpop.f32.mrb[100].mxu0  ;;  %v1704_v61 = vpop.f32.mrb[100].mxu1 }
 0x1f5   : > { %v2186_v45 = vpack.c.bf16 %v1792_v56, %v1792_v56  ;;  %v1793_v39 = vmax.f32 %v1767_v25, 0.0  ;;  %v1467_v9 = vmax.f32 %v3404_v37, %v1436_v26  ;;  %v2476_v43 = vpop.f32.mrb[101].mxu0  ;;  %v2544_v46 = vpop.f32.mrb[101].mxu1 }
 0x1f6   : > { %v1439_v55 = vpop.f32.mrb[102].mxu0  ;;  %v1707_v0 = vpop.f32.mrb[102].mxu1 }
 0x1f7   : > { %1923 = vst.msk [vmem:[%s3213_s28 + $0x58] sm:$0xf] %vm1900_vm1, %v2186_v45  ;;  %v2187_v1 = vpack.c.bf16 %v1793_v39, %v1793_v39  ;;  %v1735_v32 = vmax.f32 %v1467_v9, %v1704_v61  ;;  %v1468_v57 = vmax.f32 %v3407_v54, %v1439_v55  ;;  %v2477_v31 = vpop.f32.mrb[103].mxu0  ;;  %v2545_v62 = vpop.f32.mrb[103].mxu1 }
 0x1f9   : > { %1924 = vst.msk [vmem:[%s3213_s28 + $0x5c] sm:$0xf] %vm1900_vm1, %v2187_v1  ;;  %v1768_v27 = vadd.f32 %v3203_v2, %v1735_v32  ;;  %v1736_v38 = vmax.f32 %v1468_v57, %v1707_v0 }
 0x1fb   : > { %v1794_v63 = vmax.f32 %v1768_v27, 0.0  ;;  %v1769_v19 = vadd.f32 %v3203_v2, %v1736_v38 }
 0x1fd   : > { %v2188_v8 = vpack.c.bf16 %v1794_v63, %v1794_v63  ;;  %v1795_v42 = vmax.f32 %v1769_v19, 0.0 }
 0x1ff   : > { %1925 = vst.msk [vmem:[%s3213_s28 + $0x60] sm:$0xf] %vm1900_vm1, %v2188_v8  ;;  %v2189_v15 = vpack.c.bf16 %v1795_v42, %v1795_v42 }
 0x201   : > { %1926 = vst.msk [vmem:[%s3213_s28 + $0x64] sm:$0xf] %vm1900_vm1, %v2189_v15 }
 0x202 PF: > { %p10_p9 = scmp.ge.s32.totalorder %s2697_s16, 4   ;;  %s3408_s12 = smov %s2652_s13 }
 0x203   : > { %s3409_s13 = smov %s2706_s19  ;;  %s3410_s14 = smov %s2697_s16 }
 0x204   :  { %12 = sbr.rel (!%p10_p9) target bundleno = 2 (0x2), region = 111 }

// kernel: cnn3_forward.5
= control target key start
LH: loop header
LB: loop body
LE: loop exit
PB: predicated region body
PF: predicated region fallthrough
CT: control target
= control target key end

     0   :  { %s2739_s12 = smov 0   ;;  %s2741_s13 = smov 0   ;;  %s3491_s0 = inlined_call_operand.vmem [shape: bf16[4,96,640], index: 0, kind: input, shape index: {}]   ;;  %s3492_s1 = inlined_call_operand.vmem [shape: bf16[640,128], index: 1, kind: input, shape index: {}]   ;;  %s3493_s2 = inlined_call_operand.vmem [shape: f32[1,128], index: 2, kind: input, shape index: {}]   ;;  %s3494_s3 = inlined_call_operand.vmem [shape: bf16[96,128], index: 3, kind: output, shape index: {}]  }
   0x1   :  { %s2743_s14 = smov 0  }
   0x2 LB: > { %s1870_s15 = sadd.s32 4294967295, %s2715_s14   ;;  %s2756_s16 = sadd.s32 1, %s2715_s14   ;;  %s2715_s14 = sphi %s2743_s14, %s3497_s14   ;;  %s2711_s13 = sphi %s2741_s13, %s3496_s13   ;;  %s2707_s12 = sphi %s2739_s12, %s3495_s12  }
   0x3   : > { %s17_s17 = ssub.s32 %s2715_s14, %s2756_s16  ;;  %s20_s18 = sadd.s32 1, %s2711_s13 }
   0x4   : > { %p18_p0 = scmp.eq.s32.totalorder %s17_s17, 0  ;;  %p27_p1 = scmp.ne.s32.totalorder %s2711_s13, %s2707_s12 }
   0x5   : > { %p28_p2 = scmp.eq.s32.totalorder %s2715_s14, 0  ;;  %p1873_p4 = scmp.ge.s32.totalorder %s2715_s14, 2 }
   0x6   : > { %s2765_s19 = scalar_select %p18_p0, %s2711_s13, %s20_s18  }
   0x7   : > { %p29_p3 = por %p28_p2, %p27_p1  ;;  %127 = sbr.rel (%p1873_p4) target bundleno = 60 (0x3c), region = 24 }
   0xe   : > { %130 = sbr.rel (!%p29_p3) target bundleno = 60 (0x3c), region = 28  ;;  %s132_s20 = sand.u32 (%p29_p3), 1, %s2711_s13  }
   0xf   : > { %s2539_s21 = smul.u32 (%p29_p3), 480, %s132_s20 }
  0x10   : > { %s2542_s22 = smul.u32 (%p29_p3), 120, %s2715_s14 }
  0x11   : > { %s2778_s26 = scalar_lea.vmem (%p29_p3), [#allocation2], %s2539_s21 }
  0x12   : > { %s2773_s25 = scalar_lea.vmem (%p29_p3), %s3491_s0, %s2542_s22 }
  0x13   : > { %v153_v0 = vld [vmem:[%s2773_s25] sm:$0xff] (%p29_p3)  ;;  %v155_v1 = vld [vmem:[%s2773_s25 + $0x8] sm:$0xff] (%p29_p3)  ;;  %v157_v2 = vld [vmem:[%s2773_s25 + $0x14] sm:$0xff] (%p29_p3) }
  0x14   : > { %154 = vst [vmem:[%s2778_s26] sm:$0xff] (%p29_p3), %v153_v0  ;;  %156 = vst [vmem:[%s2778_s26 + $0x8] sm:$0xff] (%p29_p3), %v155_v1  ;;  %v159_v3 = vld [vmem:[%s2773_s25 + $0x1c] sm:$0xff] (%p29_p3)  ;;  %v161_v4 = vld [vmem:[%s2773_s25 + $0x28] sm:$0xff] (%p29_p3) }
  0x15   : > { %158 = vst [vmem:[%s2778_s26 + $0x14] sm:$0xff] %v157_v2  ;;  %v163_v5 = vld [vmem:[%s2773_s25 + $0x30] sm:$0xff]  ;;  %160 = vst [vmem:[%s2778_s26 + $0x1c] sm:$0xff] %v159_v3  ;;  %v165_v6 = vld [vmem:[%s2773_s25 + $0x3c] sm:$0xff] }
  0x16   : > { %162 = vst [vmem:[%s2778_s26 + $0x28] sm:$0xff] %v161_v4  ;;  %164 = vst [vmem:[%s2778_s26 + $0x30] sm:$0xff] %v163_v5  ;;  %v167_v7 = vld [vmem:[%s2773_s25 + $0x44] sm:$0xff]  ;;  %v169_v8 = vld [vmem:[%s2773_s25 + $0x50] sm:$0xff] }
  0x17   : > { %166 = vst [vmem:[%s2778_s26 + $0x3c] sm:$0xff] %v165_v6  ;;  %168 = vst [vmem:[%s2778_s26 + $0x44] sm:$0xff] %v167_v7  ;;  %v171_v9 = vld [vmem:[%s2773_s25 + $0x58] sm:$0xff]  ;;  %v173_v10 = vld [vmem:[%s2773_s25 + $0x64] sm:$0xff] }
  0x18   : > { %170 = vst [vmem:[%s2778_s26 + $0x50] sm:$0xff] %v169_v8  ;;  %v175_v11 = vld [vmem:[%s2773_s25 + $0x6c] sm:$0xff]  ;;  %172 = vst [vmem:[%s2778_s26 + $0x58] sm:$0xff] %v171_v9  ;;  %v179_v13 = vld [vmem:[%s2773_s25 + $0xf8] sm:$0xff] }
  0x19   : > { %174 = vst [vmem:[%s2778_s26 + $0x64] sm:$0xff] %v173_v10  ;;  %176 = vst [vmem:[%s2778_s26 + $0x6c] sm:$0xff] %v175_v11  ;;  %v177_v12 = vld [vmem:[%s2773_s25 + $0xf0] sm:$0xff]  ;;  %v181_v14 = vld [vmem:[%s2773_s25 + $0x104] sm:$0xff] }
  0x1a   : > { %178 = vst [vmem:[%s2778_s26 + $0x78] sm:$0xff] %v177_v12  ;;  %180 = vst [vmem:[%s2778_s26 + $0x80] sm:$0xff] %v179_v13  ;;  %v183_v15 = vld [vmem:[%s2773_s25 + $0x10c] sm:$0xff]  ;;  %v185_v16 = vld [vmem:[%s2773_s25 + $0x118] sm:$0xff] }
  0x1b   : > { %182 = vst [vmem:[%s2778_s26 + $0x8c] sm:$0xff] %v181_v14  ;;  %v187_v17 = vld [vmem:[%s2773_s25 + $0x120] sm:$0xff]  ;;  %184 = vst [vmem:[%s2778_s26 + $0x94] sm:$0xff] %v183_v15  ;;  %v189_v18 = vld [vmem:[%s2773_s25 + $0x12c] sm:$0xff] }
  0x1c   : > { %186 = vst [vmem:[%s2778_s26 + $0xa0] sm:$0xff] %v185_v16  ;;  %188 = vst [vmem:[%s2778_s26 + $0xa8] sm:$0xff] %v187_v17  ;;  %v191_v19 = vld [vmem:[%s2773_s25 + $0x134] sm:$0xff]  ;;  %v193_v20 = vld [vmem:[%s2773_s25 + $0x140] sm:$0xff] }
  0x1d   : > { %190 = vst [vmem:[%s2778_s26 + $0xb4] sm:$0xff] %v189_v18  ;;  %192 = vst [vmem:[%s2778_s26 + $0xbc] sm:$0xff] %v191_v19  ;;  %v195_v21 = vld [vmem:[%s2773_s25 + $0x148] sm:$0xff]  ;;  %v197_v22 = vld [vmem:[%s2773_s25 + $0x154] sm:$0xff] }
  0x1e   : > { %194 = vst [vmem:[%s2778_s26 + $0xc8] sm:$0xff] %v193_v20  ;;  %v199_v23 = vld [vmem:[%s2773_s25 + $0x15c] sm:$0xff]  ;;  %196 = vst [vmem:[%s2778_s26 + $0xd0] sm:$0xff] %v195_v21  ;;  %v203_v25 = vld [vmem:[%s2773_s25 + $0x1e8] sm:$0xff] }
  0x1f   : > { %198 = vst [vmem:[%s2778_s26 + $0xdc] sm:$0xff] %v197_v22  ;;  %200 = vst [vmem:[%s2778_s26 + $0xe4] sm:$0xff] %v199_v23  ;;  %v201_v24 = vld [vmem:[%s2773_s25 + $0x1e0] sm:$0xff]  ;;  %v205_v26 = vld [vmem:[%s2773_s25 + $0x1f4] sm:$0xff] }
  0x20   : > { %202 = vst [vmem:[%s2778_s26 + $0xf0] sm:$0xff] %v201_v24  ;;  %204 = vst [vmem:[%s2778_s26 + $0xf8] sm:$0xff] %v203_v25  ;;  %v207_v27 = vld [vmem:[%s2773_s25 + $0x1fc] sm:$0xff]  ;;  %v209_v28 = vld [vmem:[%s2773_s25 + $0x208] sm:$0xff] }
  0x21   : > { %206 = vst [vmem:[%s2778_s26 + $0x104] sm:$0xff] %v205_v26  ;;  %v211_v29 = vld [vmem:[%s2773_s25 + $0x210] sm:$0xff]  ;;  %208 = vst [vmem:[%s2778_s26 + $0x10c] sm:$0xff] %v207_v27  ;;  %v213_v30 = vld [vmem:[%s2773_s25 + $0x21c] sm:$0xff] }
  0x22   : > { %210 = vst [vmem:[%s2778_s26 + $0x118] sm:$0xff] %v209_v28  ;;  %212 = vst [vmem:[%s2778_s26 + $0x120] sm:$0xff] %v211_v29  ;;  %v215_v31 = vld [vmem:[%s2773_s25 + $0x224] sm:$0xff]  ;;  %v217_v32 = vld [vmem:[%s2773_s25 + $0x230] sm:$0xff] }
  0x23   : > { %214 = vst [vmem:[%s2778_s26 + $0x12c] sm:$0xff] %v213_v30  ;;  %216 = vst [vmem:[%s2778_s26 + $0x134] sm:$0xff] %v215_v31  ;;  %v219_v33 = vld [vmem:[%s2773_s25 + $0x238] sm:$0xff]  ;;  %v221_v34 = vld [vmem:[%s2773_s25 + $0x244] sm:$0xff] }
  0x24   : > { %218 = vst [vmem:[%s2778_s26 + $0x140] sm:$0xff] %v217_v32  ;;  %v223_v35 = vld [vmem:[%s2773_s25 + $0x24c] sm:$0xff]  ;;  %220 = vst [vmem:[%s2778_s26 + $0x148] sm:$0xff] %v219_v33  ;;  %v227_v37 = vld [vmem:[%s2773_s25 + $0x2d8] sm:$0xff] }
  0x25   : > { %222 = vst [vmem:[%s2778_s26 + $0x154] sm:$0xff] %v221_v34  ;;  %224 = vst [vmem:[%s2778_s26 + $0x15c] sm:$0xff] %v223_v35  ;;  %v225_v36 = vld [vmem:[%s2773_s25 + $0x2d0] sm:$0xff]  ;;  %v229_v38 = vld [vmem:[%s2773_s25 + $0x2e4] sm:$0xff] }
  0x26   : > { %226 = vst [vmem:[%s2778_s26 + $0x168] sm:$0xff] %v225_v36  ;;  %228 = vst [vmem:[%s2778_s26 + $0x170] sm:$0xff] %v227_v37  ;;  %v231_v39 = vld [vmem:[%s2773_s25 + $0x2ec] sm:$0xff]  ;;  %v233_v40 = vld [vmem:[%s2773_s25 + $0x2f8] sm:$0xff] }
  0x27   : > { %230 = vst [vmem:[%s2778_s26 + $0x17c] sm:$0xff] %v229_v38  ;;  %v235_v41 = vld [vmem:[%s2773_s25 + $0x300] sm:$0xff]  ;;  %232 = vst [vmem:[%s2778_s26 + $0x184] sm:$0xff] %v231_v39  ;;  %v237_v42 = vld [vmem:[%s2773_s25 + $0x30c] sm:$0xff] }
  0x28   : > { %234 = vst [vmem:[%s2778_s26 + $0x190] sm:$0xff] %v233_v40  ;;  %236 = vst [vmem:[%s2778_s26 + $0x198] sm:$0xff] %v235_v41  ;;  %v239_v43 = vld [vmem:[%s2773_s25 + $0x314] sm:$0xff]  ;;  %v241_v44 = vld [vmem:[%s2773_s25 + $0x320] sm:$0xff] }
  0x29   : > { %238 = vst [vmem:[%s2778_s26 + $0x1a4] sm:$0xff] %v237_v42  ;;  %240 = vst [vmem:[%s2778_s26 + $0x1ac] sm:$0xff] %v239_v43  ;;  %v243_v45 = vld [vmem:[%s2773_s25 + $0x328] sm:$0xff]  ;;  %v245_v46 = vld [vmem:[%s2773_s25 + $0x334] sm:$0xff] }
  0x2a   : > { %242 = vst [vmem:[%s2778_s26 + $0x1b8] sm:$0xff] %v241_v44  ;;  %v247_v47 = vld [vmem:[%s2773_s25 + $0x33c] sm:$0xff]  ;;  %244 = vst [vmem:[%s2778_s26 + $0x1c0] sm:$0xff] %v243_v45  ;;  %v1875_v48 = vld [vmem:[%s2773_s25 + $0x10] sm:$0xf] }
  0x2b   : > { %246 = vst [vmem:[%s2778_s26 + $0x1cc] sm:$0xff] %v245_v46  ;;  %248 = vst [vmem:[%s2778_s26 + $0x1d4] sm:$0xff] %v247_v47  ;;  %v1877_v49 = vld [vmem:[%s2773_s25 + $0x24] sm:$0xf]  ;;  %v1879_v50 = vld [vmem:[%s2773_s25 + $0x38] sm:$0xf] }
  0x2c   : > { %1876 = vst [vmem:[%s2778_s26 + $0x10] sm:$0xf] %v1875_v48  ;;  %1878 = vst [vmem:[%s2778_s26 + $0x24] sm:$0xf] %v1877_v49  ;;  %v1881_v51 = vld [vmem:[%s2773_s25 + $0x4c] sm:$0xf] }
  0x2d   : > { %1880 = vst [vmem:[%s2778_s26 + $0x38] sm:$0xf] %v1879_v50  ;;  %v1883_v52 = vld [vmem:[%s2773_s25 + $0x60] sm:$0xf]  ;;  %v1885_v53 = vld [vmem:[%s2773_s25 + $0x74] sm:$0xf] }
  0x2e   : > { %1882 = vst [vmem:[%s2778_s26 + $0x4c] sm:$0xf] %v1881_v51  ;;  %1884 = vst [vmem:[%s2778_s26 + $0x60] sm:$0xf] %v1883_v52  ;;  %v1887_v54 = vld [vmem:[%s2773_s25 + $0x100] sm:$0xf] }
  0x2f   : > { %1886 = vst [vmem:[%s2778_s26 + $0x74] sm:$0xf] %v1885_v53  ;;  %v1889_v55 = vld [vmem:[%s2773_s25 + $0x114] sm:$0xf]  ;;  %v1891_v56 = vld [vmem:[%s2773_s25 + $0x128] sm:$0xf] }
  0x30   : > { %1888 = vst [vmem:[%s2778_s26 + $0x88] sm:$0xf] %v1887_v54  ;;  %1890 = vst [vmem:[%s2778_s26 + $0x9c] sm:$0xf] %v1889_v55  ;;  %v1893_v57 = vld [vmem:[%s2773_s25 + $0x13c] sm:$0xf] }
  0x31   : > { %1892 = vst [vmem:[%s2778_s26 + $0xb0] sm:$0xf] %v1891_v56  ;;  %v1895_v58 = vld [vmem:[%s2773_s25 + $0x150] sm:$0xf]  ;;  %v1897_v59 = vld [vmem:[%s2773_s25 + $0x164] sm:$0xf] }
  0x32   : > { %1894 = vst [vmem:[%s2778_s26 + $0xc4] sm:$0xf] %v1893_v57  ;;  %1896 = vst [vmem:[%s2778_s26 + $0xd8] sm:$0xf] %v1895_v58  ;;  %v1899_v60 = vld [vmem:[%s2773_s25 + $0x1f0] sm:$0xf] }
  0x33   : > { %1898 = vst [vmem:[%s2778_s26 + $0xec] sm:$0xf] %v1897_v59  ;;  %v1901_v61 = vld [vmem:[%s2773_s25 + $0x204] sm:$0xf]  ;;  %v1903_v62 = vld [vmem:[%s2773_s25 + $0x218] sm:$0xf] }
  0x34   : > { %1900 = vst [vmem:[%s2778_s26 + $0x100] sm:$0xf] %v1899_v60  ;;  %1902 = vst [vmem:[%s2778_s26 + $0x114] sm:$0xf] %v1901_v61  ;;  %v1905_v63 = vld [vmem:[%s2773_s25 + $0x22c] sm:$0xf] }
  0x35   : > { %1904 = vst [vmem:[%s2778_s26 + $0x128] sm:$0xf] %v1903_v62  ;;  %v1907_v0 = vld [vmem:[%s2773_s25 + $0x240] sm:$0xf]  ;;  %v1909_v1 = vld [vmem:[%s2773_s25 + $0x254] sm:$0xf] }
  0x36   : > { %1906 = vst [vmem:[%s2778_s26 + $0x13c] sm:$0xf] %v1905_v63  ;;  %1908 = vst [vmem:[%s2778_s26 + $0x150] sm:$0xf] %v1907_v0  ;;  %v1911_v2 = vld [vmem:[%s2773_s25 + $0x2e0] sm:$0xf] }
  0x37   : > { %1910 = vst [vmem:[%s2778_s26 + $0x164] sm:$0xf] %v1909_v1  ;;  %v1913_v3 = vld [vmem:[%s2773_s25 + $0x2f4] sm:$0xf]  ;;  %v1915_v4 = vld [vmem:[%s2773_s25 + $0x308] sm:$0xf] }
  0x38   : > { %1912 = vst [vmem:[%s2778_s26 + $0x178] sm:$0xf] %v1911_v2  ;;  %1914 = vst [vmem:[%s2778_s26 + $0x18c] sm:$0xf] %v1913_v3  ;;  %v1917_v5 = vld [vmem:[%s2773_s25 + $0x31c] sm:$0xf] }
  0x39   : > { %1916 = vst [vmem:[%s2778_s26 + $0x1a0] sm:$0xf] %v1915_v4  ;;  %v1919_v6 = vld [vmem:[%s2773_s25 + $0x330] sm:$0xf]  ;;  %v1921_v7 = vld [vmem:[%s2773_s25 + $0x344] sm:$0xf] }
  0x3a   : > { %1918 = vst [vmem:[%s2778_s26 + $0x1b4] sm:$0xf] %v1917_v5  ;;  %1920 = vst [vmem:[%s2778_s26 + $0x1c8] sm:$0xf] %v1919_v6 }
  0x3b   : > { %1922 = vst [vmem:[%s2778_s26 + $0x1dc] sm:$0xf] %v1921_v7 }
  0x3c PF: > { %p1923_p5 = scmp.ge.s32.totalorder %s2715_s14, 1  ;;  %p308_p6 = scmp.lt.s32.totalorder %s2715_s14, 3 }
  0x3e   : > { %p309_p7 = pnand %p1923_p5, %p308_p6 }
  0x3f   : > { %v2926_v8 = vld [vmem:[%s3492_s1 + $0x40] sm:$0xff] (!%p309_p7)   ;;  %v2949_v12 = vld [vmem:[%s3492_s1 + $0x48] sm:$0xff] (!%p309_p7)   ;;  %v2973_v16 = vld [vmem:[%s3492_s1 + $0x50] sm:$0xff] (!%p309_p7)   ;;  %s315_s4 = sand.u32 (!%p309_p7), 1, %s2707_s12   ;;  %v2717_v42 = vmov (!%p309_p7), 0.0   ;;  %vm2718_vm0 = vmmov (!%p309_p7), 0  }
  0x40   : > { %312 = sbr.rel (%p309_p7) target bundleno = 503 (0x1f7), region = 54  ;;  %v2931_v9 = vld [vmem:[%s3492_s1 + $0xc0] sm:$0xff] (!%p309_p7)   ;;  %2111 = vmatprep.subr.bf16.mxu0 (!%p309_p7), %v2926_v8  ;;  %v2955_v13 = vld [vmem:[%s3492_s1 + $0xc8] sm:$0xff] (!%p309_p7)   ;;  %v2979_v17 = vld [vmem:[%s3492_s1 + $0xd0] sm:$0xff] (!%p309_p7)  }
  0x41   : > { %v2937_v10 = vld [vmem:[%s3492_s1] sm:$0xff] (!%p309_p7)   ;;  %2145 = vmatprep.subr.bf16.mxu1 (!%p309_p7), %v2931_v9  ;;  %v2961_v14 = vld [vmem:[%s3492_s1 + $0x8] sm:$0xff] (!%p309_p7)   ;;  %v2985_v18 = vld [vmem:[%s3492_s1 + $0x10] sm:$0xff] (!%p309_p7)   ;;  %s2541_s12 = smul.u32 (!%p309_p7), 480, %s315_s4 }
  0x42   : > { %v2943_v11 = vld [vmem:[%s3492_s1 + $0x80] sm:$0xff] (!%p309_p7)   ;;  %2112 = vmatpush3.bf16.msra.mxu0 (!%p309_p7), %v2937_v10  ;;  %v2967_v15 = vld [vmem:[%s3492_s1 + $0x88] sm:$0xff] (!%p309_p7)   ;;  %v2991_v19 = vld [vmem:[%s3492_s1 + $0x90] sm:$0xff] (!%p309_p7)   ;;  %s339_s24 = smul.u32 (!%p309_p7), 6, %s1870_s15 }
  0x43   : > { %2146 = vmatpush3.bf16.msra.mxu1 (!%p309_p7), %v2943_v11  ;;  %2113 = vmatprep.subr.bf16.mxu0 (!%p309_p7), %v2949_v12  ;;  %v2997_v20 = vld [vmem:[%s3492_s1 + $0x58] sm:$0xff] (!%p309_p7)   ;;  %v3021_v24 = vld [vmem:[%s3492_s1 + $0x60] sm:$0xff] (!%p309_p7)   ;;  %v3045_v28 = vld [vmem:[%s3492_s1 + $0x68] sm:$0xff] (!%p309_p7)   ;;  %s3115_s29 = scalar_lea.vmem (!%p309_p7), [#allocation2], %s2541_s12 }
  0x44   : > { %2147 = vmatprep.subr.bf16.mxu1 (!%p309_p7), %v2955_v13  ;;  %v3003_v21 = vld [vmem:[%s3492_s1 + $0xd8] sm:$0xff] (!%p309_p7)   ;;  %v3027_v25 = vld [vmem:[%s3492_s1 + $0xe0] sm:$0xff] (!%p309_p7)   ;;  %v3051_v29 = vld [vmem:[%s3492_s1 + $0xe8] sm:$0xff] (!%p309_p7)   ;;  %p340_p8 = scmp.lt.s32.totalorder (!%p309_p7), %s339_s24, 11 }
  0x45   : > { %v3009_v22 = vld [vmem:[%s3492_s1 + $0x18] sm:$0xff] (!%p309_p7)   ;;  %v3033_v26 = vld [vmem:[%s3492_s1 + $0x20] sm:$0xff] (!%p309_p7)   ;;  %v3057_v30 = vld [vmem:[%s3492_s1 + $0x28] sm:$0xff] (!%p309_p7)  }
  0x46   : > { %2114 = vmatpush3.bf16.msra.mxu0 (!%p309_p7), %v2961_v14  ;;  %v3015_v23 = vld [vmem:[%s3492_s1 + $0x98] sm:$0xff] (!%p309_p7)   ;;  %v3039_v27 = vld [vmem:[%s3492_s1 + $0xa0] sm:$0xff] (!%p309_p7)   ;;  %v3064_v31 = vld [vmem:[%s3492_s1 + $0xa8] sm:$0xff] (!%p309_p7)  }
  0x47   : > { %2148 = vmatpush3.bf16.msra.mxu1 %v2967_v15  ;;  %2115 = vmatprep.subr.bf16.mxu0 %v2973_v16  ;;  %v3070_v32 = vld [vmem:[%s3492_s1 + $0x70] sm:$0xff]   ;;  %v3094_v36 = vld [vmem:[%s3492_s1 + $0x78] sm:$0xff]   ;;  %v2606_v44 = vld [vmem:[%s3115_s29 + $0xc] ss:$20 sps:$4 sm:$0xff]   ;;  %s3499_s24 = smov (!%p340_p8, %s339_s24), 11 }
  0x48   : > { %2149 = vmatprep.subr.bf16.mxu1 %v2979_v17  ;;  %v3076_v33 = vld [vmem:[%s3492_s1 + $0xf0] sm:$0xff]   ;;  %v3100_v37 = vld [vmem:[%s3492_s1 + $0xf8] sm:$0xff]   ;;  %v3127_v45 = vld [vmem:[%s3492_s1 + $0x100] sm:$0xff]   ;;  %851 = vmatprep.mubr.bf16.mxu1 %v2606_v44  ;;  %s1924_s14 = sshll.u32 %s3499_s24, 2 }
  0x49   : > { %v3082_v34 = vld [vmem:[%s3492_s1 + $0x30] sm:$0xff]   ;;  %v3106_v38 = vld [vmem:[%s3492_s1 + $0x38] sm:$0xff]   ;;  %v3133_v46 = vld [vmem:[%s3492_s1 + $0x108] sm:$0xff]   ;;  %s3472_s28 = scalar_lea.vmem %s3494_s3, %s1924_s14 }
  0x4a   : > { %2116 = vmatpush3.bf16.msra.mxu0 %v2985_v18  ;;  %v3088_v35 = vld [vmem:[%s3492_s1 + $0xb0] sm:$0xff]   ;;  %v3112_v39 = vld [vmem:[%s3492_s1 + $0xb8] sm:$0xff]   ;;  %v2610_v47 = vld [vmem:[%s3115_s29 + $0x2c] ss:$20 sps:$4 sm:$0xff]  }
  0x4b   : > { %2150 = vmatpush3.bf16.msra.mxu1 %v2991_v19  ;;  %2117 = vmatprep.subr.bf16.mxu0 %v2997_v20  ;;  %v2601_v40 = vld [vmem:[%s3115_s29] ss:$20 sps:$4 sm:$0xff]   ;;  %v2603_v41 = vld [vmem:[%s3115_s29 + $0x4] ss:$20 sps:$4 sm:$0xff]   ;;  %v2604_v43 = vld [vmem:[%s3115_s29 + $0x8] ss:$20 sps:$4 sm:$0xff]  }
  0x4c   : > { %2151 = vmatprep.subr.bf16.mxu1 %v3003_v21  ;;  %794 = vmatprep.mubr.bf16.mxu0 %v2603_v41  ;;  %v2612_v48 = vld [vmem:[%s3115_s29 + $0x34] ss:$20 sps:$4 sm:$0xff]   ;;  %v2616_v51 = vld [vmem:[%s3115_s29 + $0x30] ss:$20 sps:$4 sm:$0xff]   ;;  %v3157_v54 = vld [vmem:[%s3492_s1 + $0x118] sm:$0xff]  }
  0x4d   : > { %v3143_v49 = vld [vmem:[%s3492_s1 + $0x110] sm:$0xff]   ;;  %v2615_v50 = vld [vmem:[%s3115_s29 + $0x28] ss:$20 sps:$4 sm:$0xff]   ;;  %v3165_v55 = vld [vmem:[%s3492_s1 + $0x120] sm:$0xff]  }
  0x4e   : > { %2118 = vmatpush3.bf16.msra.mxu0 %v3009_v22  ;;  %v2618_v52 = vld [vmem:[%s3115_s29 + $0x54] ss:$20 sps:$4 sm:$0xff]   ;;  %v2620_v53 = vld [vmem:[%s3115_s29 + $0x5c] ss:$20 sps:$4 sm:$0xff]   ;;  %v2624_v57 = vld [vmem:[%s3115_s29 + $0x58] ss:$20 sps:$4 sm:$0xff]  }
  0x4f   : > { %2152 = vmatpush3.bf16.msra.mxu1 %v3015_v23  ;;  %2119 = vmatprep.subr.bf16.mxu0 %v3021_v24  ;;  %v2623_v56 = vld [vmem:[%s3115_s29 + $0x50] ss:$20 sps:$4 sm:$0xff]   ;;  %v3178_v59 = vld [vmem:[%s3492_s1 + $0x128] sm:$0xff]   ;;  %v3198_v61 = vld [vmem:[%s3492_s1 + $0x138] sm:$0xff]  }
  0x50   : > { %2153 = vmatprep.subr.bf16.mxu1 %v3027_v25  ;;  %v2630_v58 = vld [vmem:[%s3115_s29 + $0x7c] ss:$20 sps:$4 sm:$0xff]   ;;  %v2628_v63 = vld [vmem:[%s3115_s29 + $0x78] ss:$20 sps:$4 sm:$0xff]   ;;  %v2635_v2 = vld [vmem:[%s3115_s29 + $0xa0] ss:$20 sps:$4 sm:$0xff]  }
  0x51   : > { %v3189_v60 = vld [vmem:[%s3492_s1 + $0x130] sm:$0xff]   ;;  %v2633_v0 = vld [vmem:[%s3115_s29 + $0xa4] ss:$20 sps:$4 sm:$0xff]   ;;  %v2636_v3 = vld [vmem:[%s3115_s29 + $0xcc] ss:$20 sps:$4 sm:$0xff]  }
  0x52   : > { %2120 = vmatpush3.bf16.msra.mxu0 %v3033_v26  ;;  %v2627_v62 = vld [vmem:[%s3115_s29 + $0x10] ss:$20 sps:$4 sm:$0xff]   ;;  %v2631_v1 = vld [vmem:[%s3115_s29 + $0x38] ss:$20 sps:$4 sm:$0xff]   ;;  %v2632_v4 = vld [vmem:[%s3115_s29 + $0x60] ss:$20 sps:$4 sm:$0xff]  }
  0x53   : > { %2154 = vmatpush3.bf16.msra.mxu1 %v3039_v27  ;;  %2121 = vmatprep.subr.bf16.mxu0 %v3045_v28  ;;  %v2641_v5 = vld [vmem:[%s3115_s29 + $0x84] ss:$20 sps:$4 sm:$0xff]   ;;  %v2638_v6 = vld [vmem:[%s3115_s29 + $0xc8] ss:$20 sps:$4 sm:$0xff]   ;;  %v2639_v7 = vld [vmem:[%s3115_s29 + $0x80] ss:$20 sps:$4 sm:$0xff]  }
  0x54   : > { %2155 = vmatprep.subr.bf16.mxu1 %v3051_v29  ;;  %v2643_v41 = vld [vmem:[%s3115_s29 + $0xac] ss:$20 sps:$4 sm:$0xff]   ;;  %v2646_v44 = vld [vmem:[%s3115_s29 + $0xb0] ss:$20 sps:$4 sm:$0xff]  }
  0x56   : > { %2122 = vmatpush3.bf16.msra.mxu0 %v3057_v30 }
  0x57   : > { %2156 = vmatpush3.bf16.msra.mxu1 %v3064_v31  ;;  %2123 = vmatprep.subr.bf16.mxu0 %v3070_v32 }
  0x58   : > { %2157 = vmatprep.subr.bf16.mxu1 %v3076_v33 }
  0x5a   : > { %2124 = vmatpush3.bf16.msra.mxu0 %v3082_v34 }
  0x5b   : > { %2158 = vmatpush3.bf16.msra.mxu1 %v3088_v35  ;;  %2125 = vmatprep.subr.bf16.mxu0 %v3094_v36 }
  0x5c   : > { %2159 = vmatprep.subr.bf16.mxu1 %v3100_v37 }
  0x5e   : > { %2126 = vmatpush3.bf16.msra.mxu0 %v3106_v38 }
  0x5f   : > { %2160 = vmatpush3.bf16.msra.mxu1 %v3112_v39  ;;  %2427 = vmatprep.subr.bf16.mxu0 %v2717_v42 }
  0x60   : > { %2190 = vmatprep.subr.bf16.mxu1 %v2926_v8 }
  0x61   : > { %795 = vmatmul.mubr.bf16.vlgmr.msra.gmra.mrb[0].mxu0 %v2601_v40  ;;  %v2642_v40 = vld [vmem:[%s3115_s29 + $0x88] ss:$20 sps:$4 sm:$0xff]  }
  0x62   : > { %852 = vmatmul.mubr.bf16.vlgmr.msra.gmra.mrb[0].mxu1 %v2604_v43  ;;  %2428 = vmatpush3.bf16.msra.mxu0 %v3127_v45  ;;  %v2645_v43 = vld [vmem:[%s3115_s29 + $0xa8] ss:$20 sps:$4 sm:$0xff]  }
  0x63   : > { %2191 = vmatpush3.bf16.msra.mxu1 %v2937_v10  ;;  %2429 = vmatprep.subr.bf16.mxu0 %v2717_v42 }
  0x64   : > { %2192 = vmatprep.subr.bf16.mxu1 %v2949_v12  ;;  %802 = vmatprep.mubr.bf16.mxu0 %v2610_v47  ;;  %v2647_v47 = vld [vmem:[%s3115_s29 + $0xd4] ss:$20 sps:$4 sm:$0xff]  }
  0x65   : > { %859 = vmatprep.mubr.bf16.mxu1 %v2612_v48  ;;  %v2649_v48 = vld [vmem:[%s3115_s29 + $0xd0] ss:$20 sps:$4 sm:$0xff]  }
  0x66   : > { %2430 = vmatpush3.bf16.msra.mxu0 %v3133_v46 }
  0x67   : > { %2193 = vmatpush3.bf16.msra.mxu1 %v2961_v14  ;;  %2431 = vmatprep.subr.bf16.mxu0 %v2717_v42 }
  0x68   : > { %2194 = vmatprep.subr.bf16.mxu1 %v2973_v16 }
  0x69   : > { %803 = vmatmul.mubr.bf16.gmra.mrb[4].mxu0 %v2615_v50  ;;  %v2650_v50 = vld [vmem:[%s3115_s29 + $0xd8] ss:$20 sps:$4 sm:$0xff]  }
  0x6a   : > { %2432 = vmatpush3.bf16.msra.mxu0 %v3143_v49  ;;  %860 = vmatmul.mubr.bf16.gmra.mrb[4].mxu1 %v2616_v51  ;;  %v2653_v51 = vld [vmem:[%s3115_s29 + $0xf4] ss:$20 sps:$4 sm:$0xff]  }
  0x6b   : > { %2195 = vmatpush3.bf16.msra.mxu1 %v2985_v18  ;;  %2433 = vmatprep.subr.bf16.mxu0 %v2717_v42 }
  0x6c   : > { %2196 = vmatprep.subr.bf16.mxu1 %v2997_v20  ;;  %810 = vmatprep.mubr.bf16.mxu0 %v2618_v52  ;;  %v2656_v52 = vld [vmem:[%s3115_s29 + $0xfc] ss:$20 sps:$4 sm:$0xff]  }
  0x6d   : > { %867 = vmatprep.mubr.bf16.mxu1 %v2620_v53  ;;  %v2651_v53 = vld [vmem:[%s3115_s29 + $0xf0] ss:$20 sps:$4 sm:$0xff]  }
  0x6e   : > { %2434 = vmatpush3.bf16.msra.mxu0 %v3157_v54 }
  0x6f   : > { %2197 = vmatpush3.bf16.msra.mxu1 %v3009_v22  ;;  %2435 = vmatprep.subr.bf16.mxu0 %v2717_v42 }
  0x70   : > { %2198 = vmatprep.subr.bf16.mxu1 %v3021_v24 }
  0x71   : > { %811 = vmatmul.mubr.bf16.gmra.mrb[8].mxu0 %v2623_v56  ;;  %v2654_v56 = vld [vmem:[%s3115_s29 + $0xf8] ss:$20 sps:$4 sm:$0xff]  }
  0x72   : > { %2436 = vmatpush3.bf16.msra.mxu0 %v3165_v55  ;;  %868 = vmatmul.mubr.bf16.gmra.mrb[8].mxu1 %v2624_v57  ;;  %v2657_v57 = vld [vmem:[%s3115_s29 + $0x11c] ss:$20 sps:$4 sm:$0xff]  }
  0x73   : > { %2199 = vmatpush3.bf16.msra.mxu1 %v3033_v26  ;;  %2437 = vmatprep.subr.bf16.mxu0 %v2717_v42 }
  0x74   : > { %2200 = vmatprep.subr.bf16.mxu1 %v3045_v28  ;;  %2443 = vmatprep.mubr.msk.bf16.mxu0 %vm2718_vm0, %v2717_v42 }
  0x75   : > { %1062 = vmatprep.mubr.bf16.mxu1 %v2630_v58  ;;  %v2659_v58 = vld [vmem:[%s3115_s29 + $0x124] ss:$20 sps:$4 sm:$0xff]  }
  0x76   : > { %2438 = vmatpush3.bf16.msra.mxu0 %v3178_v59 }
  0x77   : > { %2201 = vmatpush3.bf16.msra.mxu1 %v3057_v30  ;;  %2439 = vmatprep.subr.bf16.mxu0 %v2717_v42 }
  0x78   : > { %2202 = vmatprep.subr.bf16.mxu1 %v3070_v32 }
  0x7a   : > { %2440 = vmatpush3.bf16.msra.mxu0 %v3189_v60 }
  0x7b   : > { %2203 = vmatpush3.bf16.msra.mxu1 %v3082_v34  ;;  %2441 = vmatprep.subr.bf16.mxu0 %v2717_v42 }
  0x7c   : > { %2204 = vmatprep.subr.bf16.mxu1 %v3094_v36 }
  0x7e   : > { %2442 = vmatpush3.bf16.msra.mxu0 %v3198_v61 }
  0x7f   : > { %2205 = vmatpush3.bf16.msra.mxu1 %v3106_v38  ;;  %2224 = vmatprep.subr.bf16.mxu0 %v2931_v9 }
  0x80   : > { %2455 = vmatprep.subr.bf16.mxu1 %v2717_v42 }
  0x81   : > { %2444 = vmatmul.mubr.bf16.vlgmr.msra.gmra.mrb[12].mxu0 %v2627_v62  ;;  %v2661_v62 = vld [vmem:[%s3115_s29 + $0x118] ss:$20 sps:$4 sm:$0xff]  }
  0x82   : > { %1063 = vmatmul.mubr.bf16.vlgmr.msra.gmra.mrb[12].mxu1 %v2628_v63  ;;  %2225 = vmatpush3.bf16.msra.mxu0 %v2943_v11  ;;  %v2663_v63 = vld [vmem:[%s3115_s29 + $0x144] ss:$20 sps:$4 sm:$0xff]  }
  0x83   : > { %2456 = vmatpush3.bf16.msra.mxu1 %v3127_v45  ;;  %2226 = vmatprep.subr.bf16.mxu0 %v2955_v13 }
  0x84   : > { %2457 = vmatprep.subr.bf16.mxu1 %v2717_v42  ;;  %2447 = vmatprep.mubr.msk.bf16.mxu0 %vm2718_vm0, %v2717_v42 }
  0x85   : > { %1070 = vmatprep.mubr.bf16.mxu1 %v2633_v0 }
  0x86   : > { %2227 = vmatpush3.bf16.msra.mxu0 %v2967_v15 }
  0x87   : > { %2458 = vmatpush3.bf16.msra.mxu1 %v3133_v46  ;;  %2228 = vmatprep.subr.bf16.mxu0 %v2979_v17 }
  0x88   : > { %2459 = vmatprep.subr.bf16.mxu1 %v2717_v42 }
  0x89   : > { %2448 = vmatmul.mubr.bf16.gmra.mrb[16].mxu0 %v2631_v1 }
  0x8a   : > { %2229 = vmatpush3.bf16.msra.mxu0 %v2991_v19  ;;  %2451 = vmatprep.mubr.msk.bf16.mxu0 %vm2718_vm0, %v2717_v42 }
  0x8b   : > { %2460 = vmatpush3.bf16.msra.mxu1 %v3143_v49  ;;  %2230 = vmatprep.subr.bf16.mxu0 %v3003_v21 }
  0x8c   : > { %2461 = vmatprep.subr.bf16.mxu1 %v2717_v42  ;;  %1071 = vmatmul.mubr.bf16.gmra.mrb[16].mxu1 %v2635_v2 }
  0x8d   : > { %1078 = vmatprep.mubr.bf16.mxu1 %v2636_v3 }
  0x8e   : > { %2231 = vmatpush3.bf16.msra.mxu0 %v3015_v23 }
  0x8f   : > { %2462 = vmatpush3.bf16.msra.mxu1 %v3157_v54  ;;  %2232 = vmatprep.subr.bf16.mxu0 %v3027_v25 }
  0x90   : > { %2463 = vmatprep.subr.bf16.mxu1 %v2717_v42 }
  0x91   : > { %2452 = vmatmul.mubr.bf16.gmra.mrb[20].mxu0 %v2632_v4 }
  0x92   : > { %2233 = vmatpush3.bf16.msra.mxu0 %v3039_v27  ;;  %1119 = vmatprep.mubr.bf16.mxu0 %v2641_v5 }
  0x93   : > { %2464 = vmatpush3.bf16.msra.mxu1 %v3165_v55  ;;  %2234 = vmatprep.subr.bf16.mxu0 %v3051_v29 }
  0x94   : > { %2465 = vmatprep.subr.bf16.mxu1 %v2717_v42  ;;  %1079 = vmatmul.mubr.bf16.gmra.mrb[20].mxu1 %v2638_v6 }
  0x95   : > { %2471 = vmatprep.mubr.msk.bf16.mxu1 %vm2718_vm0, %v2717_v42 }
  0x96   : > { %2235 = vmatpush3.bf16.msra.mxu0 %v3064_v31 }
  0x97   : > { %2466 = vmatpush3.bf16.msra.mxu1 %v3178_v59  ;;  %2236 = vmatprep.subr.bf16.mxu0 %v3076_v33 }
  0x98   : > { %2467 = vmatprep.subr.bf16.mxu1 %v2717_v42 }
  0x9a   : > { %2237 = vmatpush3.bf16.msra.mxu0 %v3088_v35 }
  0x9b   : > { %2468 = vmatpush3.bf16.msra.mxu1 %v3189_v60  ;;  %2238 = vmatprep.subr.bf16.mxu0 %v3100_v37 }
  0x9c   : > { %2469 = vmatprep.subr.bf16.mxu1 %v2717_v42 }
  0x9e   : > { %2239 = vmatpush3.bf16.msra.mxu0 %v3112_v39 }
  0x9f   : > { %2470 = vmatpush3.bf16.msra.mxu1 %v3198_v61  ;;  %2269 = vmatprep.subr.bf16.mxu0 %v2926_v8 }
  0xa0   : > { %2303 = vmatprep.subr.bf16.mxu1 %v2931_v9 }
  0xa1   : > { %1120 = vmatmul.mubr.bf16.vlgmr.msra.gmra.mrb[24].mxu0 %v2639_v7 }
  0xa2   : > { %2472 = vmatmul.mubr.bf16.vlgmr.msra.gmra.mrb[24].mxu1 %v2642_v40  ;;  %2270 = vmatpush3.bf16.msra.mxu0 %v2937_v10 }
  0xa3   : > { %2304 = vmatpush3.bf16.msra.mxu1 %v2943_v11  ;;  %2271 = vmatprep.subr.bf16.mxu0 %v2949_v12 }
  0xa4   : > { %2305 = vmatprep.subr.bf16.mxu1 %v2955_v13  ;;  %1127 = vmatprep.mubr.bf16.mxu0 %v2643_v41 }
  0xa5   : > { %2475 = vmatprep.mubr.msk.bf16.mxu1 %vm2718_vm0, %v2717_v42 }
  0xa6   : > { %2272 = vmatpush3.bf16.msra.mxu0 %v2961_v14 }
  0xa7   : > { %2306 = vmatpush3.bf16.msra.mxu1 %v2967_v15  ;;  %2273 = vmatprep.subr.bf16.mxu0 %v2973_v16 }
  0xa8   : > { %2307 = vmatprep.subr.bf16.mxu1 %v2979_v17 }
  0xa9   : > { %1128 = vmatmul.mubr.bf16.gmra.mrb[28].mxu0 %v2645_v43 }
  0xaa   : > { %2274 = vmatpush3.bf16.msra.mxu0 %v2985_v18  ;;  %2476 = vmatmul.mubr.bf16.gmra.mrb[28].mxu1 %v2646_v44 }
  0xab   : > { %2308 = vmatpush3.bf16.msra.mxu1 %v2991_v19  ;;  %2275 = vmatprep.subr.bf16.mxu0 %v2997_v20 }
  0xac   : > { %2309 = vmatprep.subr.bf16.mxu1 %v3003_v21  ;;  %1135 = vmatprep.mubr.bf16.mxu0 %v2647_v47 }
  0xad   : > { %2479 = vmatprep.mubr.msk.bf16.mxu1 %vm2718_vm0, %v2717_v42 }
  0xae   : > { %2276 = vmatpush3.bf16.msra.mxu0 %v3009_v22 }
  0xaf   : > { %2310 = vmatpush3.bf16.msra.mxu1 %v3015_v23  ;;  %2277 = vmatprep.subr.bf16.mxu0 %v3021_v24 }
  0xb0   : > { %2311 = vmatprep.subr.bf16.mxu1 %v3027_v25 }
  0xb1   : > { %1136 = vmatmul.mubr.bf16.gmra.mrb[32].mxu0 %v2649_v48 }
  0xb2   : > { %2278 = vmatpush3.bf16.msra.mxu0 %v3033_v26  ;;  %2480 = vmatmul.mubr.bf16.gmra.mrb[32].mxu1 %v2650_v50 }
  0xb3   : > { %2312 = vmatpush3.bf16.msra.mxu1 %v3039_v27  ;;  %2279 = vmatprep.subr.bf16.mxu0 %v3045_v28 }
  0xb4   : > { %2313 = vmatprep.subr.bf16.mxu1 %v3051_v29  ;;  %1336 = vmatprep.mubr.bf16.mxu0 %v2653_v51 }
  0xb5   : > { %1393 = vmatprep.mubr.bf16.mxu1 %v2656_v52 }
  0xb6   : > { %2280 = vmatpush3.bf16.msra.mxu0 %v3057_v30 }
  0xb7   : > { %2314 = vmatpush3.bf16.msra.mxu1 %v3064_v31  ;;  %2281 = vmatprep.subr.bf16.mxu0 %v3070_v32 }
  0xb8   : > { %2315 = vmatprep.subr.bf16.mxu1 %v3076_v33 }
  0xba   : > { %2282 = vmatpush3.bf16.msra.mxu0 %v3082_v34 }
  0xbb   : > { %2316 = vmatpush3.bf16.msra.mxu1 %v3088_v35  ;;  %2283 = vmatprep.subr.bf16.mxu0 %v3094_v36 }
  0xbc   : > { %2317 = vmatprep.subr.bf16.mxu1 %v3100_v37 }
  0xbe   : > { %2284 = vmatpush3.bf16.msra.mxu0 %v3106_v38 }
  0xbf   : > { %2318 = vmatpush3.bf16.msra.mxu1 %v3112_v39  ;;  %2483 = vmatprep.subr.bf16.mxu0 %v2717_v42 }
  0xc0   : > { %2348 = vmatprep.subr.bf16.mxu1 %v2926_v8  ;;  %v2662_v8 = vld [vmem:[%s3115_s29 + $0x120] ss:$20 sps:$4 sm:$0xff]  }
  0xc1   : > { %1337 = vmatmul.mubr.bf16.vlgmr.msra.gmra.mrb[36].mxu0 %v2651_v53 }
  0xc2   : > { %1394 = vmatmul.mubr.bf16.vlgmr.msra.gmra.mrb[36].mxu1 %v2654_v56  ;;  %2484 = vmatpush3.bf16.msra.mxu0 %v3127_v45 }
  0xc3   : > { %2349 = vmatpush3.bf16.msra.mxu1 %v2937_v10  ;;  %2485 = vmatprep.subr.bf16.mxu0 %v2717_v42  ;;  %v2665_v10 = vld [vmem:[%s3115_s29 + $0x14c] ss:$20 sps:$4 sm:$0xff]  }
  0xc4   : > { %2350 = vmatprep.subr.bf16.mxu1 %v2949_v12  ;;  %1344 = vmatprep.mubr.bf16.mxu0 %v2657_v57  ;;  %v2667_v12 = vld [vmem:[%s3115_s29 + $0x140] ss:$20 sps:$4 sm:$0xff]  }
  0xc5   : > { %1401 = vmatprep.mubr.bf16.mxu1 %v2659_v58 }
  0xc6   : > { %2486 = vmatpush3.bf16.msra.mxu0 %v3133_v46 }
  0xc7   : > { %2351 = vmatpush3.bf16.msra.mxu1 %v2961_v14  ;;  %2487 = vmatprep.subr.bf16.mxu0 %v2717_v42  ;;  %v2668_v14 = vld [vmem:[%s3115_s29 + $0x148] ss:$20 sps:$4 sm:$0xff]  }
  0xc8   : > { %2352 = vmatprep.subr.bf16.mxu1 %v2973_v16  ;;  %v2672_v16 = vld [vmem:[%s3115_s29 + $0x16c] ss:$20 sps:$4 sm:$0xff]  }
  0xc9   : > { %1345 = vmatmul.mubr.bf16.gmra.mrb[40].mxu0 %v2661_v62 }
  0xca   : > { %2488 = vmatpush3.bf16.msra.mxu0 %v3143_v49  ;;  %1402 = vmatmul.mubr.bf16.gmra.mrb[40].mxu1 %v2662_v8 }
  0xcb   : > { %2353 = vmatpush3.bf16.msra.mxu1 %v2985_v18  ;;  %2489 = vmatprep.subr.bf16.mxu0 %v2717_v42  ;;  %v2669_v18 = vld [vmem:[%s3115_s29 + $0x100] ss:$20 sps:$4 sm:$0xff]  }
  0xcc   : > { %2354 = vmatprep.subr.bf16.mxu1 %v2997_v20  ;;  %1352 = vmatprep.mubr.bf16.mxu0 %v2663_v63  ;;  %v2670_v20 = vld [vmem:[%s3115_s29 + $0x168] ss:$20 sps:$4 sm:$0xff]  }
  0xcd   : > { %1409 = vmatprep.mubr.bf16.mxu1 %v2665_v10 }
  0xce   : > { %2490 = vmatpush3.bf16.msra.mxu0 %v3157_v54 }
  0xcf   : > { %2355 = vmatpush3.bf16.msra.mxu1 %v3009_v22  ;;  %2491 = vmatprep.subr.bf16.mxu0 %v2717_v42  ;;  %v2675_v22 = vld [vmem:[%s3115_s29 + $0x194] ss:$20 sps:$4 sm:$0xff]  }
  0xd0   : > { %2356 = vmatprep.subr.bf16.mxu1 %v3021_v24  ;;  %v2685_v24 = vld [vmem:[%s3115_s29 + $0x19c] ss:$20 sps:$4 sm:$0xff]  }
  0xd1   : > { %1353 = vmatmul.mubr.bf16.gmra.mrb[44].mxu0 %v2667_v12 }
  0xd2   : > { %2492 = vmatpush3.bf16.msra.mxu0 %v3165_v55  ;;  %1410 = vmatmul.mubr.bf16.gmra.mrb[44].mxu1 %v2668_v14 }
  0xd3   : > { %2357 = vmatpush3.bf16.msra.mxu1 %v3033_v26  ;;  %2493 = vmatprep.subr.bf16.mxu0 %v2717_v42  ;;  %v2688_v26 = vld [vmem:[%s3115_s29 + $0x1a0] ss:$20 sps:$4 sm:$0xff]  }
  0xd4   : > { %2358 = vmatprep.subr.bf16.mxu1 %v3045_v28  ;;  %2499 = vmatprep.mubr.msk.bf16.mxu0 %vm2718_vm0, %v2717_v42  ;;  %v2691_v28 = vld [vmem:[%s3115_s29 + $0x1c0] ss:$20 sps:$4 sm:$0xff]  }
  0xd5   : > { %1610 = vmatprep.mubr.bf16.mxu1 %v2672_v16 }
  0xd6   : > { %2494 = vmatpush3.bf16.msra.mxu0 %v3178_v59 }
  0xd7   : > { %2359 = vmatpush3.bf16.msra.mxu1 %v3057_v30  ;;  %2495 = vmatprep.subr.bf16.mxu0 %v2717_v42 }
  0xd8   : > { %2360 = vmatprep.subr.bf16.mxu1 %v3070_v32 }
  0xda   : > { %2496 = vmatpush3.bf16.msra.mxu0 %v3189_v60 }
  0xdb   : > { %2361 = vmatpush3.bf16.msra.mxu1 %v3082_v34  ;;  %2497 = vmatprep.subr.bf16.mxu0 %v2717_v42 }
  0xdc   : > { %2362 = vmatprep.subr.bf16.mxu1 %v3094_v36 }
  0xde   : > { %2498 = vmatpush3.bf16.msra.mxu0 %v3198_v61 }
  0xdf   : > { %2363 = vmatpush3.bf16.msra.mxu1 %v3106_v38  ;;  %2382 = vmatprep.subr.bf16.mxu0 %v2931_v9  ;;  %v2673_v9 = vld [vmem:[%s3115_s29 + $0x128] ss:$20 sps:$4 sm:$0xff]  }
  0xe0   : > { %2511 = vmatprep.subr.bf16.mxu1 %v2717_v42 }
  0xe1   : > { %2500 = vmatmul.mubr.bf16.vlgmr.msra.gmra.mrb[48].mxu0 %v2669_v18 }
  0xe2   : > { %2383 = vmatpush3.bf16.msra.mxu0 %v2943_v11  ;;  %1611 = vmatmul.mubr.bf16.vlgmr.msra.gmra.mrb[48].mxu1 %v2670_v20  ;;  %v2677_v11 = vld [vmem:[%s3115_s29 + $0x190] ss:$20 sps:$4 sm:$0xff]  }
  0xe3   : > { %2512 = vmatpush3.bf16.msra.mxu1 %v3127_v45  ;;  %2384 = vmatprep.subr.bf16.mxu0 %v2955_v13  ;;  %v2678_v13 = vld [vmem:[%s3115_s29 + $0x1bc] ss:$20 sps:$4 sm:$0xff]  }
  0xe4   : > { %2513 = vmatprep.subr.bf16.mxu1 %v2717_v42  ;;  %2503 = vmatprep.mubr.msk.bf16.mxu0 %vm2718_vm0, %v2717_v42 }
  0xe5   : > { %1618 = vmatprep.mubr.bf16.mxu1 %v2675_v22 }
  0xe6   : > { %2385 = vmatpush3.bf16.msra.mxu0 %v2967_v15  ;;  %v2674_v15 = vld [vmem:[%s3115_s29 + $0x150] ss:$20 sps:$4 sm:$0xff]  }
  0xe7   : > { %2514 = vmatpush3.bf16.msra.mxu1 %v3133_v46  ;;  %2386 = vmatprep.subr.bf16.mxu0 %v2979_v17  ;;  %v2683_v17 = vld [vmem:[%s3115_s29 + $0x174] ss:$20 sps:$4 sm:$0xff]  }
  0xe8   : > { %2515 = vmatprep.subr.bf16.mxu1 %v2717_v42 }
  0xe9   : > { %2504 = vmatmul.mubr.bf16.gmra.mrb[52].mxu0 %v2673_v9 }
  0xea   : > { %2387 = vmatpush3.bf16.msra.mxu0 %v2991_v19  ;;  %2507 = vmatprep.mubr.msk.bf16.mxu0 %vm2718_vm0, %v2717_v42  ;;  %v2680_v19 = vld [vmem:[%s3115_s29 + $0x1b8] ss:$20 sps:$4 sm:$0xff]  }
  0xeb   : > { %2516 = vmatpush3.bf16.msra.mxu1 %v3143_v49  ;;  %2388 = vmatprep.subr.bf16.mxu0 %v3003_v21  ;;  %v2681_v21 = vld [vmem:[%s3115_s29 + $0x170] ss:$20 sps:$4 sm:$0xff]  }
  0xec   : > { %2517 = vmatprep.subr.bf16.mxu1 %v2717_v42  ;;  %1619 = vmatmul.mubr.bf16.gmra.mrb[52].mxu1 %v2677_v11 }
  0xed   : > { %1626 = vmatprep.mubr.bf16.mxu1 %v2678_v13 }
  0xee   : > { %2389 = vmatpush3.bf16.msra.mxu0 %v3015_v23  ;;  %v2684_v23 = vld [vmem:[%s3115_s29 + $0x178] ss:$20 sps:$4 sm:$0xff]  }
  0xef   : > { %2518 = vmatpush3.bf16.msra.mxu1 %v3157_v54  ;;  %2390 = vmatprep.subr.bf16.mxu0 %v3027_v25  ;;  %v2687_v25 = vld [vmem:[%s3115_s29 + $0x198] ss:$20 sps:$4 sm:$0xff]  }
  0xf0   : > { %2519 = vmatprep.subr.bf16.mxu1 %v2717_v42 }
  0xf1   : > { %2508 = vmatmul.mubr.bf16.gmra.mrb[56].mxu0 %v2674_v15 }
  0xf2   : > { %2391 = vmatpush3.bf16.msra.mxu0 %v3039_v27  ;;  %1667 = vmatprep.mubr.bf16.mxu0 %v2683_v17  ;;  %v2689_v27 = vld [vmem:[%s3115_s29 + $0x1c4] ss:$20 sps:$4 sm:$0xff]  }
  0xf3   : > { %2520 = vmatpush3.bf16.msra.mxu1 %v3165_v55  ;;  %2392 = vmatprep.subr.bf16.mxu0 %v3051_v29  ;;  %v2692_v29 = vld [vmem:[%s3115_s29 + $0x1c8] ss:$20 sps:$4 sm:$0xff]  }
  0xf4   : > { %2521 = vmatprep.subr.bf16.mxu1 %v2717_v42  ;;  %1627 = vmatmul.mubr.bf16.gmra.mrb[56].mxu1 %v2680_v19 }
  0xf5   : > { %2527 = vmatprep.mubr.msk.bf16.mxu1 %vm2718_vm0, %v2717_v42 }
  0xf6   : > { %2393 = vmatpush3.bf16.msra.mxu0 %v3064_v31 }
  0xf7   : > { %2522 = vmatpush3.bf16.msra.mxu1 %v3178_v59  ;;  %2394 = vmatprep.subr.bf16.mxu0 %v3076_v33 }
  0xf8   : > { %2523 = vmatprep.subr.bf16.mxu1 %v2717_v42 }
  0xfa   : > { %2395 = vmatpush3.bf16.msra.mxu0 %v3088_v35 }
  0xfb   : > { %2524 = vmatpush3.bf16.msra.mxu1 %v3189_v60  ;;  %2396 = vmatprep.subr.bf16.mxu0 %v3100_v37 }
  0xfc   : > { %2525 = vmatprep.subr.bf16.mxu1 %v2717_v42 }
  0xfe   : > { %2397 = vmatpush3.bf16.msra.mxu0 %v3112_v39 }
  0xff   : > { %2526 = vmatpush3.bf16.msra.mxu1 %v3198_v61 }
 0x101   : > { %1668 = vmatmul.mubr.bf16.vlgmr.msra.gmra.mrb[60].mxu0 %v2681_v21 }
 0x102   : > { %2528 = vmatmul.mubr.bf16.vlgmr.msra.gmra.mrb[60].mxu1 %v2684_v23  ;;  %1675 = vmatprep.mubr.bf16.mxu0 %v2685_v24 }
 0x103   : > { %2531 = vmatprep.mubr.msk.bf16.mxu1 %vm2718_vm0, %v2717_v42 }
 0x109   : > { %1676 = vmatmul.mubr.bf16.gmra.mrb[64].mxu0 %v2687_v25 }
 0x10a   : > { %2532 = vmatmul.mubr.bf16.gmra.mrb[64].mxu1 %v2688_v26  ;;  %1683 = vmatprep.mubr.bf16.mxu0 %v2689_v27 }
 0x10b   : > { %2535 = vmatprep.mubr.msk.bf16.mxu1 %vm2718_vm0, %v2717_v42 }
 0x111   : > { %1684 = vmatmul.mubr.bf16.gmra.mrb[68].mxu0 %v2691_v28 }
 0x112   : > { %2536 = vmatmul.mubr.bf16.gmra.mrb[68].mxu1 %v2692_v29 }
 0x134   : > { %v2127_v30 = vpop.f32.mrb[0].mxu0 }
 0x135   : > { %v2161_v31 = vpop.f32.mrb[0].mxu1  ;;  %v2128_v32 = vpop.f32.mrb[1].mxu0 }
 0x136   : > { %v2129_v33 = vadd.f32 %v2128_v32, %v2127_v30  ;;  %v2162_v34 = vpop.f32.mrb[1].mxu1  ;;  %v2130_v35 = vpop.f32.mrb[2].mxu0 }
 0x137   : > { %v2163_v36 = vadd.f32 %v2162_v34, %v2161_v31  ;;  %v2164_v37 = vpop.f32.mrb[2].mxu1  ;;  %v2131_v38 = vpop.f32.mrb[3].mxu0 }
 0x138   : > { %v2132_v39 = vadd.f32 %v2131_v38, %v2130_v35  ;;  %v2165_v45 = vpop.f32.mrb[3].mxu1 }
 0x139   : > { %v2166_v46 = vadd.f32 %v2165_v45, %v2164_v37  ;;  %v854_v49 = vadd.f32 %v2163_v36, %v2129_v33 }
 0x13b   : > { %v857_v54 = vadd.f32 %v2166_v46, %v2132_v39 }
 0x13c   : > { %v2133_v55 = vpop.f32.mrb[4].mxu0 }
 0x13d   : > { %v2167_v42 = vpop.f32.mrb[4].mxu1  ;;  %v2134_v59 = vpop.f32.mrb[5].mxu0 }
 0x13e   : > { %v2135_v60 = vadd.f32 %v2134_v59, %v2133_v55  ;;  %v2168_v61 = vpop.f32.mrb[5].mxu1  ;;  %v2136_v0 = vpop.f32.mrb[6].mxu0 }
 0x13f   : > { %v2169_v1 = vadd.f32 %v2168_v61, %v2167_v42  ;;  %v2170_v2 = vpop.f32.mrb[6].mxu1  ;;  %v2137_v3 = vpop.f32.mrb[7].mxu0 }
 0x140   : > { %v2138_v4 = vadd.f32 %v2137_v3, %v2136_v0  ;;  %v2171_v5 = vpop.f32.mrb[7].mxu1 }
 0x141   : > { %v2172_v6 = vadd.f32 %v2171_v5, %v2170_v2  ;;  %v862_v7 = vadd.f32 %v2169_v1, %v2135_v60 }
 0x143   : > { %v865_v40 = vadd.f32 %v2172_v6, %v2138_v4 }
 0x144   : > { %v2139_v41 = vpop.f32.mrb[8].mxu0 }
 0x145   : > { %v2173_v43 = vpop.f32.mrb[8].mxu1  ;;  %v2140_v44 = vpop.f32.mrb[9].mxu0 }
 0x146   : > { %v2141_v47 = vadd.f32 %v2140_v44, %v2139_v41  ;;  %v2174_v48 = vpop.f32.mrb[9].mxu1  ;;  %v2142_v50 = vpop.f32.mrb[10].mxu0 }
 0x147   : > { %v2175_v51 = vadd.f32 %v2174_v48, %v2173_v43  ;;  %v2176_v52 = vpop.f32.mrb[10].mxu1  ;;  %v2143_v53 = vpop.f32.mrb[11].mxu0 }
 0x148   : > { %v2144_v56 = vadd.f32 %v2143_v53, %v2142_v50  ;;  %v2177_v57 = vpop.f32.mrb[11].mxu1 }
 0x149   : > { %v2178_v58 = vadd.f32 %v2177_v57, %v2176_v52  ;;  %v870_v62 = vadd.f32 %v2175_v51, %v2141_v47 }
 0x14b   : > { %v873_v8 = vadd.f32 %v2178_v58, %v2144_v56 }
 0x154   : > { %v910_v63 = vpop.f32.mrb[12].mxu0 }
 0x155   : > { %v3402_v10 = vadd.f32 %v910_v63, %v854_v49  ;;  %v2445_v12 = vpop.f32.mrb[13].mxu0  ;;  %v2206_v14 = vpop.f32.mrb[12].mxu1 }
 0x156   : > { %v913_v16 = vpop.f32.mrb[14].mxu0  ;;  %v2207_v18 = vpop.f32.mrb[13].mxu1 }
 0x157   : > { %v3404_v20 = vadd.f32 %v913_v16, %v857_v54  ;;  %v2446_v22 = vpop.f32.mrb[15].mxu0  ;;  %v2208_v9 = vadd.f32 %v2207_v18, %v2206_v14  ;;  %v2209_v11 = vpop.f32.mrb[14].mxu1 }
 0x158   : > { %v2210_v13 = vpop.f32.mrb[15].mxu1 }
 0x159   : > { %v2211_v15 = vadd.f32 %v2210_v13, %v2209_v11 }
 0x15c   : > { %v918_v17 = vpop.f32.mrb[16].mxu0 }
 0x15d   : > { %v3406_v19 = vadd.f32 %v918_v17, %v862_v7  ;;  %v2449_v21 = vpop.f32.mrb[17].mxu0 }
 0x15e   : > { %v921_v23 = vpop.f32.mrb[18].mxu0 }
 0x15f   : > { %v3408_v24 = vadd.f32 %v921_v23, %v865_v40  ;;  %v2450_v25 = vpop.f32.mrb[19].mxu0  ;;  %v2212_v26 = vpop.f32.mrb[16].mxu1 }
 0x160   : > { %v2213_v27 = vpop.f32.mrb[17].mxu1 }
 0x161   : > { %v2214_v28 = vadd.f32 %v2213_v27, %v2212_v26  ;;  %v2215_v29 = vpop.f32.mrb[18].mxu1 }
 0x162   : > { %v2216_v30 = vpop.f32.mrb[19].mxu1 }
 0x163   : > { %v2217_v31 = vadd.f32 %v2216_v30, %v2215_v29 }
 0x164   : > { %v926_v32 = vpop.f32.mrb[20].mxu0 }
 0x165   : > { %v3410_v33 = vadd.f32 %v926_v32, %v870_v62  ;;  %v2453_v34 = vpop.f32.mrb[21].mxu0 }
 0x166   : > { %v929_v35 = vpop.f32.mrb[22].mxu0 }
 0x167   : > { %v3412_v36 = vadd.f32 %v929_v35, %v873_v8  ;;  %v2454_v37 = vpop.f32.mrb[23].mxu0  ;;  %v2218_v38 = vpop.f32.mrb[20].mxu1 }
 0x168   : > { %v2219_v39 = vpop.f32.mrb[21].mxu1 }
 0x169   : > { %v2220_v45 = vadd.f32 %v2219_v39, %v2218_v38  ;;  %v2221_v46 = vpop.f32.mrb[22].mxu1 }
 0x16a   : > { %v2222_v49 = vpop.f32.mrb[23].mxu1 }
 0x16b   : > { %v2223_v54 = vadd.f32 %v2222_v49, %v2221_v46 }
 0x174   : > { %v2240_v55 = vpop.f32.mrb[24].mxu0 }
 0x175   : > { %v2241_v42 = vpop.f32.mrb[25].mxu0  ;;  %v1178_v59 = vpop.f32.mrb[24].mxu1 }
 0x176   : > { %v2242_v60 = vadd.f32 %v2241_v42, %v2240_v55  ;;  %v2243_v61 = vpop.f32.mrb[26].mxu0  ;;  %v2473_v0 = vpop.f32.mrb[25].mxu1 }
 0x177   : > { %v2244_v1 = vpop.f32.mrb[27].mxu0  ;;  %v1181_v2 = vpop.f32.mrb[26].mxu1 }
 0x178   : > { %v2245_v3 = vadd.f32 %v2244_v1, %v2243_v61  ;;  %v1122_v4 = vadd.f32 %v2242_v60, %v2208_v9  ;;  %v2474_v5 = vpop.f32.mrb[27].mxu1 }
 0x17a   : > { %v3414_v6 = vadd.f32 %v1178_v59, %v1122_v4  ;;  %v1125_v7 = vadd.f32 %v2245_v3, %v2211_v15 }
 0x17c   : > { %v1201_v40 = vmax.f32 %v3402_v10, %v3414_v6  ;;  %v3418_v41 = vadd.f32 %v1181_v2, %v1125_v7  ;;  %v2246_v43 = vpop.f32.mrb[28].mxu0 }
 0x17d   : > { %v2247_v44 = vpop.f32.mrb[29].mxu0  ;;  %v1186_v47 = vpop.f32.mrb[28].mxu1 }
 0x17e   : > { %v1202_v48 = vmax.f32 %v3404_v20, %v3418_v41  ;;  %v2248_v50 = vadd.f32 %v2247_v44, %v2246_v43  ;;  %v2249_v51 = vpop.f32.mrb[30].mxu0  ;;  %v2477_v52 = vpop.f32.mrb[29].mxu1 }
 0x17f   : > { %v2250_v53 = vpop.f32.mrb[31].mxu0  ;;  %v1189_v56 = vpop.f32.mrb[30].mxu1 }
 0x180   : > { %v2251_v57 = vadd.f32 %v2250_v53, %v2249_v51  ;;  %v1130_v58 = vadd.f32 %v2248_v50, %v2214_v28  ;;  %v2478_v62 = vpop.f32.mrb[31].mxu1 }
 0x182   : > { %v3422_v8 = vadd.f32 %v1186_v47, %v1130_v58  ;;  %v1133_v63 = vadd.f32 %v2251_v57, %v2217_v31 }
 0x184   : > { %v1203_v12 = vmax.f32 %v3406_v19, %v3422_v8  ;;  %v3426_v14 = vadd.f32 %v1189_v56, %v1133_v63  ;;  %v2252_v16 = vpop.f32.mrb[32].mxu0 }
 0x185   : > { %v2253_v18 = vpop.f32.mrb[33].mxu0  ;;  %v1194_v22 = vpop.f32.mrb[32].mxu1 }
 0x186   : > { %v1204_v9 = vmax.f32 %v3408_v24, %v3426_v14  ;;  %v2254_v11 = vadd.f32 %v2253_v18, %v2252_v16  ;;  %v2255_v13 = vpop.f32.mrb[34].mxu0  ;;  %v2481_v15 = vpop.f32.mrb[33].mxu1 }
 0x187   : > { %v2256_v17 = vpop.f32.mrb[35].mxu0  ;;  %v1197_v21 = vpop.f32.mrb[34].mxu1 }
 0x188   : > { %v2257_v23 = vadd.f32 %v2256_v17, %v2255_v13  ;;  %v1138_v25 = vadd.f32 %v2254_v11, %v2220_v45  ;;  %v2482_v26 = vpop.f32.mrb[35].mxu1 }
 0x18a   : > { %v3430_v27 = vadd.f32 %v1194_v22, %v1138_v25  ;;  %v1141_v28 = vadd.f32 %v2257_v23, %v2223_v54 }
 0x18c   : > { %v1205_v29 = vmax.f32 %v3410_v33, %v3430_v27  ;;  %v3434_v30 = vadd.f32 %v1197_v21, %v1141_v28 }
 0x18e   : > { %v1206_v31 = vmax.f32 %v3412_v36, %v3434_v30 }
 0x194   : > { %v2285_v32 = vpop.f32.mrb[36].mxu0 }
 0x195   : > { %v2319_v34 = vpop.f32.mrb[36].mxu1  ;;  %v2286_v35 = vpop.f32.mrb[37].mxu0 }
 0x196   : > { %v2287_v37 = vadd.f32 %v2286_v35, %v2285_v32  ;;  %v2320_v38 = vpop.f32.mrb[37].mxu1  ;;  %v2288_v39 = vpop.f32.mrb[38].mxu0 }
 0x197   : > { %v2321_v46 = vadd.f32 %v2320_v38, %v2319_v34  ;;  %v2322_v45 = vpop.f32.mrb[38].mxu1  ;;  %v2289_v49 = vpop.f32.mrb[39].mxu0 }
 0x198   : > { %v2290_v55 = vadd.f32 %v2289_v49, %v2288_v39  ;;  %v2323_v42 = vpop.f32.mrb[39].mxu1 }
 0x199   : > { %v2324_v54 = vadd.f32 %v2323_v42, %v2322_v45  ;;  %v1396_v59 = vadd.f32 %v2321_v46, %v2287_v37 }
 0x19b   : > { %v1399_v60 = vadd.f32 %v2324_v54, %v2290_v55 }
 0x19c   : > { %v2291_v61 = vpop.f32.mrb[40].mxu0 }
 0x19d   : > { %v2325_v0 = vpop.f32.mrb[40].mxu1  ;;  %v2292_v1 = vpop.f32.mrb[41].mxu0 }
 0x19e   : > { %v2293_v2 = vadd.f32 %v2292_v1, %v2291_v61  ;;  %v2326_v3 = vpop.f32.mrb[41].mxu1  ;;  %v2294_v4 = vpop.f32.mrb[42].mxu0 }
 0x19f   : > { %v2327_v5 = vadd.f32 %v2326_v3, %v2325_v0  ;;  %v2328_v7 = vpop.f32.mrb[42].mxu1  ;;  %v2295_v43 = vpop.f32.mrb[43].mxu0 }
 0x1a0   : > { %v2296_v44 = vadd.f32 %v2295_v43, %v2294_v4  ;;  %v2329_v47 = vpop.f32.mrb[43].mxu1 }
 0x1a1   : > { %v2330_v50 = vadd.f32 %v2329_v47, %v2328_v7  ;;  %v1404_v51 = vadd.f32 %v2327_v5, %v2293_v2 }
 0x1a3   : > { %v1407_v52 = vadd.f32 %v2330_v50, %v2296_v44 }
 0x1a4   : > { %v2297_v53 = vpop.f32.mrb[44].mxu0 }
 0x1a5   : > { %v2331_v56 = vpop.f32.mrb[44].mxu1  ;;  %v2298_v57 = vpop.f32.mrb[45].mxu0 }
 0x1a6   : > { %v2299_v58 = vadd.f32 %v2298_v57, %v2297_v53  ;;  %v2332_v62 = vpop.f32.mrb[45].mxu1  ;;  %v2300_v63 = vpop.f32.mrb[46].mxu0 }
 0x1a7   : > { %v2333_v16 = vadd.f32 %v2332_v62, %v2331_v56  ;;  %v2334_v18 = vpop.f32.mrb[46].mxu1  ;;  %v2301_v22 = vpop.f32.mrb[47].mxu0 }
 0x1a8   : > { %v2302_v11 = vadd.f32 %v2301_v22, %v2300_v63  ;;  %v2335_v13 = vpop.f32.mrb[47].mxu1  ;;  %v2079_v63 = vld [vmem:[%s3493_s2] ss:$0 sm:$0xff] }
 0x1a9   : > { %v2336_v15 = vadd.f32 %v2335_v13, %v2334_v18  ;;  %v1412_v17 = vadd.f32 %v2333_v16, %v2299_v58 }
 0x1ab   : > { %v1415_v21 = vadd.f32 %v2336_v15, %v2302_v11 }
 0x1b4   : > { %v1452_v23 = vpop.f32.mrb[48].mxu0 }
 0x1b5   : > { %v1453_v25 = vadd.f32 %v1452_v23, %v1396_v59  ;;  %v2501_v26 = vpop.f32.mrb[49].mxu0  ;;  %v2364_v28 = vpop.f32.mrb[48].mxu1 }
 0x1b6   : > { %v1455_v32 = vpop.f32.mrb[50].mxu0  ;;  %v2365_v34 = vpop.f32.mrb[49].mxu1 }
 0x1b7   : > { %v1475_v35 = vmax.f32 %v1201_v40, %v1453_v25  ;;  %v1456_v37 = vadd.f32 %v1455_v32, %v1399_v60  ;;  %v2502_v38 = vpop.f32.mrb[51].mxu0  ;;  %v2366_v39 = vadd.f32 %v2365_v34, %v2364_v28  ;;  %v2367_v46 = vpop.f32.mrb[50].mxu1 }
 0x1b8   : > { %v2368_v45 = vpop.f32.mrb[51].mxu1 }
 0x1b9   : > { %v1476_v49 = vmax.f32 %v1202_v48, %v1456_v37  ;;  %v2369_v55 = vadd.f32 %v2368_v45, %v2367_v46 }
 0x1bc   : > { %v1460_v42 = vpop.f32.mrb[52].mxu0 }
 0x1bd   : > { %v1461_v54 = vadd.f32 %v1460_v42, %v1404_v51  ;;  %v2505_v59 = vpop.f32.mrb[53].mxu0 }
 0x1be   : > { %v1463_v61 = vpop.f32.mrb[54].mxu0 }
 0x1bf   : > { %v3447_v0 = vmax.f32 %v1203_v12, %v1461_v54  ;;  %v1464_v10 = vadd.f32 %v1463_v61, %v1407_v52  ;;  %v2506_v6 = vpop.f32.mrb[55].mxu0  ;;  %v2370_v40 = vpop.f32.mrb[52].mxu1 }
 0x1c0   : > { %v2371_v60 = vpop.f32.mrb[53].mxu1 }
 0x1c1   : > { %v3452_v1 = vmax.f32 %v1204_v9, %v1464_v10  ;;  %v2372_v20 = vadd.f32 %v2371_v60, %v2370_v40  ;;  %v2373_v41 = vpop.f32.mrb[54].mxu1 }
 0x1c2   : > { %v2374_v48 = vpop.f32.mrb[55].mxu1 }
 0x1c3   : > { %v2375_v2 = vadd.f32 %v2374_v48, %v2373_v41 }
 0x1c4   : > { %v1468_v3 = vpop.f32.mrb[56].mxu0 }
 0x1c5   : > { %v1469_v4 = vadd.f32 %v1468_v3, %v1412_v17  ;;  %v2509_v5 = vpop.f32.mrb[57].mxu0 }
 0x1c6   : > { %v1471_v19 = vpop.f32.mrb[58].mxu0 }
 0x1c7   : > { %v3457_v8 = vmax.f32 %v1205_v29, %v1469_v4  ;;  %v1472_v12 = vadd.f32 %v1471_v19, %v1415_v21  ;;  %v2510_v7 = vpop.f32.mrb[59].mxu0  ;;  %v2376_v43 = vpop.f32.mrb[56].mxu1 }
 0x1c8   : > { %v2377_v24 = vpop.f32.mrb[57].mxu1 }
 0x1c9   : > { %v3462_v14 = vmax.f32 %v1206_v31, %v1472_v12  ;;  %v2378_v9 = vadd.f32 %v2377_v24, %v2376_v43  ;;  %v2379_v44 = vpop.f32.mrb[58].mxu1 }
 0x1ca   : > { %v2380_v47 = vpop.f32.mrb[59].mxu1 }
 0x1cb   : > { %v2381_v50 = vadd.f32 %v2380_v47, %v2379_v44 }
 0x1d4   : > { %v2398_v51 = vpop.f32.mrb[60].mxu0 }
 0x1d5   : > { %v2399_v52 = vpop.f32.mrb[61].mxu0  ;;  %v1726_v33 = vpop.f32.mrb[60].mxu1 }
 0x1d6   : > { %v2400_v27 = vadd.f32 %v2399_v52, %v2398_v51  ;;  %v2401_v29 = vpop.f32.mrb[62].mxu0  ;;  %v2529_v53 = vpop.f32.mrb[61].mxu1 }
 0x1d7   : > { %v2402_v56 = vpop.f32.mrb[63].mxu0  ;;  %v1729_v57 = vpop.f32.mrb[62].mxu1 }
 0x1d8   : > { %v1670_v58 = vadd.f32 %v2400_v27, %v2366_v39  ;;  %v2403_v62 = vadd.f32 %v2402_v56, %v2401_v29  ;;  %v2530_v36 = vpop.f32.mrb[63].mxu1 }
 0x1da   : > { %v1727_v30 = vadd.f32 %v1726_v33, %v1670_v58  ;;  %v1673_v31 = vadd.f32 %v2403_v62, %v2369_v55 }
 0x1dc   : > { %v1749_v16 = vmax.f32 %v1475_v35, %v1727_v30  ;;  %v1730_v18 = vadd.f32 %v1729_v57, %v1673_v31  ;;  %v2404_v22 = vpop.f32.mrb[64].mxu0 }
 0x1dd   : > { %v2405_v11 = vpop.f32.mrb[65].mxu0  ;;  %v1734_v13 = vpop.f32.mrb[64].mxu1 }
 0x1de   : > { %v1762_v15 = vadd.f32 %v2079_v63, %v1749_v16  ;;  %v1750_v17 = vmax.f32 %v1476_v49, %v1730_v18  ;;  %v2406_v21 = vadd.f32 %v2405_v11, %v2404_v22  ;;  %v2407_v23 = vpop.f32.mrb[66].mxu0  ;;  %v2533_v25 = vpop.f32.mrb[65].mxu1 }
 0x1df   : > { %v2408_v26 = vpop.f32.mrb[67].mxu0  ;;  %v1737_v28 = vpop.f32.mrb[66].mxu1 }
 0x1e0   : > { %v1763_v32 = vadd.f32 %v2079_v63, %v1750_v17  ;;  %v1678_v34 = vadd.f32 %v2406_v21, %v2372_v20  ;;  %v2409_v37 = vadd.f32 %v2408_v26, %v2407_v23  ;;  %v2534_v38 = vpop.f32.mrb[67].mxu1  ;;  %v1768_v39 = vmax.f32 %v1762_v15, 0.0 }
 0x1e2   : > { %v1769_v46 = vmax.f32 %v1763_v32, 0.0  ;;  %v1735_v35 = vadd.f32 %v1734_v13, %v1678_v34  ;;  %v1681_v45 = vadd.f32 %v2409_v37, %v2375_v2 }
 0x1e4   : > { %v2097_v49 = vpack.c.bf16 %v1769_v46, %v1768_v39  ;;  %v1751_v55 = vmax.f32 %v3447_v0, %v1735_v35  ;;  %v1738_v42 = vadd.f32 %v1737_v28, %v1681_v45  ;;  %v2410_v54 = vpop.f32.mrb[68].mxu0 }
 0x1e5   : > { %v2411_v59 = vpop.f32.mrb[69].mxu0  ;;  %v1742_v61 = vpop.f32.mrb[68].mxu1 }
 0x1e6   : > { %2098 = vst [vmem:[%s3472_s28] sm:$0xff] %v2097_v49   ;;  %v1764_v10 = vadd.f32 %v2079_v63, %v1751_v55  ;;  %v1752_v6 = vmax.f32 %v3452_v1, %v1738_v42  ;;  %v2412_v40 = vadd.f32 %v2411_v59, %v2410_v54  ;;  %v2413_v60 = vpop.f32.mrb[70].mxu0  ;;  %v2537_v20 = vpop.f32.mrb[69].mxu1 }
 0x1e7   : > { %v2414_v41 = vpop.f32.mrb[71].mxu0  ;;  %v1745_v48 = vpop.f32.mrb[70].mxu1 }
 0x1e8   : > { %v1765_v2 = vadd.f32 %v2079_v63, %v1752_v6  ;;  %v1686_v3 = vadd.f32 %v2412_v40, %v2378_v9  ;;  %v2415_v4 = vadd.f32 %v2414_v41, %v2413_v60  ;;  %v2538_v5 = vpop.f32.mrb[71].mxu1  ;;  %v1770_v0 = vmax.f32 %v1764_v10, 0.0 }
 0x1ea   : > { %v1771_v19 = vmax.f32 %v1765_v2, 0.0  ;;  %v1743_v12 = vadd.f32 %v1742_v61, %v1686_v3  ;;  %v1689_v7 = vadd.f32 %v2415_v4, %v2381_v50 }
 0x1ec   : > { %v2102_v43 = vpack.c.bf16 %v1771_v19, %v1770_v0  ;;  %v1753_v24 = vmax.f32 %v3457_v8, %v1743_v12  ;;  %v1746_v44 = vadd.f32 %v1745_v48, %v1689_v7 }
 0x1ee   : > { %2109 = vst [vmem:[%s3472_s28 + $0x8] sm:$0xff] %v2102_v43   ;;  %v1766_v1 = vadd.f32 %v2079_v63, %v1753_v24  ;;  %v1754_v47 = vmax.f32 %v3462_v14, %v1746_v44 }
 0x1f0   : > { %v1767_v51 = vadd.f32 %v2079_v63, %v1754_v47  ;;  %v1772_v52 = vmax.f32 %v1766_v1, 0.0 }
 0x1f2   : > { %v1773_v33 = vmax.f32 %v1767_v51, 0.0 }
 0x1f4   : > { %v2107_v27 = vpack.c.bf16 %v1773_v33, %v1772_v52 }
 0x1f6   : > { %2110 = vst [vmem:[%s3472_s28 + $0x10] sm:$0xff] %v2107_v27  }
 0x1f7 PF: > { %p10_p9 = scmp.ge.s32.totalorder %s2756_s16, 4   ;;  %s3495_s12 = smov %s2711_s13 }
 0x1f8   : > { %s3496_s13 = smov %s2765_s19  ;;  %s3497_s14 = smov %s2756_s16 }
 0x1f9   :  { %12 = sbr.rel (!%p10_p9) target bundleno = 2 (0x2), region = 102 }

// kernel: cnn3_forward.7
= control target key start
LH: loop header
LB: loop body
LE: loop exit
PB: predicated region body
PF: predicated region fallthrough
CT: control target
= control target key end

     0   :  { %v265_v1 = vmov 0.0   ;;  %vm266_vm0 = vmmov 0   ;;  %s333_s0 = inlined_call_operand.vmem [shape: bf16[2,4,128], index: 0, kind: input, shape index: {}]   ;;  %s334_s1 = inlined_call_operand.vmem [shape: bf16[128,10], index: 1, kind: input, shape index: {}]   ;;  %s335_s2 = inlined_call_operand.vmem [shape: f32[1,10], index: 2, kind: input, shape index: {}]   ;;  %s336_s3 = inlined_call_operand.hbm [shape: f32[2,10], index: 3, kind: output, shape index: {}]  }
   0x1   :  { %v233_v0 = vld [vmem:[%s334_s1] sm:$0xff]   ;;  %210 = vmatprep.subr.bf16.mxu0 %v265_v1  ;;  %v234_v2 = vld [vmem:[%s334_s1 + $0x8] sm:$0xff]   ;;  %226 = vmatprep.mubr.msk.bf16.mxu0 %vm266_vm0, %v265_v1  ;;  %v235_v3 = vld [vmem:[%s334_s1 + $0x10] sm:$0xff]  }
   0x2   :  { %211 = vmatpush3.bf16.msra.mxu0 %v233_v0  ;;  %v16_v4 = vld [vmem:[%s333_s0] sm:$0x3]  ;;  %v17_v5 = vld [vmem:[%s333_s0 + $0x2] sm:$0x3] }
   0x3   :  { %212 = vmatprep.subr.bf16.mxu0 %v265_v1  ;;  %v18_v6 = vunpack.c.l.bf16 %v16_v4  ;;  %v19_v7 = vunpack.c.l.bf16 %v17_v5 }
   0x6   :  { %213 = vmatpush3.bf16.msra.mxu0 %v234_v2 }
   0x7   :  { %214 = vmatprep.subr.bf16.mxu0 %v265_v1 }
   0x8   :  { %8 = vsyncpa [#allocation3], 0  ;;  %v236_v8 = vld [vmem:[%s334_s1 + $0x18] sm:$0xff]   ;;  %v186_v9 = vrot.slane %v18_v6, 9  ;;  %v187_v10 = vrot.slane %v19_v7, 9  ;;  %v188_v11 = vrot.slane %v18_v6, 10 }
   0x9   :  { %v189_v12 = vrot.slane %v19_v7, 10  ;;  %v190_v15 = vrot.slane %v18_v6, 11  ;;  %v191_v16 = vrot.slane %v19_v7, 11  ;;  %v237_v17 = vld [vmem:[%s334_s1 + $0x20] sm:$0xff]   ;;  %v238_v22 = vld [vmem:[%s334_s1 + $0x28] sm:$0xff]   ;;  %v239_v27 = vld [vmem:[%s334_s1 + $0x30] sm:$0xff]  }
   0xa   :  { %215 = vmatpush3.bf16.msra.mxu0 %v235_v3  ;;  %v28_v13 = vadd.f32 %v186_v9, %v18_v6  ;;  %v29_v14 = vadd.f32 %v187_v10, %v19_v7  ;;  %vm78_vm1 = vcmask 1041409   ;;  %v240_v31 = vld [vmem:[%s334_s1 + $0x38] sm:$0xff]   ;;  %v192_v34 = vld [vmem:[%s335_s2] ss:$0 sm:$0xff]  ;;  %s267_s6 = smov [#allocation2]   ;;  %vm170_vm2 = vcmask 74752  }
   0xb   :  { %216 = vmatprep.subr.bf16.mxu0 %v265_v1  ;;  %s178_s7 = sshll.u32 %s267_s6, 4  ;;  %s179_s7 = int_to_ptr.vmem [resolvable:$true] %s178_s7 }
   0xc   :  { %v36_v18 = vadd.f32 %v188_v11, %v28_v13  ;;  %v37_v19 = vadd.f32 %v189_v12, %v29_v14  ;;  %s241_s1 = scalar_lea.vmem %s179_s7, 32  ;;  %p246_p1 = scmp.lt.s32.totalorder %s179_s7, %s179_s7 }
   0xd   :  { %p242_p0 = scmp.ne.s32.totalorder %s179_s7, %s241_s1  ;;  %p247_p2 = scmp.lt.s32.totalorder %s241_s1, %s241_s1 }
   0xe   :  { %217 = vmatpush3.bf16.msra.mxu0 %v236_v8  ;;  %v44_v20 = vadd.f32 %v190_v15, %v36_v18  ;;  %v45_v21 = vadd.f32 %v191_v16, %v37_v19 }
   0xf   :  { %218 = vmatprep.subr.bf16.mxu0 %v265_v1  ;;  %p248_p3 = por %p247_p2, %p246_p1 }
  0x10   :  { %v46_v23 = vmul.f32 0.25, %v44_v20  ;;  %v47_v24 = vmul.f32 0.25, %v45_v21 }
  0x11   :  { %p249_p4 = pnand %p248_p3, %p242_p0 }
  0x12   :  { %219 = vmatpush3.bf16.msra.mxu0 %v237_v17  ;;  %v48_v25 = vpack.c.bf16 %v46_v23, %v46_v23  ;;  %v49_v26 = vpack.c.bf16 %v47_v24, %v47_v24 }
  0x13   :  { %220 = vmatprep.subr.bf16.mxu0 %v265_v1 }
  0x14   :  { %v75_v28 = vunpack.c.l.b16 %v48_v25  ;;  %v76_v29 = vunpack.c.l.b16 %v49_v26 }
  0x16   :  { %221 = vmatpush3.bf16.msra.mxu0 %v238_v22  ;;  %v77_v30 = vrot.slane %v76_v29, 7 }
  0x17   :  { %222 = vmatprep.subr.bf16.mxu0 %v265_v1 }
  0x18   :  { %v79_v32 = vsel %vm78_vm1, %v77_v30, %v75_v28 }
  0x19   :  { %v80_v33 = vpack.c.b16 %v79_v32, %v79_v32 }
  0x1a   :  { %223 = vmatpush3.bf16.msra.mxu0 %v239_v27 }
  0x1b   :  { %224 = vmatprep.subr.bf16.mxu0 %v265_v1 }
  0x1e   :  { %225 = vmatpush3.bf16.msra.mxu0 %v240_v31 }
  0x21   :  { %227 = vmatmul.mubr.bf16.vlgmr.msra.gmra.mrb[0].mxu0 %v80_v33 }
  0xf4   :  { %v164_v35 = vpop.f32.mrb[0].mxu0 }
  0xf5   :  { %v165_v36 = vadd.f32 %v192_v34, %v164_v35  ;;  %v228_v37 = vpop.f32.mrb[1].mxu0 }
  0xf6   :  { %v167_v38 = vpop.f32.mrb[2].mxu0 }
  0xf7   :  { %v229_v39 = vpop.f32.mrb[3].mxu0  ;;  %171 = vst.msk [vmem:[#allocation2] sm:$0x3] %vm170_vm2, %v165_v36 }
  0xf8   :  { %252 = shalt.err (!%p249_p4)
}
  0xf9   :  { %s253_s2 = scalar_lea.hbm %s336_s3, 32 }
  0xfa   :  { %p254_p5 = scmp.ne.s32.totalorder %s336_s3, %s253_s2  ;;  %p257_p6 = scmp.lt.u32.totalorder %s253_s2, %s336_s3 }
  0xfc   :  { %p259_p7 = pnand %p257_p6, %p254_p5 }
  0xfe   :  { %262 = shalt.err (!%p259_p7)
}
  0xff   :  { %181 = dma.vmem_to_hbm [thread:$0]  %s179_s7, 32, %s336_s3, [#allocation3]  }
 0x100   :  { %263 = dma.done.wait [#allocation3], 32  }
 0x101   :  { %264 = vsyncadd [#allocation3], 4294967264 }
 0x102   :  { %185 = vsyncpa [#allocation3], 1 }

// kernel: cnn3_forward.6
= control target key start
LH: loop header
LB: loop body
LE: loop exit
PB: predicated region body
PF: predicated region fallthrough
CT: control target
= control target key end

     0   :  { %vm2433_vm0 = vmmov 0   ;;  %s3310_s1 = inlined_call_operand.vmem [shape: bf16[1152,128], index: 1, kind: input, shape index: {}]   ;;  %s3311_s0 = inlined_call_operand.vmem [shape: bf16[4,16,1152], index: 0, kind: input, shape index: {}]   ;;  %s3312_s2 = inlined_call_operand.vmem [shape: f32[1,128], index: 2, kind: input, shape index: {}]   ;;  %s3313_s3 = inlined_call_operand.vmem [shape: bf16[16,128], index: 3, kind: output, shape index: {}]  }
   0x1   :  { %v2457_v0 = vld [vmem:[%s3310_s1 + $0x40] sm:$0xff]   ;;  %v2480_v4 = vld [vmem:[%s3310_s1 + $0x48] sm:$0xff]   ;;  %v2504_v8 = vld [vmem:[%s3310_s1 + $0x50] sm:$0xff]  }
   0x2   :  { %v2462_v1 = vld [vmem:[%s3310_s1 + $0xc0] sm:$0xff]   ;;  %1817 = vmatprep.subr.bf16.mxu0 %v2457_v0  ;;  %v2486_v5 = vld [vmem:[%s3310_s1 + $0xc8] sm:$0xff]   ;;  %3353 = vst [vmem:[#allocation2_spill] sm:$0xff] %v2504_v8  ;;  %v2510_v9 = vld [vmem:[%s3310_s1 + $0xd0] sm:$0xff]  }
   0x3   :  { %v2468_v2 = vld [vmem:[%s3310_s1] sm:$0xff]   ;;  %1839 = vmatprep.subr.bf16.mxu1 %v2462_v1  ;;  %v2492_v6 = vld [vmem:[%s3310_s1 + $0x8] sm:$0xff]   ;;  %v2516_v10 = vld [vmem:[%s3310_s1 + $0x10] sm:$0xff]  }
   0x4   :  { %v2474_v3 = vld [vmem:[%s3310_s1 + $0x80] sm:$0xff]   ;;  %1818 = vmatpush3.bf16.msra.mxu0 %v2468_v2  ;;  %v2498_v7 = vld [vmem:[%s3310_s1 + $0x88] sm:$0xff]   ;;  %3354 = vst [vmem:[#allocation3_spill] sm:$0xff] %v2516_v10  ;;  %v2522_v11 = vld [vmem:[%s3310_s1 + $0x90] sm:$0xff]  }
   0x5   :  { %1840 = vmatpush3.bf16.msra.mxu1 %v2474_v3  ;;  %1819 = vmatprep.subr.bf16.mxu0 %v2480_v4  ;;  %v2528_v12 = vld [vmem:[%s3310_s1 + $0x58] sm:$0xff]   ;;  %v2552_v16 = vld [vmem:[%s3310_s1 + $0x60] sm:$0xff]   ;;  %v2576_v20 = vld [vmem:[%s3310_s1 + $0x68] sm:$0xff]  }
   0x6   :  { %1841 = vmatprep.subr.bf16.mxu1 %v2486_v5  ;;  %v2534_v13 = vld [vmem:[%s3310_s1 + $0xd8] sm:$0xff]   ;;  %v2558_v17 = vld [vmem:[%s3310_s1 + $0xe0] sm:$0xff]   ;;  %v2582_v21 = vld [vmem:[%s3310_s1 + $0xe8] sm:$0xff]  }
   0x7   :  { %v2540_v14 = vld [vmem:[%s3310_s1 + $0x18] sm:$0xff]   ;;  %v2564_v18 = vld [vmem:[%s3310_s1 + $0x20] sm:$0xff]   ;;  %v2588_v22 = vld [vmem:[%s3310_s1 + $0x28] sm:$0xff]  }
   0x8   :  { %1820 = vmatpush3.bf16.msra.mxu0 %v2492_v6  ;;  %v2546_v15 = vld [vmem:[%s3310_s1 + $0x98] sm:$0xff]   ;;  %3355 = vst [vmem:[#allocation4_spill] sm:$0xff] %v2564_v18  ;;  %v2570_v19 = vld [vmem:[%s3310_s1 + $0xa0] sm:$0xff]   ;;  %3356 = vst [vmem:[#allocation5_spill] sm:$0xff] %v2588_v22 }
   0x9   :  { %1842 = vmatpush3.bf16.msra.mxu1 %v2498_v7  ;;  %1821 = vmatprep.subr.bf16.mxu0 %v2504_v8  ;;  %v2594_v23 = vld [vmem:[%s3310_s1 + $0xa8] sm:$0xff]   ;;  %v2600_v24 = vld [vmem:[%s3310_s1 + $0x70] sm:$0xff]   ;;  %v2624_v28 = vld [vmem:[%s3310_s1 + $0x78] sm:$0xff]  }
   0xa   :  { %1843 = vmatprep.subr.bf16.mxu1 %v2510_v9  ;;  %3357 = vst [vmem:[#allocation6_spill] sm:$0xff] %v2600_v24  ;;  %v2606_v25 = vld [vmem:[%s3310_s1 + $0xf0] sm:$0xff]   ;;  %3358 = vst [vmem:[#allocation7_spill] sm:$0xff] %v2624_v28  ;;  %v2630_v29 = vld [vmem:[%s3310_s1 + $0xf8] sm:$0xff]  }
   0xb   :  { %v2612_v26 = vld [vmem:[%s3310_s1 + $0x30] sm:$0xff]   ;;  %v2636_v30 = vld [vmem:[%s3310_s1 + $0x38] sm:$0xff]   ;;  %v2319_v32 = vld [vmem:[%s3311_s0] ss:$36 sps:$4 sm:$0xff]  }
   0xc   :  { %1822 = vmatpush3.bf16.msra.mxu0 %v2516_v10  ;;  %v2618_v27 = vld [vmem:[%s3310_s1 + $0xb0] sm:$0xff]   ;;  %v2642_v31 = vld [vmem:[%s3310_s1 + $0xb8] sm:$0xff]   ;;  %v2321_v33 = vld [vmem:[%s3311_s0 + $0x4] ss:$36 sps:$4 sm:$0xff]  }
   0xd   :  { %1844 = vmatpush3.bf16.msra.mxu1 %v2522_v11  ;;  %1823 = vmatprep.subr.bf16.mxu0 %v2528_v12  ;;  %v2322_v34 = vld [vmem:[%s3311_s0 + $0x8] ss:$36 sps:$4 sm:$0xff]   ;;  %v2661_v36 = vld [vmem:[%s3310_s1 + $0x140] sm:$0xff]   ;;  %v2708_v44 = vld [vmem:[%s3310_s1 + $0x150] sm:$0xff]  }
   0xe   :  { %1845 = vmatprep.subr.bf16.mxu1 %v2534_v13  ;;  %v2324_v35 = vld [vmem:[%s3311_s0 + $0xc] ss:$36 sps:$4 sm:$0xff]   ;;  %679 = vmatprep.mubr.bf16.mxu0 %v2321_v33  ;;  %v2666_v37 = vld [vmem:[%s3310_s1 + $0x1c0] sm:$0xff]   ;;  %v2732_v48 = vld [vmem:[%s3310_s1 + $0x158] sm:$0xff]  }
   0xf   :  { %720 = vmatprep.mubr.bf16.mxu1 %v2324_v35  ;;  %v2672_v38 = vld [vmem:[%s3310_s1 + $0x100] sm:$0xff]   ;;  %v2684_v40 = vld [vmem:[%s3310_s1 + $0x148] sm:$0xff]   ;;  %v2714_v45 = vld [vmem:[%s3310_s1 + $0x1d0] sm:$0xff]  }
  0x10   :  { %1824 = vmatpush3.bf16.msra.mxu0 %v2540_v14  ;;  %v2678_v39 = vld [vmem:[%s3310_s1 + $0x180] sm:$0xff]   ;;  %v2690_v41 = vld [vmem:[%s3310_s1 + $0x1c8] sm:$0xff]   ;;  %v2720_v46 = vld [vmem:[%s3310_s1 + $0x110] sm:$0xff]  }
  0x11   :  { %1846 = vmatpush3.bf16.msra.mxu1 %v2546_v15  ;;  %1825 = vmatprep.subr.bf16.mxu0 %v2552_v16  ;;  %v2696_v42 = vld [vmem:[%s3310_s1 + $0x108] sm:$0xff]   ;;  %v2726_v47 = vld [vmem:[%s3310_s1 + $0x190] sm:$0xff]   ;;  %v2738_v49 = vld [vmem:[%s3310_s1 + $0x1d8] sm:$0xff]  }
  0x12   :  { %1847 = vmatprep.subr.bf16.mxu1 %v2558_v17  ;;  %v2702_v43 = vld [vmem:[%s3310_s1 + $0x188] sm:$0xff]   ;;  %v2744_v50 = vld [vmem:[%s3310_s1 + $0x118] sm:$0xff]   ;;  %v2756_v52 = vld [vmem:[%s3310_s1 + $0x160] sm:$0xff]  }
  0x13   :  { %v2750_v51 = vld [vmem:[%s3310_s1 + $0x198] sm:$0xff]   ;;  %v2762_v53 = vld [vmem:[%s3310_s1 + $0x1e0] sm:$0xff]   ;;  %v2780_v56 = vld [vmem:[%s3310_s1 + $0x168] sm:$0xff]  }
  0x14   :  { %1826 = vmatpush3.bf16.msra.mxu0 %v2564_v18  ;;  %v2768_v54 = vld [vmem:[%s3310_s1 + $0x120] sm:$0xff]   ;;  %v2786_v57 = vld [vmem:[%s3310_s1 + $0x1e8] sm:$0xff]   ;;  %v2804_v60 = vld [vmem:[%s3310_s1 + $0x170] sm:$0xff]  }
  0x15   :  { %1848 = vmatpush3.bf16.msra.mxu1 %v2570_v19  ;;  %1827 = vmatprep.subr.bf16.mxu0 %v2576_v20  ;;  %v2774_v55 = vld [vmem:[%s3310_s1 + $0x1a0] sm:$0xff]   ;;  %3360 = vst [vmem:[#allocation9_spill] sm:$0xff] %v2786_v57  ;;  %v2792_v58 = vld [vmem:[%s3310_s1 + $0x128] sm:$0xff]   ;;  %v2810_v61 = vld [vmem:[%s3310_s1 + $0x1f0] sm:$0xff]  }
  0x16   :  { %1849 = vmatprep.subr.bf16.mxu1 %v2582_v21  ;;  %3359 = vst [vmem:[#allocation8_spill] sm:$0xff] %v2774_v55  ;;  %v2798_v59 = vld [vmem:[%s3310_s1 + $0x1a8] sm:$0xff]   ;;  %3362 = vst [vmem:[#allocation11_spill] sm:$0xff] %v2810_v61  ;;  %v2816_v62 = vld [vmem:[%s3310_s1 + $0x130] sm:$0xff]  }
  0x17   :  { %3361 = vst [vmem:[#allocation10_spill] sm:$0xff] %v2798_v59  ;;  %v2822_v63 = vld [vmem:[%s3310_s1 + $0x1b0] sm:$0xff]   ;;  %v2834_v33 = vld [vmem:[%s3310_s1 + $0x1f8] sm:$0xff]  }
  0x18   :  { %1828 = vmatpush3.bf16.msra.mxu0 %v2588_v22  ;;  %3363 = vst [vmem:[#allocation12_spill] sm:$0xff] %v2822_v63  ;;  %3364 = vst [vmem:[#allocation13_spill] sm:$0xff] %v2834_v33  ;;  %v2846_v35 = vld [vmem:[%s3310_s1 + $0x1b8] sm:$0xff]  }
  0x19   :  { %1850 = vmatpush3.bf16.msra.mxu1 %v2594_v23  ;;  %1829 = vmatprep.subr.bf16.mxu0 %v2600_v24 }
  0x1a   :  { %1851 = vmatprep.subr.bf16.mxu1 %v2606_v25 }
  0x1c   :  { %1830 = vmatpush3.bf16.msra.mxu0 %v2612_v26 }
  0x1d   :  { %1852 = vmatpush3.bf16.msra.mxu1 %v2618_v27  ;;  %1831 = vmatprep.subr.bf16.mxu0 %v2624_v28 }
  0x1e   :  { %1853 = vmatprep.subr.bf16.mxu1 %v2630_v29 }
  0x20   :  { %1832 = vmatpush3.bf16.msra.mxu0 %v2636_v30 }
  0x21   :  { %1854 = vmatpush3.bf16.msra.mxu1 %v2642_v31  ;;  %1861 = vmatprep.subr.bf16.mxu0 %v2661_v36 }
  0x22   :  { %1883 = vmatprep.subr.bf16.mxu1 %v2666_v37 }
  0x23   :  { %680 = vmatmul.mubr.bf16.vlgmr.msra.gmra.mrb[0].mxu0 %v2319_v32  ;;  %v2828_v32 = vld [vmem:[%s3310_s1 + $0x178] sm:$0xff]  }
  0x24   :  { %721 = vmatmul.mubr.bf16.vlgmr.msra.gmra.mrb[0].mxu1 %v2322_v34  ;;  %1862 = vmatpush3.bf16.msra.mxu0 %v2672_v38  ;;  %v2840_v34 = vld [vmem:[%s3310_s1 + $0x138] sm:$0xff]  }
  0x25   :  { %1884 = vmatpush3.bf16.msra.mxu1 %v2678_v39  ;;  %1863 = vmatprep.subr.bf16.mxu0 %v2684_v40 }
  0x26   :  { %1885 = vmatprep.subr.bf16.mxu1 %v2690_v41 }
  0x28   :  { %1864 = vmatpush3.bf16.msra.mxu0 %v2696_v42 }
  0x29   :  { %1886 = vmatpush3.bf16.msra.mxu1 %v2702_v43  ;;  %1865 = vmatprep.subr.bf16.mxu0 %v2708_v44 }
  0x2a   :  { %1887 = vmatprep.subr.bf16.mxu1 %v2714_v45 }
  0x2c   :  { %1866 = vmatpush3.bf16.msra.mxu0 %v2720_v46 }
  0x2d   :  { %1888 = vmatpush3.bf16.msra.mxu1 %v2726_v47  ;;  %1867 = vmatprep.subr.bf16.mxu0 %v2732_v48 }
  0x2e   :  { %1889 = vmatprep.subr.bf16.mxu1 %v2738_v49 }
  0x30   :  { %1868 = vmatpush3.bf16.msra.mxu0 %v2744_v50 }
  0x31   :  { %1890 = vmatpush3.bf16.msra.mxu1 %v2750_v51  ;;  %1869 = vmatprep.subr.bf16.mxu0 %v2756_v52 }
  0x32   :  { %1891 = vmatprep.subr.bf16.mxu1 %v2762_v53 }
  0x34   :  { %1870 = vmatpush3.bf16.msra.mxu0 %v2768_v54 }
  0x35   :  { %1892 = vmatpush3.bf16.msra.mxu1 %v2774_v55  ;;  %1871 = vmatprep.subr.bf16.mxu0 %v2780_v56  ;;  %v2867_v55 = vld [vmem:[%s3310_s1 + $0x200] sm:$0xff]  }
  0x36   :  { %1893 = vmatprep.subr.bf16.mxu1 %v2786_v57  ;;  %v2362_v57 = vld [vmem:[%s3311_s0 + $0x1c] ss:$36 sps:$4 sm:$0xff]   ;;  %3365 = vst [vmem:[#allocation14_spill] sm:$0xff] %v2867_v55 }
  0x37   :  { %802 = vmatprep.mubr.bf16.mxu1 %v2362_v57  ;;  %v2884_v57 = vld [vmem:[%s3310_s1 + $0x210] sm:$0xff]  }
  0x38   :  { %1872 = vmatpush3.bf16.msra.mxu0 %v2792_v58  ;;  %3367 = vst [vmem:[#allocation16_spill] sm:$0xff] %v2884_v57 }
  0x39   :  { %1894 = vmatpush3.bf16.msra.mxu1 %v2798_v59  ;;  %1873 = vmatprep.subr.bf16.mxu0 %v2804_v60  ;;  %v3335_v59 = vmov 0.0  }
  0x3a   :  { %1895 = vmatprep.subr.bf16.mxu1 %v2810_v61  ;;  %v2359_v61 = vld [vmem:[%s3311_s0 + $0x14] ss:$36 sps:$4 sm:$0xff]  }
  0x3b   :  { %761 = vmatprep.mubr.bf16.mxu0 %v2359_v61  ;;  %v2875_v61 = vld [vmem:[%s3310_s1 + $0x208] sm:$0xff]  }
  0x3c   :  { %1874 = vmatpush3.bf16.msra.mxu0 %v2816_v62  ;;  %3366 = vst [vmem:[#allocation15_spill] sm:$0xff] %v2875_v61 }
  0x3d   :  { %1896 = vmatpush3.bf16.msra.mxu1 %v2822_v63  ;;  %1875 = vmatprep.subr.bf16.mxu0 %v2828_v32  ;;  %v2357_v63 = vld [vmem:[%s3311_s0 + $0x10] ss:$36 sps:$4 sm:$0xff]  }
  0x3e   :  { %1897 = vmatprep.subr.bf16.mxu1 %v2834_v33  ;;  %v2360_v33 = vld [vmem:[%s3311_s0 + $0x18] ss:$36 sps:$4 sm:$0xff]  }
  0x40   :  { %1876 = vmatpush3.bf16.msra.mxu0 %v2840_v34 }
  0x41   :  { %1898 = vmatpush3.bf16.msra.mxu1 %v2846_v35  ;;  %2205 = vmatprep.subr.bf16.mxu0 %v3335_v59 }
  0x42   :  { %1914 = vmatprep.subr.bf16.mxu1 %v2457_v0 }
  0x43   :  { %762 = vmatmul.mubr.bf16.vlgmr.msra.gmra.mrb[4].mxu0 %v2357_v63  ;;  %v2374_v63 = vld [vmem:[%s3311_s0 + $0x4c] ss:$36 sps:$4 sm:$0xff]  }
  0x44   :  { %2221 = vmatprep.mubr.msk.bf16.mxu0 %vm2433_vm0, %v3335_v59  ;;  %803 = vmatmul.mubr.bf16.vlgmr.msra.gmra.mrb[4].mxu1 %v2360_v33  ;;  %v2896_v33 = vld [vmem:[%s3310_s1 + $0x218] sm:$0xff]  }
  0x45   :  { %2206 = vmatpush3.bf16.msra.mxu0 %v2867_v55  ;;  %1915 = vmatpush3.bf16.msra.mxu1 %v2468_v2  ;;  %3368 = vst [vmem:[#allocation17_spill] sm:$0xff] %v2896_v33 }
  0x46   :  { %2207 = vmatprep.subr.bf16.mxu0 %v3335_v59  ;;  %1916 = vmatprep.subr.bf16.mxu1 %v2480_v4 }
  0x47   :  { %941 = vmatprep.mubr.bf16.mxu1 %v2374_v63  ;;  %v2923_v63 = vld [vmem:[%s3310_s1 + $0x230] sm:$0xff]  }
  0x48   :  { %3371 = vst [vmem:[#allocation20_spill] sm:$0xff] %v2923_v63 }
  0x49   :  { %2208 = vmatpush3.bf16.msra.mxu0 %v2875_v61  ;;  %1917 = vmatpush3.bf16.msra.mxu1 %v2492_v6 }
  0x4a   :  { %2209 = vmatprep.subr.bf16.mxu0 %v3335_v59  ;;  %1918 = vmatprep.subr.bf16.mxu1 %v2504_v8  ;;  %v2905_v8 = vld [vmem:[%s3310_s1 + $0x220] sm:$0xff]  }
  0x4b   :  { %3369 = vst [vmem:[#allocation18_spill] sm:$0xff] %v2905_v8 }
  0x4d   :  { %2210 = vmatpush3.bf16.msra.mxu0 %v2884_v57  ;;  %1919 = vmatpush3.bf16.msra.mxu1 %v2516_v10  ;;  %v2913_v10 = vld [vmem:[%s3310_s1 + $0x228] sm:$0xff]  }
  0x4e   :  { %2211 = vmatprep.subr.bf16.mxu0 %v3335_v59  ;;  %1920 = vmatprep.subr.bf16.mxu1 %v2528_v12  ;;  %3370 = vst [vmem:[#allocation19_spill] sm:$0xff] %v2913_v10 }
  0x51   :  { %2212 = vmatpush3.bf16.msra.mxu0 %v2896_v33  ;;  %1921 = vmatpush3.bf16.msra.mxu1 %v2540_v14 }
  0x52   :  { %2213 = vmatprep.subr.bf16.mxu0 %v3335_v59  ;;  %1922 = vmatprep.subr.bf16.mxu1 %v2552_v16 }
  0x55   :  { %2214 = vmatpush3.bf16.msra.mxu0 %v2905_v8  ;;  %1923 = vmatpush3.bf16.msra.mxu1 %v2564_v18  ;;  %v2932_v18 = vld [vmem:[%s3310_s1 + $0x238] sm:$0xff]  }
  0x56   :  { %2215 = vmatprep.subr.bf16.mxu0 %v3335_v59  ;;  %1924 = vmatprep.subr.bf16.mxu1 %v2576_v20 }
  0x59   :  { %2216 = vmatpush3.bf16.msra.mxu0 %v2913_v10  ;;  %1925 = vmatpush3.bf16.msra.mxu1 %v2588_v22  ;;  %v2371_v22 = vld [vmem:[%s3311_s0 + $0x20] ss:$36 sps:$4 sm:$0xff]  }
  0x5a   :  { %2217 = vmatprep.subr.bf16.mxu0 %v3335_v59  ;;  %1926 = vmatprep.subr.bf16.mxu1 %v2600_v24  ;;  %v2372_v24 = vld [vmem:[%s3311_s0 + $0x48] ss:$36 sps:$4 sm:$0xff]  }
  0x5d   :  { %2218 = vmatpush3.bf16.msra.mxu0 %v2923_v63  ;;  %1927 = vmatpush3.bf16.msra.mxu1 %v2612_v26 }
  0x5e   :  { %2219 = vmatprep.subr.bf16.mxu0 %v3335_v59  ;;  %1928 = vmatprep.subr.bf16.mxu1 %v2624_v28  ;;  %v2377_v59 = vld [vmem:[%s3311_s0 + $0x54] ss:$36 sps:$4 sm:$0xff]   ;;  %v2380_v28 = vld [vmem:[%s3311_s0 + $0x5c] ss:$36 sps:$4 sm:$0xff]  }
  0x61   :  { %2220 = vmatpush3.bf16.msra.mxu0 %v2932_v18  ;;  %1929 = vmatpush3.bf16.msra.mxu1 %v2636_v30 }
  0x62   :  { %1936 = vmatprep.subr.bf16.mxu0 %v2462_v1  ;;  %1958 = vmatprep.subr.bf16.mxu1 %v2661_v36 }
  0x64   :  { %2222 = vmatmul.mubr.bf16.vlgmr.msra.gmra.mrb[8].mxu0 %v2371_v22  ;;  %942 = vmatmul.mubr.bf16.vlgmr.msra.gmra.mrb[8].mxu1 %v2372_v24  ;;  %v2375_v22 = vld [vmem:[%s3311_s0 + $0x50] ss:$36 sps:$4 sm:$0xff]   ;;  %v2378_v24 = vld [vmem:[%s3311_s0 + $0x58] ss:$36 sps:$4 sm:$0xff]  }
  0x65   :  { %1937 = vmatpush3.bf16.msra.mxu0 %v2474_v3  ;;  %1959 = vmatpush3.bf16.msra.mxu1 %v2672_v38 }
  0x66   :  { %1938 = vmatprep.subr.bf16.mxu0 %v2486_v5  ;;  %1960 = vmatprep.subr.bf16.mxu1 %v2684_v40 }
  0x67   :  { %982 = vmatprep.mubr.bf16.mxu0 %v2377_v59  ;;  %1023 = vmatprep.mubr.bf16.mxu1 %v2380_v28  ;;  %v3372_v28 = vmov 0.0   ;;  %v2383_v59 = vld [vmem:[%s3311_s0 + $0x64] ss:$36 sps:$4 sm:$0xff]  }
  0x69   :  { %1939 = vmatpush3.bf16.msra.mxu0 %v2498_v7  ;;  %1961 = vmatpush3.bf16.msra.mxu1 %v2696_v42 }
  0x6a   :  { %1940 = vmatprep.subr.bf16.mxu0 %v2510_v9  ;;  %1962 = vmatprep.subr.bf16.mxu1 %v2708_v44 }
  0x6d   :  { %1941 = vmatpush3.bf16.msra.mxu0 %v2522_v11  ;;  %1963 = vmatpush3.bf16.msra.mxu1 %v2720_v46 }
  0x6e   :  { %1942 = vmatprep.subr.bf16.mxu0 %v2534_v13  ;;  %1964 = vmatprep.subr.bf16.mxu1 %v2732_v48 }
  0x71   :  { %1943 = vmatpush3.bf16.msra.mxu0 %v2546_v15  ;;  %1965 = vmatpush3.bf16.msra.mxu1 %v2744_v50 }
  0x72   :  { %1944 = vmatprep.subr.bf16.mxu0 %v2558_v17  ;;  %1966 = vmatprep.subr.bf16.mxu1 %v2756_v52 }
  0x75   :  { %1945 = vmatpush3.bf16.msra.mxu0 %v2570_v19  ;;  %1967 = vmatpush3.bf16.msra.mxu1 %v2768_v54 }
  0x76   :  { %1946 = vmatprep.subr.bf16.mxu0 %v2582_v21  ;;  %1968 = vmatprep.subr.bf16.mxu1 %v2780_v56 }
  0x79   :  { %1947 = vmatpush3.bf16.msra.mxu0 %v2594_v23  ;;  %1969 = vmatpush3.bf16.msra.mxu1 %v2792_v58 }
  0x7a   :  { %1948 = vmatprep.subr.bf16.mxu0 %v2606_v25  ;;  %1970 = vmatprep.subr.bf16.mxu1 %v2804_v60 }
  0x7d   :  { %1949 = vmatpush3.bf16.msra.mxu0 %v2618_v27  ;;  %1971 = vmatpush3.bf16.msra.mxu1 %v2816_v62 }
  0x7e   :  { %1950 = vmatprep.subr.bf16.mxu0 %v2630_v29  ;;  %1972 = vmatprep.subr.bf16.mxu1 %v2828_v32 }
  0x81   :  { %1951 = vmatpush3.bf16.msra.mxu0 %v2642_v31  ;;  %1973 = vmatpush3.bf16.msra.mxu1 %v2840_v34 }
  0x82   :  { %1980 = vmatprep.subr.bf16.mxu0 %v2666_v37  ;;  %2225 = vmatprep.subr.bf16.mxu1 %v3372_v28 }
  0x84   :  { %983 = vmatmul.mubr.bf16.vlgmr.msra.gmra.mrb[12].mxu0 %v2375_v22  ;;  %1024 = vmatmul.mubr.bf16.vlgmr.msra.gmra.mrb[12].mxu1 %v2378_v24  ;;  %v3373_v22 = vld [vmem:[#allocation8_spill] sm:$0xff]  ;;  %v3374_v24 = vld [vmem:[#allocation9_spill] sm:$0xff] }
  0x85   :  { %1981 = vmatpush3.bf16.msra.mxu0 %v2678_v39  ;;  %2226 = vmatpush3.bf16.msra.mxu1 %v2867_v55  ;;  %v2390_v55 = vld [vmem:[%s3311_s0 + $0x9c] ss:$36 sps:$4 sm:$0xff]  }
  0x86   :  { %1982 = vmatprep.subr.bf16.mxu0 %v2690_v41  ;;  %2227 = vmatprep.subr.bf16.mxu1 %v3372_v28 }
  0x87   :  { %1064 = vmatprep.mubr.bf16.mxu0 %v2383_v59  ;;  %2241 = vmatprep.mubr.msk.bf16.mxu1 %vm2433_vm0, %v3372_v28  ;;  %v3375_v59 = vld [vmem:[#allocation10_spill] sm:$0xff] }
  0x89   :  { %1983 = vmatpush3.bf16.msra.mxu0 %v2702_v43  ;;  %2228 = vmatpush3.bf16.msra.mxu1 %v2875_v61  ;;  %v3378_v61 = vld [vmem:[#allocation13_spill] sm:$0xff] }
  0x8a   :  { %1984 = vmatprep.subr.bf16.mxu0 %v2714_v45  ;;  %2229 = vmatprep.subr.bf16.mxu1 %v3372_v28 }
  0x8d   :  { %1985 = vmatpush3.bf16.msra.mxu0 %v2726_v47  ;;  %2230 = vmatpush3.bf16.msra.mxu1 %v2884_v57  ;;  %v3376_v57 = vld [vmem:[#allocation11_spill] sm:$0xff] }
  0x8e   :  { %1986 = vmatprep.subr.bf16.mxu0 %v2738_v49  ;;  %2231 = vmatprep.subr.bf16.mxu1 %v3372_v28 }
  0x91   :  { %1987 = vmatpush3.bf16.msra.mxu0 %v2750_v51  ;;  %2232 = vmatpush3.bf16.msra.mxu1 %v2896_v33  ;;  %v3377_v33 = vld [vmem:[#allocation12_spill] sm:$0xff] }
  0x92   :  { %1988 = vmatprep.subr.bf16.mxu0 %v2762_v53  ;;  %2233 = vmatprep.subr.bf16.mxu1 %v3372_v28 }
  0x95   :  { %1989 = vmatpush3.bf16.msra.mxu0 %v3373_v22  ;;  %2234 = vmatpush3.bf16.msra.mxu1 %v2905_v8  ;;  %v2381_v8 = vld [vmem:[%s3311_s0 + $0x60] ss:$36 sps:$4 sm:$0xff]  }
  0x96   :  { %1990 = vmatprep.subr.bf16.mxu0 %v3374_v24  ;;  %2235 = vmatprep.subr.bf16.mxu1 %v3372_v28 }
  0x99   :  { %1991 = vmatpush3.bf16.msra.mxu0 %v3375_v59  ;;  %2236 = vmatpush3.bf16.msra.mxu1 %v2913_v10  ;;  %v2384_v10 = vld [vmem:[%s3311_s0 + $0x68] ss:$36 sps:$4 sm:$0xff]  }
  0x9a   :  { %1992 = vmatprep.subr.bf16.mxu0 %v3376_v57  ;;  %2237 = vmatprep.subr.bf16.mxu1 %v3372_v28 }
  0x9d   :  { %1993 = vmatpush3.bf16.msra.mxu0 %v3377_v33  ;;  %2238 = vmatpush3.bf16.msra.mxu1 %v2923_v63  ;;  %v2387_v63 = vld [vmem:[%s3311_s0 + $0x94] ss:$36 sps:$4 sm:$0xff]  }
  0x9e   :  { %1994 = vmatprep.subr.bf16.mxu0 %v3378_v61  ;;  %2239 = vmatprep.subr.bf16.mxu1 %v3372_v28 }
  0xa1   :  { %1995 = vmatpush3.bf16.msra.mxu0 %v2846_v35  ;;  %2240 = vmatpush3.bf16.msra.mxu1 %v2932_v18 }
  0xa2   :  { %2011 = vmatprep.subr.bf16.mxu0 %v2457_v0  ;;  %2033 = vmatprep.subr.bf16.mxu1 %v2462_v1  ;;  %v3379_v0 = vld [vmem:[#allocation2_spill] sm:$0xff]  ;;  %v3380_v1 = vld [vmem:[#allocation3_spill] sm:$0xff] }
  0xa4   :  { %1065 = vmatmul.mubr.bf16.vlgmr.msra.gmra.mrb[16].mxu0 %v2381_v8  ;;  %2242 = vmatmul.mubr.bf16.vlgmr.msra.gmra.mrb[16].mxu1 %v2384_v10  ;;  %v2393_v8 = vld [vmem:[%s3311_s0 + $0xa4] ss:$36 sps:$4 sm:$0xff]  }
  0xa5   :  { %2012 = vmatpush3.bf16.msra.mxu0 %v2468_v2  ;;  %2034 = vmatpush3.bf16.msra.mxu1 %v2474_v3  ;;  %v3381_v2 = vld [vmem:[#allocation4_spill] sm:$0xff]  ;;  %v3382_v3 = vld [vmem:[#allocation5_spill] sm:$0xff]  ;;  %v2391_v10 = vld [vmem:[%s3311_s0 + $0xa0] ss:$36 sps:$4 sm:$0xff]  }
  0xa6   :  { %2013 = vmatprep.subr.bf16.mxu0 %v2480_v4  ;;  %2035 = vmatprep.subr.bf16.mxu1 %v2486_v5  ;;  %v3383_v4 = vld [vmem:[#allocation6_spill] sm:$0xff]  ;;  %v3384_v5 = vld [vmem:[#allocation7_spill] sm:$0xff] }
  0xa7   :  { %1205 = vmatprep.mubr.bf16.mxu0 %v2387_v63  ;;  %1246 = vmatprep.mubr.bf16.mxu1 %v2390_v55  ;;  %v3389_v63 = vld [vmem:[#allocation18_spill] sm:$0xff] }
  0xa9   :  { %2014 = vmatpush3.bf16.msra.mxu0 %v2492_v6  ;;  %2036 = vmatpush3.bf16.msra.mxu1 %v2498_v7  ;;  %v2385_v6 = vld [vmem:[%s3311_s0 + $0x90] ss:$36 sps:$4 sm:$0xff]   ;;  %v2388_v7 = vld [vmem:[%s3311_s0 + $0x98] ss:$36 sps:$4 sm:$0xff]  }
  0xaa   :  { %2015 = vmatprep.subr.bf16.mxu0 %v3379_v0  ;;  %2037 = vmatprep.subr.bf16.mxu1 %v2510_v9  ;;  %v2396_v9 = vld [vmem:[%s3311_s0 + $0xac] ss:$36 sps:$4 sm:$0xff]  }
  0xad   :  { %2016 = vmatpush3.bf16.msra.mxu0 %v3380_v1  ;;  %2038 = vmatpush3.bf16.msra.mxu1 %v2522_v11  ;;  %v2394_v11 = vld [vmem:[%s3311_s0 + $0xa8] ss:$36 sps:$4 sm:$0xff]  }
  0xae   :  { %2017 = vmatprep.subr.bf16.mxu0 %v2528_v12  ;;  %2039 = vmatprep.subr.bf16.mxu1 %v2534_v13  ;;  %v2411_v13 = vld [vmem:[%s3310_s1 + $0x40] sm:$0xff]  }
  0xb1   :  { %2018 = vmatpush3.bf16.msra.mxu0 %v2540_v14  ;;  %2040 = vmatpush3.bf16.msra.mxu1 %v2546_v15  ;;  %v2400_v15 = vld [vmem:[%s3311_s0 + $0xdc] ss:$36 sps:$4 sm:$0xff]  }
  0xb2   :  { %2019 = vmatprep.subr.bf16.mxu0 %v2552_v16  ;;  %2041 = vmatprep.subr.bf16.mxu1 %v2558_v17  ;;  %v3385_v17 = vld [vmem:[#allocation14_spill] sm:$0xff] }
  0xb5   :  { %2020 = vmatpush3.bf16.msra.mxu0 %v3381_v2  ;;  %2042 = vmatpush3.bf16.msra.mxu1 %v2570_v19  ;;  %v2412_v19 = vld [vmem:[%s3310_s1] sm:$0xff]  }
  0xb6   :  { %2021 = vmatprep.subr.bf16.mxu0 %v2576_v20  ;;  %2043 = vmatprep.subr.bf16.mxu1 %v2582_v21  ;;  %v2413_v21 = vld [vmem:[%s3310_s1 + $0x48] sm:$0xff]  }
  0xb9   :  { %2022 = vmatpush3.bf16.msra.mxu0 %v3382_v3  ;;  %2044 = vmatpush3.bf16.msra.mxu1 %v2594_v23  ;;  %v3386_v23 = vld [vmem:[#allocation15_spill] sm:$0xff] }
  0xba   :  { %2023 = vmatprep.subr.bf16.mxu0 %v3383_v4  ;;  %2045 = vmatprep.subr.bf16.mxu1 %v2606_v25  ;;  %v2414_v25 = vld [vmem:[%s3310_s1 + $0x8] sm:$0xff]  }
  0xbd   :  { %2024 = vmatpush3.bf16.msra.mxu0 %v2612_v26  ;;  %2046 = vmatpush3.bf16.msra.mxu1 %v2618_v27  ;;  %v2415_v27 = vld [vmem:[%s3310_s1 + $0x50] sm:$0xff]  }
  0xbe   :  { %2025 = vmatprep.subr.bf16.mxu0 %v3384_v5  ;;  %2047 = vmatprep.subr.bf16.mxu1 %v2630_v29  ;;  %v3387_v29 = vld [vmem:[#allocation16_spill] sm:$0xff] }
  0xc1   :  { %2026 = vmatpush3.bf16.msra.mxu0 %v2636_v30  ;;  %2048 = vmatpush3.bf16.msra.mxu1 %v2642_v31  ;;  %v3388_v31 = vld [vmem:[#allocation17_spill] sm:$0xff] }
  0xc2   :  { %2055 = vmatprep.subr.bf16.mxu0 %v2661_v36  ;;  %2077 = vmatprep.subr.bf16.mxu1 %v2666_v37 }
  0xc4   :  { %1206 = vmatmul.mubr.bf16.vlgmr.msra.gmra.mrb[20].mxu0 %v2385_v6  ;;  %1247 = vmatmul.mubr.bf16.vlgmr.msra.gmra.mrb[20].mxu1 %v2388_v7 }
  0xc5   :  { %2056 = vmatpush3.bf16.msra.mxu0 %v2672_v38  ;;  %2078 = vmatpush3.bf16.msra.mxu1 %v2678_v39 }
  0xc6   :  { %2057 = vmatprep.subr.bf16.mxu0 %v2684_v40  ;;  %2079 = vmatprep.subr.bf16.mxu1 %v2690_v41 }
  0xc7   :  { %1287 = vmatprep.mubr.bf16.mxu0 %v2393_v8  ;;  %1328 = vmatprep.mubr.bf16.mxu1 %v2396_v9 }
  0xc9   :  { %2058 = vmatpush3.bf16.msra.mxu0 %v2696_v42  ;;  %2080 = vmatpush3.bf16.msra.mxu1 %v2702_v43 }
  0xca   :  { %2059 = vmatprep.subr.bf16.mxu0 %v2708_v44  ;;  %2081 = vmatprep.subr.bf16.mxu1 %v2714_v45 }
  0xcd   :  { %2060 = vmatpush3.bf16.msra.mxu0 %v2720_v46  ;;  %2082 = vmatpush3.bf16.msra.mxu1 %v2726_v47 }
  0xce   :  { %2061 = vmatprep.subr.bf16.mxu0 %v2732_v48  ;;  %2083 = vmatprep.subr.bf16.mxu1 %v2738_v49 }
  0xd1   :  { %2062 = vmatpush3.bf16.msra.mxu0 %v2744_v50  ;;  %2084 = vmatpush3.bf16.msra.mxu1 %v2750_v51 }
  0xd2   :  { %2063 = vmatprep.subr.bf16.mxu0 %v2756_v52  ;;  %2085 = vmatprep.subr.bf16.mxu1 %v2762_v53 }
  0xd5   :  { %2064 = vmatpush3.bf16.msra.mxu0 %v2768_v54  ;;  %2086 = vmatpush3.bf16.msra.mxu1 %v3373_v22 }
  0xd6   :  { %2065 = vmatprep.subr.bf16.mxu0 %v2780_v56  ;;  %2087 = vmatprep.subr.bf16.mxu1 %v3374_v24 }
  0xd9   :  { %2066 = vmatpush3.bf16.msra.mxu0 %v2792_v58  ;;  %2088 = vmatpush3.bf16.msra.mxu1 %v3375_v59 }
  0xda   :  { %2067 = vmatprep.subr.bf16.mxu0 %v2804_v60  ;;  %2089 = vmatprep.subr.bf16.mxu1 %v3376_v57 }
  0xdd   :  { %2068 = vmatpush3.bf16.msra.mxu0 %v2816_v62  ;;  %2090 = vmatpush3.bf16.msra.mxu1 %v3377_v33 }
  0xde   :  { %2069 = vmatprep.subr.bf16.mxu0 %v2828_v32  ;;  %2091 = vmatprep.subr.bf16.mxu1 %v3378_v61 }
  0xe1   :  { %2070 = vmatpush3.bf16.msra.mxu0 %v2840_v34  ;;  %2092 = vmatpush3.bf16.msra.mxu1 %v2846_v35 }
  0xe2   :  { %2245 = vmatprep.subr.bf16.mxu0 %v3372_v28  ;;  %2108 = vmatprep.subr.bf16.mxu1 %v2411_v13  ;;  %v3390_v13 = vld [vmem:[#allocation19_spill] sm:$0xff] }
  0xe4   :  { %1288 = vmatmul.mubr.bf16.vlgmr.msra.gmra.mrb[24].mxu0 %v2391_v10  ;;  %1329 = vmatmul.mubr.bf16.vlgmr.msra.gmra.mrb[24].mxu1 %v2394_v11 }
  0xe5   :  { %2246 = vmatpush3.bf16.msra.mxu0 %v3385_v17  ;;  %2109 = vmatpush3.bf16.msra.mxu1 %v2412_v19  ;;  %v3391_v19 = vld [vmem:[#allocation20_spill] sm:$0xff] }
  0xe6   :  { %2247 = vmatprep.subr.bf16.mxu0 %v3372_v28  ;;  %2110 = vmatprep.subr.bf16.mxu1 %v2413_v21  ;;  %v2419_v21 = vld [vmem:[%s3310_s1 + $0x88] sm:$0xff]  }
  0xe7   :  { %2261 = vmatprep.mubr.msk.bf16.mxu0 %vm2433_vm0, %v3372_v28  ;;  %1469 = vmatprep.mubr.bf16.mxu1 %v2400_v15 }
  0xe9   :  { %2248 = vmatpush3.bf16.msra.mxu0 %v3386_v23  ;;  %2111 = vmatpush3.bf16.msra.mxu1 %v2414_v25  ;;  %v2422_v25 = vld [vmem:[%s3310_s1 + $0xd8] sm:$0xff]  }
  0xea   :  { %2249 = vmatprep.subr.bf16.mxu0 %v3372_v28  ;;  %2112 = vmatprep.subr.bf16.mxu1 %v2415_v27  ;;  %v2426_v27 = vld [vmem:[%s3310_s1 + $0xe8] sm:$0xff]  }
  0xed   :  { %2250 = vmatpush3.bf16.msra.mxu0 %v3387_v29  ;;  %2113 = vmatpush3.bf16.msra.mxu1 %v3380_v1 }
  0xee   :  { %2251 = vmatprep.subr.bf16.mxu0 %v3372_v28  ;;  %2114 = vmatprep.subr.bf16.mxu1 %v2528_v12 }
  0xf1   :  { %2252 = vmatpush3.bf16.msra.mxu0 %v3388_v31  ;;  %2115 = vmatpush3.bf16.msra.mxu1 %v2540_v14 }
  0xf2   :  { %2253 = vmatprep.subr.bf16.mxu0 %v3372_v28  ;;  %2116 = vmatprep.subr.bf16.mxu1 %v2552_v16 }
  0xf5   :  { %2254 = vmatpush3.bf16.msra.mxu0 %v3389_v63  ;;  %2117 = vmatpush3.bf16.msra.mxu1 %v3381_v2 }
  0xf6   :  { %v1833_v55 = vpop.f32.mrb[0].mxu0  ;;  %2255 = vmatprep.subr.bf16.mxu0 %v3372_v28  ;;  %2118 = vmatprep.subr.bf16.mxu1 %v2576_v20  ;;  %v2397_v20 = vld [vmem:[%s3311_s0 + $0xb0] ss:$36 sps:$4 sm:$0xff]  }
  0xf7   :  { %v1855_v0 = vpop.f32.mrb[0].mxu1  ;;  %v1834_v6 = vpop.f32.mrb[1].mxu0 }
  0xf8   :  { %v1835_v1 = vadd.f32 %v1834_v6, %v1833_v55  ;;  %v1856_v7 = vpop.f32.mrb[1].mxu1  ;;  %v1836_v12 = vpop.f32.mrb[2].mxu0 }
  0xf9   :  { %v1857_v8 = vadd.f32 %v1856_v7, %v1855_v0  ;;  %v1858_v9 = vpop.f32.mrb[2].mxu1  ;;  %v1837_v10 = vpop.f32.mrb[3].mxu0  ;;  %2256 = vmatpush3.bf16.msra.mxu0 %v3390_v13  ;;  %2119 = vmatpush3.bf16.msra.mxu1 %v3382_v3  ;;  %v2398_v3 = vld [vmem:[%s3311_s0 + $0xd8] ss:$36 sps:$4 sm:$0xff]  }
  0xfa   :  { %v1838_v14 = vadd.f32 %v1837_v10, %v1836_v12  ;;  %v1859_v11 = vpop.f32.mrb[3].mxu1  ;;  %2257 = vmatprep.subr.bf16.mxu0 %v3372_v28  ;;  %2120 = vmatprep.subr.bf16.mxu1 %v3383_v4  ;;  %v2403_v4 = vld [vmem:[%s3311_s0 + $0xe4] ss:$36 sps:$4 sm:$0xff]  }
  0xfb   :  { %v3157_v16 = vadd.f32 %v1857_v8, %v1835_v1  ;;  %v1860_v15 = vadd.f32 %v1859_v11, %v1858_v9 }
  0xfd   :  { %v3162_v2 = vadd.f32 %v1860_v15, %v1838_v14  ;;  %2258 = vmatpush3.bf16.msra.mxu0 %v3391_v19  ;;  %2121 = vmatpush3.bf16.msra.mxu1 %v2612_v26  ;;  %v2416_v26 = vld [vmem:[%s3310_s1 + $0xc0] sm:$0xff]  }
  0xfe   :  { %2259 = vmatprep.subr.bf16.mxu0 %v3372_v28  ;;  %2122 = vmatprep.subr.bf16.mxu1 %v3384_v5  ;;  %v2406_v5 = vld [vmem:[%s3311_s0 + $0xec] ss:$36 sps:$4 sm:$0xff]  }
 0x101   :  { %2260 = vmatpush3.bf16.msra.mxu0 %v2932_v18  ;;  %2123 = vmatpush3.bf16.msra.mxu1 %v2636_v30  ;;  %v2417_v30 = vld [vmem:[%s3310_s1 + $0x80] sm:$0xff]  }
 0x102   :  { %2130 = vmatprep.subr.bf16.mxu0 %v2416_v26  ;;  %2152 = vmatprep.subr.bf16.mxu1 %v2661_v36  ;;  %v2418_v36 = vld [vmem:[%s3310_s1 + $0xc8] sm:$0xff]  }
 0x104   :  { %2262 = vmatmul.mubr.bf16.vlgmr.msra.gmra.mrb[28].mxu0 %v2397_v20  ;;  %1470 = vmatmul.mubr.bf16.vlgmr.msra.gmra.mrb[28].mxu1 %v2398_v3 }
 0x105   :  { %2131 = vmatpush3.bf16.msra.mxu0 %v2417_v30  ;;  %2153 = vmatpush3.bf16.msra.mxu1 %v2672_v38  ;;  %v2420_v38 = vld [vmem:[%s3310_s1 + $0xd0] sm:$0xff]  }
 0x106   :  { %2132 = vmatprep.subr.bf16.mxu0 %v2418_v36  ;;  %2154 = vmatprep.subr.bf16.mxu1 %v2684_v40  ;;  %v2421_v40 = vld [vmem:[%s3310_s1 + $0x90] sm:$0xff]  }
 0x107   :  { %1510 = vmatprep.mubr.bf16.mxu0 %v2403_v4  ;;  %1551 = vmatprep.mubr.bf16.mxu1 %v2406_v5 }
 0x109   :  { %2133 = vmatpush3.bf16.msra.mxu0 %v2419_v21  ;;  %2155 = vmatpush3.bf16.msra.mxu1 %v2696_v42  ;;  %v2423_v42 = vld [vmem:[%s3310_s1 + $0x98] sm:$0xff]  }
 0x10a   :  { %2134 = vmatprep.subr.bf16.mxu0 %v2420_v38  ;;  %2156 = vmatprep.subr.bf16.mxu1 %v2708_v44  ;;  %v2424_v44 = vld [vmem:[%s3310_s1 + $0xe0] sm:$0xff]  }
 0x10d   :  { %2135 = vmatpush3.bf16.msra.mxu0 %v2421_v40  ;;  %2157 = vmatpush3.bf16.msra.mxu1 %v2720_v46  ;;  %v2425_v46 = vld [vmem:[%s3310_s1 + $0xa0] sm:$0xff]  }
 0x10e   :  { %2136 = vmatprep.subr.bf16.mxu0 %v2422_v25  ;;  %2158 = vmatprep.subr.bf16.mxu1 %v2732_v48 }
 0x111   :  { %2137 = vmatpush3.bf16.msra.mxu0 %v2423_v42  ;;  %2159 = vmatpush3.bf16.msra.mxu1 %v2744_v50 }
 0x112   :  { %2138 = vmatprep.subr.bf16.mxu0 %v2424_v44  ;;  %2160 = vmatprep.subr.bf16.mxu1 %v2756_v52  ;;  %v2427_v52 = vld [vmem:[%s3310_s1 + $0xa8] sm:$0xff]  }
 0x115   :  { %2139 = vmatpush3.bf16.msra.mxu0 %v2425_v46  ;;  %2161 = vmatpush3.bf16.msra.mxu1 %v2768_v54 }
 0x116   :  { %v1877_v48 = vpop.f32.mrb[4].mxu0  ;;  %2140 = vmatprep.subr.bf16.mxu0 %v2426_v27  ;;  %2162 = vmatprep.subr.bf16.mxu1 %v2780_v56  ;;  %v2428_v56 = vld [vmem:[%s3310_s1 + $0xf0] sm:$0xff]  }
 0x117   :  { %v1878_v50 = vpop.f32.mrb[5].mxu0  ;;  %v1899_v6 = vpop.f32.mrb[4].mxu1 }
 0x118   :  { %v1879_v55 = vadd.f32 %v1878_v50, %v1877_v48  ;;  %v1880_v0 = vpop.f32.mrb[6].mxu0  ;;  %v1900_v7 = vpop.f32.mrb[5].mxu1 }
 0x119   :  { %2141 = vmatpush3.bf16.msra.mxu0 %v2427_v52  ;;  %v1881_v1 = vpop.f32.mrb[7].mxu0  ;;  %v1901_v8 = vadd.f32 %v1900_v7, %v1899_v6  ;;  %v1902_v9 = vpop.f32.mrb[6].mxu1  ;;  %2163 = vmatpush3.bf16.msra.mxu1 %v2792_v58  ;;  %v2430_v58 = vld [vmem:[%s3310_s1 + $0xf8] sm:$0xff]  }
 0x11a   :  { %v764_v54 = vadd.f32 %v1879_v55, %v3157_v16  ;;  %v1882_v12 = vadd.f32 %v1881_v1, %v1880_v0  ;;  %2142 = vmatprep.subr.bf16.mxu0 %v2428_v56  ;;  %v1903_v10 = vpop.f32.mrb[7].mxu1  ;;  %2164 = vmatprep.subr.bf16.mxu1 %v2804_v60  ;;  %v2429_v16 = vld [vmem:[%s3310_s1 + $0xb0] sm:$0xff]   ;;  %v2401_v60 = vld [vmem:[%s3311_s0 + $0xe0] ss:$36 sps:$4 sm:$0xff]  }
 0x11b   :  { %v1904_v11 = vadd.f32 %v1903_v10, %v1902_v9 }
 0x11c   :  { %v767_v14 = vadd.f32 %v1882_v12, %v3162_v2  ;;  %v805_v15 = vadd.f32 %v1901_v8, %v764_v54  ;;  %v2431_v2 = vld [vmem:[%s3310_s1 + $0xb8] sm:$0xff]  }
 0x11d   :  { %2143 = vmatpush3.bf16.msra.mxu0 %v2429_v16  ;;  %2165 = vmatpush3.bf16.msra.mxu1 %v2816_v62  ;;  %v2404_v62 = vld [vmem:[%s3311_s0 + $0xe8] ss:$36 sps:$4 sm:$0xff]  }
 0x11e   :  { %2144 = vmatprep.subr.bf16.mxu0 %v2430_v58  ;;  %v808_v20 = vadd.f32 %v1904_v11, %v767_v14  ;;  %2166 = vmatprep.subr.bf16.mxu1 %v2828_v32  ;;  %v2409_v32 = vld [vmem:[%s3311_s0 + $0xf4] ss:$36 sps:$4 sm:$0xff]  }
 0x121   :  { %2145 = vmatpush3.bf16.msra.mxu0 %v2431_v2  ;;  %2167 = vmatpush3.bf16.msra.mxu1 %v2840_v34 }
 0x122   :  { %2174 = vmatprep.subr.bf16.mxu0 %v2666_v37  ;;  %2265 = vmatprep.subr.bf16.mxu1 %v3372_v28 }
 0x124   :  { %1511 = vmatmul.mubr.bf16.vlgmr.msra.gmra.mrb[32].mxu0 %v2401_v60  ;;  %1552 = vmatmul.mubr.bf16.vlgmr.msra.gmra.mrb[32].mxu1 %v2404_v62 }
 0x125   :  { %2175 = vmatpush3.bf16.msra.mxu0 %v2678_v39  ;;  %2266 = vmatpush3.bf16.msra.mxu1 %v3385_v17 }
 0x126   :  { %2176 = vmatprep.subr.bf16.mxu0 %v2690_v41  ;;  %2267 = vmatprep.subr.bf16.mxu1 %v3372_v28 }
 0x127   :  { %1592 = vmatprep.mubr.bf16.mxu0 %v2409_v32  ;;  %2281 = vmatprep.mubr.msk.bf16.mxu1 %vm2433_vm0, %v3372_v28 }
 0x129   :  { %2177 = vmatpush3.bf16.msra.mxu0 %v2702_v43  ;;  %2268 = vmatpush3.bf16.msra.mxu1 %v3386_v23 }
 0x12a   :  { %2178 = vmatprep.subr.bf16.mxu0 %v2714_v45  ;;  %2269 = vmatprep.subr.bf16.mxu1 %v3372_v28 }
 0x12d   :  { %2179 = vmatpush3.bf16.msra.mxu0 %v2726_v47  ;;  %2270 = vmatpush3.bf16.msra.mxu1 %v3387_v29 }
 0x12e   :  { %2180 = vmatprep.subr.bf16.mxu0 %v2738_v49  ;;  %2271 = vmatprep.subr.bf16.mxu1 %v3372_v28 }
 0x131   :  { %2181 = vmatpush3.bf16.msra.mxu0 %v2750_v51  ;;  %2272 = vmatpush3.bf16.msra.mxu1 %v3388_v31 }
 0x132   :  { %2182 = vmatprep.subr.bf16.mxu0 %v2762_v53  ;;  %2273 = vmatprep.subr.bf16.mxu1 %v3372_v28 }
 0x135   :  { %2183 = vmatpush3.bf16.msra.mxu0 %v3373_v22  ;;  %2274 = vmatpush3.bf16.msra.mxu1 %v3389_v63 }
 0x136   :  { %2184 = vmatprep.subr.bf16.mxu0 %v3374_v24  ;;  %2275 = vmatprep.subr.bf16.mxu1 %v3372_v28 }
 0x137   :  { %v845_v37 = vpop.f32.mrb[8].mxu0  ;;  %v1930_v43 = vpop.f32.mrb[8].mxu1 }
 0x138   :  { %v3282_v39 = vadd.f32 %v845_v37, %v805_v15  ;;  %v2223_v41 = vpop.f32.mrb[9].mxu0  ;;  %v1931_v47 = vpop.f32.mrb[9].mxu1 }
 0x139   :  { %v848_v45 = vpop.f32.mrb[10].mxu0  ;;  %2185 = vmatpush3.bf16.msra.mxu0 %v3375_v59  ;;  %v1932_v53 = vadd.f32 %v1931_v47, %v1930_v43  ;;  %2276 = vmatpush3.bf16.msra.mxu1 %v3390_v13  ;;  %v1933_v34 = vpop.f32.mrb[10].mxu1  ;;  %v2407_v59 = vld [vmem:[%s3311_s0 + $0xf0] ss:$36 sps:$4 sm:$0xff]  }
 0x13a   :  { %v3285_v49 = vadd.f32 %v848_v45, %v808_v20  ;;  %v2224_v51 = vpop.f32.mrb[11].mxu0  ;;  %2186 = vmatprep.subr.bf16.mxu0 %v3376_v57  ;;  %v1934_v22 = vpop.f32.mrb[11].mxu1  ;;  %2277 = vmatprep.subr.bf16.mxu1 %v3372_v28  ;;  %v2410_v57 = vld [vmem:[%s3311_s0 + $0xf8] ss:$36 sps:$4 sm:$0xff]  }
 0x13b   :  { %v1935_v24 = vadd.f32 %v1934_v22, %v1933_v34 }
 0x13d   :  { %2187 = vmatpush3.bf16.msra.mxu0 %v3377_v33  ;;  %2278 = vmatpush3.bf16.msra.mxu1 %v3391_v19 }
 0x13e   :  { %2188 = vmatprep.subr.bf16.mxu0 %v3378_v61  ;;  %2279 = vmatprep.subr.bf16.mxu1 %v3372_v28 }
 0x141   :  { %2189 = vmatpush3.bf16.msra.mxu0 %v2846_v35  ;;  %2280 = vmatpush3.bf16.msra.mxu1 %v2932_v18 }
 0x144   :  { %1593 = vmatmul.mubr.bf16.vlgmr.msra.gmra.mrb[36].mxu0 %v2407_v59  ;;  %2282 = vmatmul.mubr.bf16.vlgmr.msra.gmra.mrb[36].mxu1 %v2410_v57 }
 0x157   :  { %v1952_v33 = vpop.f32.mrb[12].mxu0  ;;  %v1974_v23 = vpop.f32.mrb[12].mxu1 }
 0x158   :  { %v1953_v17 = vpop.f32.mrb[13].mxu0  ;;  %v1975_v28 = vpop.f32.mrb[13].mxu1 }
 0x159   :  { %v1954_v61 = vadd.f32 %v1953_v17, %v1952_v33  ;;  %v1955_v29 = vpop.f32.mrb[14].mxu0  ;;  %v1976_v63 = vadd.f32 %v1975_v28, %v1974_v23  ;;  %v1977_v13 = vpop.f32.mrb[14].mxu1 }
 0x15a   :  { %v1956_v31 = vpop.f32.mrb[15].mxu0  ;;  %v1978_v35 = vpop.f32.mrb[15].mxu1 }
 0x15b   :  { %v985_v19 = vadd.f32 %v1954_v61, %v1932_v53  ;;  %v1957_v3 = vadd.f32 %v1956_v31, %v1955_v29  ;;  %v1979_v26 = vadd.f32 %v1978_v35, %v1977_v13 }
 0x15d   :  { %v988_v4 = vadd.f32 %v1957_v3, %v1935_v24  ;;  %v1026_v5 = vadd.f32 %v1976_v63, %v985_v19 }
 0x15f   :  { %v1029_v30 = vadd.f32 %v1979_v26, %v988_v4 }
 0x177   :  { %v1996_v36 = vpop.f32.mrb[16].mxu0  ;;  %v1107_v21 = vpop.f32.mrb[16].mxu1 }
 0x178   :  { %v1997_v18 = vpop.f32.mrb[17].mxu0  ;;  %v2243_v25 = vpop.f32.mrb[17].mxu1 }
 0x179   :  { %v1998_v38 = vadd.f32 %v1997_v18, %v1996_v36  ;;  %v1999_v40 = vpop.f32.mrb[18].mxu0  ;;  %v1110_v44 = vpop.f32.mrb[18].mxu1 }
 0x17a   :  { %v2000_v42 = vpop.f32.mrb[19].mxu0  ;;  %v2244_v27 = vpop.f32.mrb[19].mxu1 }
 0x17b   :  { %v2001_v46 = vadd.f32 %v2000_v42, %v1999_v40  ;;  %v1067_v48 = vadd.f32 %v1998_v38, %v1026_v5 }
 0x17d   :  { %v1108_v50 = vadd.f32 %v1107_v21, %v1067_v48  ;;  %v1070_v55 = vadd.f32 %v2001_v46, %v1029_v30 }
 0x17f   :  { %v1114_v0 = vmax.f32 %v3282_v39, %v1108_v50  ;;  %v1111_v6 = vadd.f32 %v1110_v44, %v1070_v55 }
 0x181   :  { %v1115_v52 = vmax.f32 %v3285_v49, %v1111_v6 }
 0x197   :  { %v2027_v1 = vpop.f32.mrb[20].mxu0  ;;  %v2049_v7 = vpop.f32.mrb[20].mxu1 }
 0x198   :  { %v2028_v54 = vpop.f32.mrb[21].mxu0  ;;  %v2050_v8 = vpop.f32.mrb[21].mxu1 }
 0x199   :  { %v2029_v12 = vadd.f32 %v2028_v54, %v2027_v1  ;;  %v2030_v9 = vpop.f32.mrb[22].mxu0  ;;  %v2051_v56 = vadd.f32 %v2050_v8, %v2049_v7  ;;  %v2052_v10 = vpop.f32.mrb[22].mxu1 }
 0x19a   :  { %v2031_v14 = vpop.f32.mrb[23].mxu0  ;;  %v2053_v15 = vpop.f32.mrb[23].mxu1 }
 0x19b   :  { %v2032_v11 = vadd.f32 %v2031_v14, %v2030_v9  ;;  %v1249_v16 = vadd.f32 %v2051_v56, %v2029_v12  ;;  %v2054_v58 = vadd.f32 %v2053_v15, %v2052_v10 }
 0x19d   :  { %v1252_v20 = vadd.f32 %v2054_v58, %v2032_v11  ;;  %v1807_v11 = vld [vmem:[%s3312_s2] ss:$0 sm:$0xff] }
 0x1b7   :  { %v2071_v60 = vpop.f32.mrb[24].mxu0  ;;  %v2093_v62 = vpop.f32.mrb[24].mxu1 }
 0x1b8   :  { %v2072_v2 = vpop.f32.mrb[25].mxu0  ;;  %v2094_v39 = vpop.f32.mrb[25].mxu1 }
 0x1b9   :  { %v2073_v32 = vadd.f32 %v2072_v2, %v2071_v60  ;;  %v2074_v37 = vpop.f32.mrb[26].mxu0  ;;  %v2095_v43 = vadd.f32 %v2094_v39, %v2093_v62  ;;  %v2096_v45 = vpop.f32.mrb[26].mxu1 }
 0x1ba   :  { %v2075_v41 = vpop.f32.mrb[27].mxu0  ;;  %v2097_v51 = vpop.f32.mrb[27].mxu1 }
 0x1bb   :  { %v1290_v47 = vadd.f32 %v2073_v32, %v1249_v16  ;;  %v2076_v49 = vadd.f32 %v2075_v41, %v2074_v37  ;;  %v2098_v53 = vadd.f32 %v2097_v51, %v2096_v45 }
 0x1bd   :  { %v1293_v34 = vadd.f32 %v2076_v49, %v1252_v20  ;;  %v1331_v22 = vadd.f32 %v2095_v43, %v1290_v47 }
 0x1bf   :  { %v1334_v24 = vadd.f32 %v2098_v53, %v1293_v34 }
 0x1d7   :  { %v1371_v59 = vpop.f32.mrb[28].mxu0  ;;  %v2124_v17 = vpop.f32.mrb[28].mxu1 }
 0x1d8   :  { %v1372_v57 = vadd.f32 %v1371_v59, %v1331_v22  ;;  %v2263_v33 = vpop.f32.mrb[29].mxu0  ;;  %v2125_v61 = vpop.f32.mrb[29].mxu1 }
 0x1d9   :  { %v1374_v23 = vpop.f32.mrb[30].mxu0  ;;  %v2126_v63 = vadd.f32 %v2125_v61, %v2124_v17  ;;  %v2127_v13 = vpop.f32.mrb[30].mxu1 }
 0x1da   :  { %v1378_v29 = vmax.f32 %v1114_v0, %v1372_v57  ;;  %v1375_v28 = vadd.f32 %v1374_v23, %v1334_v24  ;;  %v2264_v31 = vpop.f32.mrb[31].mxu0  ;;  %v2128_v19 = vpop.f32.mrb[31].mxu1 }
 0x1db   :  { %v2129_v35 = vadd.f32 %v2128_v19, %v2127_v13 }
 0x1dc   :  { %v1379_v3 = vmax.f32 %v1115_v52, %v1375_v28 }
 0x1f7   :  { %v2146_v26 = vpop.f32.mrb[32].mxu0  ;;  %v2168_v5 = vpop.f32.mrb[32].mxu1 }
 0x1f8   :  { %v2147_v4 = vpop.f32.mrb[33].mxu0  ;;  %v2169_v18 = vpop.f32.mrb[33].mxu1 }
 0x1f9   :  { %v2148_v30 = vadd.f32 %v2147_v4, %v2146_v26  ;;  %v2149_v36 = vpop.f32.mrb[34].mxu0  ;;  %v2170_v38 = vadd.f32 %v2169_v18, %v2168_v5  ;;  %v2171_v40 = vpop.f32.mrb[34].mxu1 }
 0x1fa   :  { %v2150_v21 = vpop.f32.mrb[35].mxu0  ;;  %v2172_v44 = vpop.f32.mrb[35].mxu1 }
 0x1fb   :  { %v1513_v25 = vadd.f32 %v2148_v30, %v2126_v63  ;;  %v2151_v42 = vadd.f32 %v2150_v21, %v2149_v36  ;;  %v2173_v46 = vadd.f32 %v2172_v44, %v2171_v40 }
 0x1fd   :  { %v1516_v48 = vadd.f32 %v2151_v42, %v2129_v35  ;;  %v1554_v27 = vadd.f32 %v2170_v38, %v1513_v25 }
 0x1ff   :  { %v1557_v50 = vadd.f32 %v2173_v46, %v1516_v48 }
 0x217   :  { %v2190_v55 = vpop.f32.mrb[36].mxu0  ;;  %v1635_v6 = vpop.f32.mrb[36].mxu1 }
 0x218   :  { %v2191_v0 = vpop.f32.mrb[37].mxu0  ;;  %v2283_v7 = vpop.f32.mrb[37].mxu1 }
 0x219   :  { %v2192_v52 = vadd.f32 %v2191_v0, %v2190_v55  ;;  %v2193_v1 = vpop.f32.mrb[38].mxu0  ;;  %v1638_v12 = vpop.f32.mrb[38].mxu1 }
 0x21a   :  { %v2194_v54 = vpop.f32.mrb[39].mxu0  ;;  %v2284_v56 = vpop.f32.mrb[39].mxu1 }
 0x21b   :  { %v1595_v8 = vadd.f32 %v2192_v52, %v1554_v27  ;;  %v2195_v9 = vadd.f32 %v2194_v54, %v2193_v1 }
 0x21d   :  { %v1636_v10 = vadd.f32 %v1635_v6, %v1595_v8  ;;  %v1598_v14 = vadd.f32 %v2195_v9, %v1557_v50 }
 0x21f   :  { %v1642_v15 = vmax.f32 %v1378_v29, %v1636_v10  ;;  %v1639_v16 = vadd.f32 %v1638_v12, %v1598_v14 }
 0x221   :  { %v1651_v58 = vadd.f32 %v1807_v11, %v1642_v15  ;;  %v1643_v20 = vmax.f32 %v1379_v3, %v1639_v16 }
 0x223   :  { %v1652_v60 = vadd.f32 %v1807_v11, %v1643_v20  ;;  %v1653_v2 = vmax.f32 %v1651_v58, 0.0 }
 0x225   :  { %v1654_v62 = vmax.f32 %v1652_v60, 0.0 }
 0x227   :  { %v1815_v32 = vpack.c.bf16 %v1654_v62, %v1653_v2 }
 0x229   :  { %1816 = vst [vmem:[%s3313_s3] sm:$0xff] %v1815_v32  }

</bundles_post_ra>
